<compile_context>
chip_gen: v7x
topology: tpu7x:2x2x1
jax: 0.10.0
libtpu: 0.0.40
codegen_flags: <defaults>
</compile_context>

<pallas_src>
import functools

import jax
import jax.numpy as jnp
from jax.experimental import pallas as pl
from jax.experimental.pallas import tpu as pltpu

EPS = 1e-5          # nn.InstanceNorm2d default
NEG_SLOPE = 0.01    # nn.LeakyReLU default
CPAD = 128          # lane-dense channel / contraction padding


def _round_up(x, m):
    return (x + m - 1) // m * m


# ------------------------------ kernel helpers ------------------------------

def _instance_norm(y, mask, inv_count):
    """Masked single-pass InstanceNorm over the interior rows of y (f32).

    NOTE: sum / sum-of-squares in f32 can lose precision when |mean| >> std;
    fine at the 8% check tolerance used here.
    """
    y = y * mask                                   # zero garbage border rows
    s1 = jnp.sum(y, axis=0, keepdims=True)         # (1, C)
    s2 = jnp.sum(y * y, axis=0, keepdims=True)     # (1, C)
    mean = s1 * inv_count
    var = jnp.maximum(s2 * inv_count - mean * mean, 0.0)
    return (y - mean) * jax.lax.rsqrt(var + EPS)


def _leaky(y):
    return jnp.where(y >= 0, y, NEG_SLOPE * y)


# ----------------------------- fused block kernel ----------------------------

def _block_kernel(p_ref, mask_ref, w0_ref, ws_ref, o_ref, act_ref, h_ref, *,
                  sp, ext, wpad, hidden, n_layers, inv_count):
    """Entire EncoderResidualBlock for one batch sample, fully fused in VMEM.

    Activation layout: flattened zero-bordered (Ho+2, Wpad) grid with `ext`
    zero guard rows at both ends; channels replicated into 9 lane groups of
    size `hidden` (lanes [t*hidden, (t+1)*hidden) all hold the same channels),
    so the next conv's im2col is just 9 row-shifted lane-masked selects.
    """
    mask = mask_ref[...]                                           # (sp, 1) f32

    # Zero only the guard bands; interior rows are fully overwritten below.
    zg = jnp.zeros((ext, CPAD), jnp.bfloat16)
    for buf in (act_ref, h_ref):
        buf[pl.ds(0, ext), :] = zg
        buf[pl.ds(ext + sp, ext), :] = zg

    # Lane-group masks for the folded-taps im2col (hoisted out of the loops).
    lane = jax.lax.broadcasted_iota(jnp.int32, (1, CPAD), 1)
    group_masks = [(lane >= t * hidden) & (lane < (t + 1) * hidden)
                   for t in range(9)]

    def im2col(src_ref):
        # Fold the 9 taps into K: lane group t <- activation shifted by tap t.
        acc = jnp.zeros((sp, CPAD), jnp.bfloat16)
        for t in range(9):
            dy, dx = divmod(t, 3)
            off = ext + (dy - 1) * wpad + (dx - 1)      # static offset
            acc = jnp.where(group_masks[t], src_ref[pl.ds(off, sp), :], acc)
        return acc

    patches = p_ref[0]                                  # (sp, KP0) bf16

    for l in range(n_layers):
        # ---- conv1 (+ IN + LeakyReLU) ----
        if l == 0:          # 3x3 / stride-2 via pre-built im2col patches
            y1 = jnp.dot(patches, w0_ref[0], preferred_element_type=jnp.float32)
        else:               # 3x3 / stride-1, single folded matmul from VMEM
            y1 = jnp.dot(im2col(act_ref), ws_ref[2 * l - 1],
                         preferred_element_type=jnp.float32)
        h = _leaky(_instance_norm(y1, mask, inv_count)) * mask
        h_ref[pl.ds(ext, sp), :] = h.astype(jnp.bfloat16)   # one cast on store

        # ---- conv2 (+ IN) ----
        w2_idx = 0 if l == 0 else 2 * l
        y2 = jnp.dot(im2col(h_ref), ws_ref[w2_idx],
                     preferred_element_type=jnp.float32)
        y2 = _instance_norm(y2, mask, inv_count)

        # ---- identity path ----
        if l == 0:          # 1x1 / stride-2 conv (+ IN); reuses the patches
            yd = jnp.dot(patches, w0_ref[1], preferred_element_type=jnp.float32)
            identity = _instance_norm(yd, mask, inv_count)
        else:               # plain residual: the layer input (interior rows)
            identity = act_ref[pl.ds(ext, sp), :].astype(jnp.float32)

        out = _leaky(y2 + identity) * mask              # masked border stays 0
        if l == n_layers - 1:
            o_ref[0, :, :] = out                        # lane-dense f32 store
        else:
            act_ref[pl.ds(ext, sp), :] = out.astype(jnp.bfloat16)


# ------------------------------ compiler params -------------------------------

def _compiler_params():
    cap = None
    try:
        cap = getattr(pltpu.get_tpu_info(), "vmem_capacity_bytes", None)
    except Exception:
        cap = None
    if not cap:
        cap = 64 * 1024 * 1024                 # conservative: fits every gen
    limit = min((cap * 3) // 4, 100 * 1024 * 1024)   # ~96 MiB v5e/v6e, ~48 MiB v7x
    return pltpu.CompilerParams(
        dimension_semantics=("parallel",),     # batch across TCs (v7x megacore)
        vmem_limit_bytes=int(limit))


# ------------------------------ weight packing --------------------------------

def _rep_cols(w2d, hidden):
    """(K, hidden) f32 -> (K, CPAD) bf16 with the output channels replicated
    into 9 lane groups (the matmul output lands directly in the replicated
    layout consumed by the next folded im2col)."""
    rep = jnp.concatenate([w2d] * 9, axis=1)                    # (K, 9*hidden)
    return jnp.pad(rep, ((0, 0), (0, CPAD - 9 * hidden))).astype(jnp.bfloat16)


def _prep_3x3(w_hwio, hidden):
    """3x3/stride-1 conv weight -> (CPAD, CPAD) folded im2col matrix."""
    base = w_hwio.reshape(9 * hidden, hidden)        # row = tap*hidden + c_in
    rep = _rep_cols(base, hidden)
    return jnp.pad(rep, ((0, CPAD - 9 * hidden), (0, 0)))


# ------------------------------ plain-JAX glue ---------------------------------

def encoder_residual_block(x_nchw, params, hidden):
    """Mirrors EncoderResidualBlock(downsample_method='conv').forward (NCHW)."""
    x = jnp.transpose(x_nchw, (0, 2, 3, 1)).astype(jnp.float32)      # NHWC
    n, h, w, cin = x.shape
    assert h % 2 == 0 and w % 2 == 0
    assert 9 * hidden <= CPAD, "folded-tap path needs 9*hidden <= 128"
    ho, wo = h // 2, w // 2
    wpad = _round_up(wo + 2, 8)          # dy tap shifts sublane-aligned
    sp = (ho + 2) * wpad
    ext = wpad + 8                       # 8-aligned guard covering +-(wpad+1)
    sext = sp + 2 * ext
    kp0 = _round_up(9 * cin, 128)
    n_layers = len(params)

    # Interior mask on the flattened padded (Ho+2, Wpad) grid.
    mask = jnp.pad(jnp.ones((ho, wo), jnp.float32),
                   ((1, 1), (1, wpad - wo - 1))).reshape(sp, 1)

    # JAX-side im2col for the layer-0 stride-2 conv (padded-flat layout).
    xp = jnp.pad(x, ((0, 0), (1, 1), (1, 1), (0, 0)))
    taps = [xp[:, dy:dy + 2 * ho:2, dx:dx + 2 * wo:2, :]
            for dy in range(3) for dx in range(3)]
    patches = jnp.stack(taps, axis=3).reshape(n, ho, wo, 9 * cin)
    patches = jnp.pad(patches,
                      ((0, 0), (1, 1), (1, wpad - wo - 1), (0, kp0 - 9 * cin)))
    patches = patches.reshape(n, sp, kp0).astype(jnp.bfloat16)

    # Kernel-layout weights.
    w1_0 = _rep_cols(params[0]["w1_hwio"].reshape(9 * cin, hidden), hidden)
    w1_0 = jnp.pad(w1_0, ((0, kp0 - 9 * cin), (0, 0)))
    wd_0 = _rep_cols(params[0]["wd_hwio"].reshape(cin, hidden), hidden)
    wd_0 = jnp.pad(wd_0, ((4 * cin, kp0 - 5 * cin), (0, 0)))   # centre-tap rows
    w0 = jnp.stack([w1_0, wd_0], axis=0)                       # (2, kp0, CPAD)

    ws_list = [_prep_3x3(params[0]["w2_hwio"], hidden)]
    for p in params[1:]:
        ws_list.append(_prep_3x3(p["w1_hwio"], hidden))
        ws_list.append(_prep_3x3(p["w2_hwio"], hidden))
    ws = jnp.stack(ws_list, axis=0)                            # (2L-1, 128, 128)

    kernel = functools.partial(_block_kernel, sp=sp, ext=ext, wpad=wpad,
                               hidden=hidden, n_layers=n_layers,
                               inv_count=1.0 / (ho * wo))
    out = pl.pallas_call(
        kernel,
        out_shape=jax.ShapeDtypeStruct((n, sp, CPAD), jnp.float32),
        grid=(n,),
        in_specs=[
            pl.BlockSpec((1, sp, kp0), lambda i: (i, 0, 0)),
            pl.BlockSpec((sp, 1), lambda i: (0, 0)),
            pl.BlockSpec((2, kp0, CPAD), lambda i: (0, 0, 0)),
            pl.BlockSpec((2 * n_layers - 1, CPAD, CPAD), lambda i: (0, 0, 0)),
        ],
        out_specs=pl.BlockSpec((1, sp, CPAD), lambda i: (i, 0, 0)),
        scratch_shapes=[pltpu.VMEM((sext, CPAD), jnp.bfloat16),   # act ping
                        pltpu.VMEM((sext, CPAD), jnp.bfloat16)],  # h staging
        compiler_params=_compiler_params(),
    )(patches, mask, w0, ws)

    out = out[:, :, :hidden].reshape(n, ho + 2, wpad, hidden)
    out = out[:, 1:ho + 1, 1:wo + 1, :]
    return jnp.transpose(out, (0, 3, 1, 2))                          # NCHW


# ------------------------------ parameter init ---------------------------------

def init_block_params(key, in_channels, hidden_channels, layers):
    params = []
    for i in range(layers):
        k1, k2, kd, key = jax.random.split(key, 4)
        cin = in_channels if i == 0 else hidden_channels
        layer = {
            "w1_hwio": jax.random.normal(
                k1, (3, 3, cin, hidden_channels), jnp.float32) * 0.1,
            "w2_hwio": jax.random.normal(
                k2, (3, 3, hidden_channels, hidden_channels), jnp.float32) * 0.1,
        }
        if i == 0:
            layer["wd_hwio"] = jax.random.normal(
                kd, (1, 1, cin, hidden_channels), jnp.float32) * 0.1
        params.append(layer)
    return params


# ------------------------------ pure-JAX reference ------------------------------

def _conv2d_ref(x, w_hwio, stride, padding):
    return jax.lax.conv_general_dilated(
        x, w_hwio, window_strides=(stride, stride),
        padding=((padding, padding), (padding, padding)),
        dimension_numbers=("NHWC", "HWIO", "NHWC"))


def _instance_norm_ref(y):
    mean = jnp.mean(y, axis=(1, 2), keepdims=True)
    var = jnp.mean((y - mean) ** 2, axis=(1, 2), keepdims=True)
    return (y - mean) * jax.lax.rsqrt(var + EPS)


def encoder_residual_block_ref(x_nchw, params):
    x = jnp.transpose(x_nchw, (0, 2, 3, 1))
    for i, p in enumerate(params):
        downsample = i == 0
        y = _leaky(_instance_norm_ref(
            _conv2d_ref(x, p["w1_hwio"], 2 if downsample else 1, 1)))
        y = _instance_norm_ref(_conv2d_ref(y, p["w2_hwio"], 1, 1))
        idn = (_instance_norm_ref(_conv2d_ref(x, p["wd_hwio"], 2, 0))
               if downsample else x)
        x = _leaky(y + idn)
    return jnp.transpose(x, (0, 3, 1, 2))


# ----------------------------------- main ----------------------------------------

if __name__ == "__main__":
    key = jax.random.PRNGKey(0)
    kx, kp = jax.random.split(key)

    N, C_IN, H, W = 2, 4, 16, 16
    HIDDEN, LAYERS = 8, 2

    x = jax.random.normal(kx, (N, C_IN, H, W), jnp.float32)   # NCHW like PyTorch
    params = init_block_params(kp, C_IN, HIDDEN, LAYERS)

    run = jax.jit(functools.partial(encoder_residual_block, hidden=HIDDEN))
    out = jax.block_until_ready(run(x, params))

    assert out.shape == (N, HIDDEN, H // 2, W // 2), out.shape
    assert out.dtype == jnp.float32

    # Numerical check vs. a pure-JAX f32 reference (loose tol: bf16 MXU inputs
    # and bf16 inter-layer activations).
    ref = encoder_residual_block_ref(x, params)
    err = float(jnp.max(jnp.abs(out - ref)) / (jnp.max(jnp.abs(ref)) + 1e-6))
    assert err < 0.08, f"kernel/reference mismatch: rel-max err = {err:.4f}"

    print("KERNEL_OK")
</pallas_src>

<mosaic_0001>
module attributes {stable_mosaic.version = 11 : i64} {
  func.func @_block_kernel(%arg0: i32, %arg1: memref<1x160x128xbf16, #tpu.memory_space<vmem>>, %arg2: memref<160x1xf32, #tpu.memory_space<vmem>>, %arg3: memref<2x128x128xbf16, #tpu.memory_space<vmem>>, %arg4: memref<3x128x128xbf16, #tpu.memory_space<vmem>>, %arg5: memref<1x160x128xf32, #tpu.memory_space<vmem>>, %arg6: memref<208x128xbf16, #tpu.memory_space<vmem>>, %arg7: memref<208x128xbf16, #tpu.memory_space<vmem>>) attributes {dimension_semantics = [#tpu.dimension_semantics<parallel>], iteration_bounds = array<i64: 2>, scalar_prefetch = 0 : i64, scratch_operands = 2 : i64, tpu.core_type = #tpu.core_type<tc>, window_params = [{transform_indices = @transform_0, window_bounds = array<i64: 1, 160, 128>}, {pipeline_mode = #tpu.pipeline_mode<synchronous>, transform_indices = @transform_1, window_bounds = array<i64: 160, 1>}, {pipeline_mode = #tpu.pipeline_mode<synchronous>, transform_indices = @transform_2, window_bounds = array<i64: 2, 128, 128>}, {pipeline_mode = #tpu.pipeline_mode<synchronous>, transform_indices = @transform_3, window_bounds = array<i64: 3, 128, 128>}, {transform_indices = @transform_4, window_bounds = array<i64: 1, 160, 128>}]} {
    %c0 = arith.constant 0 : index
    %c0_0 = arith.constant 0 : index
    %0 = vector.load %arg2[%c0, %c0_0] : memref<160x1xf32, #tpu.memory_space<vmem>>, vector<160x1xf32>
    %cst = arith.constant 0.000000e+00 : bf16
    %1 = vector.broadcast %cst : bf16 to vector<24x128xbf16>
    %c0_1 = arith.constant 0 : index
    %c0_2 = arith.constant 0 : index
    %2 = vector.load %arg6[%c0_1, %c0_2] : memref<208x128xbf16, #tpu.memory_space<vmem>>, vector<24x128xbf16>
    tpu.vector_store %arg6[%c0_1, %c0_2], %1 {strides = array<i32>} : memref<208x128xbf16, #tpu.memory_space<vmem>>, vector<24x128xbf16>,
    %c184 = arith.constant 184 : index
    %c0_3 = arith.constant 0 : index
    %3 = vector.load %arg6[%c184, %c0_3] : memref<208x128xbf16, #tpu.memory_space<vmem>>, vector<24x128xbf16>
    tpu.vector_store %arg6[%c184, %c0_3], %1 {strides = array<i32>} : memref<208x128xbf16, #tpu.memory_space<vmem>>, vector<24x128xbf16>,
    %c0_4 = arith.constant 0 : index
    %c0_5 = arith.constant 0 : index
    %4 = vector.load %arg7[%c0_4, %c0_5] : memref<208x128xbf16, #tpu.memory_space<vmem>>, vector<24x128xbf16>
    tpu.vector_store %arg7[%c0_4, %c0_5], %1 {strides = array<i32>} : memref<208x128xbf16, #tpu.memory_space<vmem>>, vector<24x128xbf16>,
    %c184_6 = arith.constant 184 : index
    %c0_7 = arith.constant 0 : index
    %5 = vector.load %arg7[%c184_6, %c0_7] : memref<208x128xbf16, #tpu.memory_space<vmem>>, vector<24x128xbf16>
    tpu.vector_store %arg7[%c184_6, %c0_7], %1 {strides = array<i32>} : memref<208x128xbf16, #tpu.memory_space<vmem>>, vector<24x128xbf16>,
    %6 = tpu.iota {dimensions = array<i32: 1>} : vector<1x128xi32>
    %c0_i32 = arith.constant 0 : i32
    %7 = vector.broadcast %c0_i32 : i32 to vector<1x128xi32>
    %8 = arith.cmpi sge, %6, %7 : vector<1x128xi32>
    %c8_i32 = arith.constant 8 : i32
    %9 = vector.broadcast %c8_i32 : i32 to vector<1x128xi32>
    %10 = arith.cmpi slt, %6, %9 : vector<1x128xi32>
    %11 = arith.andi %8, %10 : vector<1x128xi1>
    %c8_i32_8 = arith.constant 8 : i32
    %12 = vector.broadcast %c8_i32_8 : i32 to vector<1x128xi32>
    %13 = arith.cmpi sge, %6, %12 : vector<1x128xi32>
    %c16_i32 = arith.constant 16 : i32
    %14 = vector.broadcast %c16_i32 : i32 to vector<1x128xi32>
    %15 = arith.cmpi slt, %6, %14 : vector<1x128xi32>
    %16 = arith.andi %13, %15 : vector<1x128xi1>
    %c16_i32_9 = arith.constant 16 : i32
    %17 = vector.broadcast %c16_i32_9 : i32 to vector<1x128xi32>
    %18 = arith.cmpi sge, %6, %17 : vector<1x128xi32>
    %c24_i32 = arith.constant 24 : i32
    %19 = vector.broadcast %c24_i32 : i32 to vector<1x128xi32>
    %20 = arith.cmpi slt, %6, %19 : vector<1x128xi32>
    %21 = arith.andi %18, %20 : vector<1x128xi1>
    %c24_i32_10 = arith.constant 24 : i32
    %22 = vector.broadcast %c24_i32_10 : i32 to vector<1x128xi32>
    %23 = arith.cmpi sge, %6, %22 : vector<1x128xi32>
    %c32_i32 = arith.constant 32 : i32
    %24 = vector.broadcast %c32_i32 : i32 to vector<1x128xi32>
    %25 = arith.cmpi slt, %6, %24 : vector<1x128xi32>
    %26 = arith.andi %23, %25 : vector<1x128xi1>
    %c32_i32_11 = arith.constant 32 : i32
    %27 = vector.broadcast %c32_i32_11 : i32 to vector<1x128xi32>
    %28 = arith.cmpi sge, %6, %27 : vector<1x128xi32>
    %c40_i32 = arith.constant 40 : i32
    %29 = vector.broadcast %c40_i32 : i32 to vector<1x128xi32>
    %30 = arith.cmpi slt, %6, %29 : vector<1x128xi32>
    %31 = arith.andi %28, %30 : vector<1x128xi1>
    %c40_i32_12 = arith.constant 40 : i32
    %32 = vector.broadcast %c40_i32_12 : i32 to vector<1x128xi32>
    %33 = arith.cmpi sge, %6, %32 : vector<1x128xi32>
    %c48_i32 = arith.constant 48 : i32
    %34 = vector.broadcast %c48_i32 : i32 to vector<1x128xi32>
    %35 = arith.cmpi slt, %6, %34 : vector<1x128xi32>
    %36 = arith.andi %33, %35 : vector<1x128xi1>
    %c48_i32_13 = arith.constant 48 : i32
    %37 = vector.broadcast %c48_i32_13 : i32 to vector<1x128xi32>
    %38 = arith.cmpi sge, %6, %37 : vector<1x128xi32>
    %c56_i32 = arith.constant 56 : i32
    %39 = vector.broadcast %c56_i32 : i32 to vector<1x128xi32>
    %40 = arith.cmpi slt, %6, %39 : vector<1x128xi32>
    %41 = arith.andi %38, %40 : vector<1x128xi1>
    %c56_i32_14 = arith.constant 56 : i32
    %42 = vector.broadcast %c56_i32_14 : i32 to vector<1x128xi32>
    %43 = arith.cmpi sge, %6, %42 : vector<1x128xi32>
    %c64_i32 = arith.constant 64 : i32
    %44 = vector.broadcast %c64_i32 : i32 to vector<1x128xi32>
    %45 = arith.cmpi slt, %6, %44 : vector<1x128xi32>
    %46 = arith.andi %43, %45 : vector<1x128xi1>
    %c64_i32_15 = arith.constant 64 : i32
    %47 = vector.broadcast %c64_i32_15 : i32 to vector<1x128xi32>
    %48 = arith.cmpi sge, %6, %47 : vector<1x128xi32>
    %c72_i32 = arith.constant 72 : i32
    %49 = vector.broadcast %c72_i32 : i32 to vector<1x128xi32>
    %50 = arith.cmpi slt, %6, %49 : vector<1x128xi32>
    %51 = arith.andi %48, %50 : vector<1x128xi1>
    %c0_16 = arith.constant 0 : index
    %c0_17 = arith.constant 0 : index
    %c0_18 = arith.constant 0 : index
    %52 = vector.load %arg1[%c0_16, %c0_17, %c0_18] : memref<1x160x128xbf16, #tpu.memory_space<vmem>>, vector<1x160x128xbf16>
    %53 = vector.shape_cast %52 : vector<1x160x128xbf16> to vector<160x128xbf16>
    %c0_19 = arith.constant 0 : index
    %c0_20 = arith.constant 0 : index
    %c0_21 = arith.constant 0 : index
    %54 = vector.load %arg3[%c0_19, %c0_20, %c0_21] : memref<2x128x128xbf16, #tpu.memory_space<vmem>>, vector<1x128x128xbf16>
    %55 = vector.shape_cast %54 : vector<1x128x128xbf16> to vector<128x128xbf16>
    %cst_22 = arith.constant dense<0.000000e+00> : vector<160x128xf32>
    %56 = tpu.matmul %53, %55, %cst_22 {dimension_numbers = #tpu.dot_dimension_numbers<[1], [0], [0], [1], [0, 0, 1, 1], [], []>} : vector<160x128xbf16>, vector<128x128xbf16>, vector<160x128xf32> -> vector<160x128xf32>
    %57 = vector.broadcast %0 : vector<160x1xf32> to vector<160x128xf32>
    %58 = arith.mulf %56, %57 : vector<160x128xf32>
    %cst_23 = arith.constant dense<0.000000e+00> : vector<128xf32>
    %59 = vector.multi_reduction <add>, %58, %cst_23 [0] : vector<160x128xf32> to vector<128xf32>
    %60 = vector.shape_cast %59 : vector<128xf32> to vector<1x128xf32>
    %61 = arith.mulf %58, %58 : vector<160x128xf32>
    %cst_24 = arith.constant dense<0.000000e+00> : vector<128xf32>
    %62 = vector.multi_reduction <add>, %61, %cst_24 [0] : vector<160x128xf32> to vector<128xf32>
    %63 = vector.shape_cast %62 : vector<128xf32> to vector<1x128xf32>
    %cst_25 = arith.constant 1.562500e-02 : f32
    %64 = vector.broadcast %cst_25 : f32 to vector<1x128xf32>
    %65 = arith.mulf %60, %64 : vector<1x128xf32>
    %cst_26 = arith.constant 1.562500e-02 : f32
    %66 = vector.broadcast %cst_26 : f32 to vector<1x128xf32>
    %67 = arith.mulf %63, %66 : vector<1x128xf32>
    %68 = arith.mulf %65, %65 : vector<1x128xf32>
    %69 = arith.subf %67, %68 : vector<1x128xf32>
    %cst_27 = arith.constant 0.000000e+00 : f32
    %70 = vector.broadcast %cst_27 : f32 to vector<1x128xf32>
    %71 = arith.maximumf %69, %70 : vector<1x128xf32>
    %72 = vector.broadcast %65 : vector<1x128xf32> to vector<160x128xf32>
    %73 = arith.subf %58, %72 : vector<160x128xf32>
    %cst_28 = arith.constant 9.99999974E-6 : f32
    %74 = vector.broadcast %cst_28 : f32 to vector<1x128xf32>
    %75 = arith.addf %71, %74 : vector<1x128xf32>
    %76 = math.rsqrt %75 : vector<1x128xf32>
    %77 = vector.broadcast %76 : vector<1x128xf32> to vector<160x128xf32>
    %78 = arith.mulf %73, %77 : vector<160x128xf32>
    %cst_29 = arith.constant 0.000000e+00 : f32
    %79 = vector.broadcast %cst_29 : f32 to vector<160x128xf32>
    %80 = arith.cmpf oge, %78, %79 : vector<160x128xf32>
    %cst_30 = arith.constant 0.00999999977 : f32
    %81 = vector.broadcast %cst_30 : f32 to vector<160x128xf32>
    %82 = arith.mulf %81, %78 : vector<160x128xf32>
    %83 = arith.select %80, %78, %82 : vector<160x128xi1>, vector<160x128xf32>
    %84 = vector.broadcast %0 : vector<160x1xf32> to vector<160x128xf32>
    %85 = arith.mulf %83, %84 : vector<160x128xf32>
    %86 = arith.truncf %85 : vector<160x128xf32> to vector<160x128xbf16>
    %c24 = arith.constant 24 : index
    %c0_31 = arith.constant 0 : index
    %87 = vector.load %arg7[%c24, %c0_31] : memref<208x128xbf16, #tpu.memory_space<vmem>>, vector<160x128xbf16>
    tpu.vector_store %arg7[%c24, %c0_31], %86 {strides = array<i32>} : memref<208x128xbf16, #tpu.memory_space<vmem>>, vector<160x128xbf16>,
    %cst_32 = arith.constant 0.000000e+00 : bf16
    %88 = vector.broadcast %cst_32 : bf16 to vector<160x128xbf16>
    %c7 = arith.constant 7 : index
    %c0_33 = arith.constant 0 : index
    %89 = vector.load %arg7[%c7, %c0_33] : memref<208x128xbf16, #tpu.memory_space<vmem>>, vector<160x128xbf16>
    %90 = vector.shape_cast %11 : vector<1x128xi1> to vector<1x128xi1>
    %91 = vector.broadcast %90 : vector<1x128xi1> to vector<160x128xi1>
    %92 = arith.select %91, %89, %88 : vector<160x128xi1>, vector<160x128xbf16>
    %c8 = arith.constant 8 : index
    %c0_34 = arith.constant 0 : index
    %93 = vector.load %arg7[%c8, %c0_34] : memref<208x128xbf16, #tpu.memory_space<vmem>>, vector<160x128xbf16>
    %94 = vector.shape_cast %16 : vector<1x128xi1> to vector<1x128xi1>
    %95 = vector.broadcast %94 : vector<1x128xi1> to vector<160x128xi1>
    %96 = arith.select %95, %93, %92 : vector<160x128xi1>, vector<160x128xbf16>
    %c9 = arith.constant 9 : index
    %c0_35 = arith.constant 0 : index
    %97 = vector.load %arg7[%c9, %c0_35] : memref<208x128xbf16, #tpu.memory_space<vmem>>, vector<160x128xbf16>
    %98 = vector.shape_cast %21 : vector<1x128xi1> to vector<1x128xi1>
    %99 = vector.broadcast %98 : vector<1x128xi1> to vector<160x128xi1>
    %100 = arith.select %99, %97, %96 : vector<160x128xi1>, vector<160x128xbf16>
    %c23 = arith.constant 23 : index
    %c0_36 = arith.constant 0 : index
    %101 = vector.load %arg7[%c23, %c0_36] : memref<208x128xbf16, #tpu.memory_space<vmem>>, vector<160x128xbf16>
    %102 = vector.shape_cast %26 : vector<1x128xi1> to vector<1x128xi1>
    %103 = vector.broadcast %102 : vector<1x128xi1> to vector<160x128xi1>
    %104 = arith.select %103, %101, %100 : vector<160x128xi1>, vector<160x128xbf16>
    %c24_37 = arith.constant 24 : index
    %c0_38 = arith.constant 0 : index
    %105 = vector.load %arg7[%c24_37, %c0_38] : memref<208x128xbf16, #tpu.memory_space<vmem>>, vector<160x128xbf16>
    %106 = vector.shape_cast %31 : vector<1x128xi1> to vector<1x128xi1>
    %107 = vector.broadcast %106 : vector<1x128xi1> to vector<160x128xi1>
    %108 = arith.select %107, %105, %104 : vector<160x128xi1>, vector<160x128xbf16>
    %c25 = arith.constant 25 : index
    %c0_39 = arith.constant 0 : index
    %109 = vector.load %arg7[%c25, %c0_39] : memref<208x128xbf16, #tpu.memory_space<vmem>>, vector<160x128xbf16>
    %110 = vector.shape_cast %36 : vector<1x128xi1> to vector<1x128xi1>
    %111 = vector.broadcast %110 : vector<1x128xi1> to vector<160x128xi1>
    %112 = arith.select %111, %109, %108 : vector<160x128xi1>, vector<160x128xbf16>
    %c39 = arith.constant 39 : index
    %c0_40 = arith.constant 0 : index
    %113 = vector.load %arg7[%c39, %c0_40] : memref<208x128xbf16, #tpu.memory_space<vmem>>, vector<160x128xbf16>
    %114 = vector.shape_cast %41 : vector<1x128xi1> to vector<1x128xi1>
    %115 = vector.broadcast %114 : vector<1x128xi1> to vector<160x128xi1>
    %116 = arith.select %115, %113, %112 : vector<160x128xi1>, vector<160x128xbf16>
    %c40 = arith.constant 40 : index
    %c0_41 = arith.constant 0 : index
    %117 = vector.load %arg7[%c40, %c0_41] : memref<208x128xbf16, #tpu.memory_space<vmem>>, vector<160x128xbf16>
    %118 = vector.shape_cast %46 : vector<1x128xi1> to vector<1x128xi1>
    %119 = vector.broadcast %118 : vector<1x128xi1> to vector<160x128xi1>
    %120 = arith.select %119, %117, %116 : vector<160x128xi1>, vector<160x128xbf16>
    %c41 = arith.constant 41 : index
    %c0_42 = arith.constant 0 : index
    %121 = vector.load %arg7[%c41, %c0_42] : memref<208x128xbf16, #tpu.memory_space<vmem>>, vector<160x128xbf16>
    %122 = vector.shape_cast %51 : vector<1x128xi1> to vector<1x128xi1>
    %123 = vector.broadcast %122 : vector<1x128xi1> to vector<160x128xi1>
    %124 = arith.select %123, %121, %120 : vector<160x128xi1>, vector<160x128xbf16>
    %c0_43 = arith.constant 0 : index
    %c0_44 = arith.constant 0 : index
    %c0_45 = arith.constant 0 : index
    %125 = vector.load %arg4[%c0_43, %c0_44, %c0_45] : memref<3x128x128xbf16, #tpu.memory_space<vmem>>, vector<1x128x128xbf16>
    %126 = vector.shape_cast %125 : vector<1x128x128xbf16> to vector<128x128xbf16>
    %cst_46 = arith.constant dense<0.000000e+00> : vector<160x128xf32>
    %127 = tpu.matmul %124, %126, %cst_46 {dimension_numbers = #tpu.dot_dimension_numbers<[1], [0], [0], [1], [0, 0, 1, 1], [], []>} : vector<160x128xbf16>, vector<128x128xbf16>, vector<160x128xf32> -> vector<160x128xf32>
    %128 = vector.broadcast %0 : vector<160x1xf32> to vector<160x128xf32>
    %129 = arith.mulf %127, %128 : vector<160x128xf32>
    %cst_47 = arith.constant dense<0.000000e+00> : vector<128xf32>
    %130 = vector.multi_reduction <add>, %129, %cst_47 [0] : vector<160x128xf32> to vector<128xf32>
    %131 = vector.shape_cast %130 : vector<128xf32> to vector<1x128xf32>
    %132 = arith.mulf %129, %129 : vector<160x128xf32>
    %cst_48 = arith.constant dense<0.000000e+00> : vector<128xf32>
    %133 = vector.multi_reduction <add>, %132, %cst_48 [0] : vector<160x128xf32> to vector<128xf32>
    %134 = vector.shape_cast %133 : vector<128xf32> to vector<1x128xf32>
    %cst_49 = arith.constant 1.562500e-02 : f32
    %135 = vector.broadcast %cst_49 : f32 to vector<1x128xf32>
    %136 = arith.mulf %131, %135 : vector<1x128xf32>
    %cst_50 = arith.constant 1.562500e-02 : f32
    %137 = vector.broadcast %cst_50 : f32 to vector<1x128xf32>
    %138 = arith.mulf %134, %137 : vector<1x128xf32>
    %139 = arith.mulf %136, %136 : vector<1x128xf32>
    %140 = arith.subf %138, %139 : vector<1x128xf32>
    %cst_51 = arith.constant 0.000000e+00 : f32
    %141 = vector.broadcast %cst_51 : f32 to vector<1x128xf32>
    %142 = arith.maximumf %140, %141 : vector<1x128xf32>
    %143 = vector.broadcast %136 : vector<1x128xf32> to vector<160x128xf32>
    %144 = arith.subf %129, %143 : vector<160x128xf32>
    %cst_52 = arith.constant 9.99999974E-6 : f32
    %145 = vector.broadcast %cst_52 : f32 to vector<1x128xf32>
    %146 = arith.addf %142, %145 : vector<1x128xf32>
    %147 = math.rsqrt %146 : vector<1x128xf32>
    %148 = vector.broadcast %147 : vector<1x128xf32> to vector<160x128xf32>
    %149 = arith.mulf %144, %148 : vector<160x128xf32>
    %c1 = arith.constant 1 : index
    %c0_53 = arith.constant 0 : index
    %c0_54 = arith.constant 0 : index
    %150 = vector.load %arg3[%c1, %c0_53, %c0_54] : memref<2x128x128xbf16, #tpu.memory_space<vmem>>, vector<1x128x128xbf16>
    %151 = vector.shape_cast %150 : vector<1x128x128xbf16> to vector<128x128xbf16>
    %cst_55 = arith.constant dense<0.000000e+00> : vector<160x128xf32>
    %152 = tpu.matmul %53, %151, %cst_55 {dimension_numbers = #tpu.dot_dimension_numbers<[1], [0], [0], [1], [0, 0, 1, 1], [], []>} : vector<160x128xbf16>, vector<128x128xbf16>, vector<160x128xf32> -> vector<160x128xf32>
    %153 = vector.broadcast %0 : vector<160x1xf32> to vector<160x128xf32>
    %154 = arith.mulf %152, %153 : vector<160x128xf32>
    %cst_56 = arith.constant dense<0.000000e+00> : vector<128xf32>
    %155 = vector.multi_reduction <add>, %154, %cst_56 [0] : vector<160x128xf32> to vector<128xf32>
    %156 = vector.shape_cast %155 : vector<128xf32> to vector<1x128xf32>
    %157 = arith.mulf %154, %154 : vector<160x128xf32>
    %cst_57 = arith.constant dense<0.000000e+00> : vector<128xf32>
    %158 = vector.multi_reduction <add>, %157, %cst_57 [0] : vector<160x128xf32> to vector<128xf32>
    %159 = vector.shape_cast %158 : vector<128xf32> to vector<1x128xf32>
    %cst_58 = arith.constant 1.562500e-02 : f32
    %160 = vector.broadcast %cst_58 : f32 to vector<1x128xf32>
    %161 = arith.mulf %156, %160 : vector<1x128xf32>
    %cst_59 = arith.constant 1.562500e-02 : f32
    %162 = vector.broadcast %cst_59 : f32 to vector<1x128xf32>
    %163 = arith.mulf %159, %162 : vector<1x128xf32>
    %164 = arith.mulf %161, %161 : vector<1x128xf32>
    %165 = arith.subf %163, %164 : vector<1x128xf32>
    %cst_60 = arith.constant 0.000000e+00 : f32
    %166 = vector.broadcast %cst_60 : f32 to vector<1x128xf32>
    %167 = arith.maximumf %165, %166 : vector<1x128xf32>
    %168 = vector.broadcast %161 : vector<1x128xf32> to vector<160x128xf32>
    %169 = arith.subf %154, %168 : vector<160x128xf32>
    %cst_61 = arith.constant 9.99999974E-6 : f32
    %170 = vector.broadcast %cst_61 : f32 to vector<1x128xf32>
    %171 = arith.addf %167, %170 : vector<1x128xf32>
    %172 = math.rsqrt %171 : vector<1x128xf32>
    %173 = vector.broadcast %172 : vector<1x128xf32> to vector<160x128xf32>
    %174 = arith.mulf %169, %173 : vector<160x128xf32>
    %175 = arith.addf %149, %174 : vector<160x128xf32>
    %cst_62 = arith.constant 0.000000e+00 : f32
    %176 = vector.broadcast %cst_62 : f32 to vector<160x128xf32>
    %177 = arith.cmpf oge, %175, %176 : vector<160x128xf32>
    %cst_63 = arith.constant 0.00999999977 : f32
    %178 = vector.broadcast %cst_63 : f32 to vector<160x128xf32>
    %179 = arith.mulf %178, %175 : vector<160x128xf32>
    %180 = arith.select %177, %175, %179 : vector<160x128xi1>, vector<160x128xf32>
    %181 = vector.broadcast %0 : vector<160x1xf32> to vector<160x128xf32>
    %182 = arith.mulf %180, %181 : vector<160x128xf32>
    %183 = arith.truncf %182 : vector<160x128xf32> to vector<160x128xbf16>
    %c24_64 = arith.constant 24 : index
    %c0_65 = arith.constant 0 : index
    %184 = vector.load %arg6[%c24_64, %c0_65] : memref<208x128xbf16, #tpu.memory_space<vmem>>, vector<160x128xbf16>
    tpu.vector_store %arg6[%c24_64, %c0_65], %183 {strides = array<i32>} : memref<208x128xbf16, #tpu.memory_space<vmem>>, vector<160x128xbf16>,
    %cst_66 = arith.constant 0.000000e+00 : bf16
    %185 = vector.broadcast %cst_66 : bf16 to vector<160x128xbf16>
    %c7_67 = arith.constant 7 : index
    %c0_68 = arith.constant 0 : index
    %186 = vector.load %arg6[%c7_67, %c0_68] : memref<208x128xbf16, #tpu.memory_space<vmem>>, vector<160x128xbf16>
    %187 = vector.shape_cast %11 : vector<1x128xi1> to vector<1x128xi1>
    %188 = vector.broadcast %187 : vector<1x128xi1> to vector<160x128xi1>
    %189 = arith.select %188, %186, %185 : vector<160x128xi1>, vector<160x128xbf16>
    %c8_69 = arith.constant 8 : index
    %c0_70 = arith.constant 0 : index
    %190 = vector.load %arg6[%c8_69, %c0_70] : memref<208x128xbf16, #tpu.memory_space<vmem>>, vector<160x128xbf16>
    %191 = vector.shape_cast %16 : vector<1x128xi1> to vector<1x128xi1>
    %192 = vector.broadcast %191 : vector<1x128xi1> to vector<160x128xi1>
    %193 = arith.select %192, %190, %189 : vector<160x128xi1>, vector<160x128xbf16>
    %c9_71 = arith.constant 9 : index
    %c0_72 = arith.constant 0 : index
    %194 = vector.load %arg6[%c9_71, %c0_72] : memref<208x128xbf16, #tpu.memory_space<vmem>>, vector<160x128xbf16>
    %195 = vector.shape_cast %21 : vector<1x128xi1> to vector<1x128xi1>
    %196 = vector.broadcast %195 : vector<1x128xi1> to vector<160x128xi1>
    %197 = arith.select %196, %194, %193 : vector<160x128xi1>, vector<160x128xbf16>
    %c23_73 = arith.constant 23 : index
    %c0_74 = arith.constant 0 : index
    %198 = vector.load %arg6[%c23_73, %c0_74] : memref<208x128xbf16, #tpu.memory_space<vmem>>, vector<160x128xbf16>
    %199 = vector.shape_cast %26 : vector<1x128xi1> to vector<1x128xi1>
    %200 = vector.broadcast %199 : vector<1x128xi1> to vector<160x128xi1>
    %201 = arith.select %200, %198, %197 : vector<160x128xi1>, vector<160x128xbf16>
    %c24_75 = arith.constant 24 : index
    %c0_76 = arith.constant 0 : index
    %202 = vector.load %arg6[%c24_75, %c0_76] : memref<208x128xbf16, #tpu.memory_space<vmem>>, vector<160x128xbf16>
    %203 = vector.shape_cast %31 : vector<1x128xi1> to vector<1x128xi1>
    %204 = vector.broadcast %203 : vector<1x128xi1> to vector<160x128xi1>
    %205 = arith.select %204, %202, %201 : vector<160x128xi1>, vector<160x128xbf16>
    %c25_77 = arith.constant 25 : index
    %c0_78 = arith.constant 0 : index
    %206 = vector.load %arg6[%c25_77, %c0_78] : memref<208x128xbf16, #tpu.memory_space<vmem>>, vector<160x128xbf16>
    %207 = vector.shape_cast %36 : vector<1x128xi1> to vector<1x128xi1>
    %208 = vector.broadcast %207 : vector<1x128xi1> to vector<160x128xi1>
    %209 = arith.select %208, %206, %205 : vector<160x128xi1>, vector<160x128xbf16>
    %c39_79 = arith.constant 39 : index
    %c0_80 = arith.constant 0 : index
    %210 = vector.load %arg6[%c39_79, %c0_80] : memref<208x128xbf16, #tpu.memory_space<vmem>>, vector<160x128xbf16>
    %211 = vector.shape_cast %41 : vector<1x128xi1> to vector<1x128xi1>
    %212 = vector.broadcast %211 : vector<1x128xi1> to vector<160x128xi1>
    %213 = arith.select %212, %210, %209 : vector<160x128xi1>, vector<160x128xbf16>
    %c40_81 = arith.constant 40 : index
    %c0_82 = arith.constant 0 : index
    %214 = vector.load %arg6[%c40_81, %c0_82] : memref<208x128xbf16, #tpu.memory_space<vmem>>, vector<160x128xbf16>
    %215 = vector.shape_cast %46 : vector<1x128xi1> to vector<1x128xi1>
    %216 = vector.broadcast %215 : vector<1x128xi1> to vector<160x128xi1>
    %217 = arith.select %216, %214, %213 : vector<160x128xi1>, vector<160x128xbf16>
    %c41_83 = arith.constant 41 : index
    %c0_84 = arith.constant 0 : index
    %218 = vector.load %arg6[%c41_83, %c0_84] : memref<208x128xbf16, #tpu.memory_space<vmem>>, vector<160x128xbf16>
    %219 = vector.shape_cast %51 : vector<1x128xi1> to vector<1x128xi1>
    %220 = vector.broadcast %219 : vector<1x128xi1> to vector<160x128xi1>
    %221 = arith.select %220, %218, %217 : vector<160x128xi1>, vector<160x128xbf16>
    %c1_85 = arith.constant 1 : index
    %c0_86 = arith.constant 0 : index
    %c0_87 = arith.constant 0 : index
    %222 = vector.load %arg4[%c1_85, %c0_86, %c0_87] : memref<3x128x128xbf16, #tpu.memory_space<vmem>>, vector<1x128x128xbf16>
    %223 = vector.shape_cast %222 : vector<1x128x128xbf16> to vector<128x128xbf16>
    %cst_88 = arith.constant dense<0.000000e+00> : vector<160x128xf32>
    %224 = tpu.matmul %221, %223, %cst_88 {dimension_numbers = #tpu.dot_dimension_numbers<[1], [0], [0], [1], [0, 0, 1, 1], [], []>} : vector<160x128xbf16>, vector<128x128xbf16>, vector<160x128xf32> -> vector<160x128xf32>
    %225 = vector.broadcast %0 : vector<160x1xf32> to vector<160x128xf32>
    %226 = arith.mulf %224, %225 : vector<160x128xf32>
    %cst_89 = arith.constant dense<0.000000e+00> : vector<128xf32>
    %227 = vector.multi_reduction <add>, %226, %cst_89 [0] : vector<160x128xf32> to vector<128xf32>
    %228 = vector.shape_cast %227 : vector<128xf32> to vector<1x128xf32>
    %229 = arith.mulf %226, %226 : vector<160x128xf32>
    %cst_90 = arith.constant dense<0.000000e+00> : vector<128xf32>
    %230 = vector.multi_reduction <add>, %229, %cst_90 [0] : vector<160x128xf32> to vector<128xf32>
    %231 = vector.shape_cast %230 : vector<128xf32> to vector<1x128xf32>
    %cst_91 = arith.constant 1.562500e-02 : f32
    %232 = vector.broadcast %cst_91 : f32 to vector<1x128xf32>
    %233 = arith.mulf %228, %232 : vector<1x128xf32>
    %cst_92 = arith.constant 1.562500e-02 : f32
    %234 = vector.broadcast %cst_92 : f32 to vector<1x128xf32>
    %235 = arith.mulf %231, %234 : vector<1x128xf32>
    %236 = arith.mulf %233, %233 : vector<1x128xf32>
    %237 = arith.subf %235, %236 : vector<1x128xf32>
    %cst_93 = arith.constant 0.000000e+00 : f32
    %238 = vector.broadcast %cst_93 : f32 to vector<1x128xf32>
    %239 = arith.maximumf %237, %238 : vector<1x128xf32>
    %240 = vector.broadcast %233 : vector<1x128xf32> to vector<160x128xf32>
    %241 = arith.subf %226, %240 : vector<160x128xf32>
    %cst_94 = arith.constant 9.99999974E-6 : f32
    %242 = vector.broadcast %cst_94 : f32 to vector<1x128xf32>
    %243 = arith.addf %239, %242 : vector<1x128xf32>
    %244 = math.rsqrt %243 : vector<1x128xf32>
    %245 = vector.broadcast %244 : vector<1x128xf32> to vector<160x128xf32>
    %246 = arith.mulf %241, %245 : vector<160x128xf32>
    %cst_95 = arith.constant 0.000000e+00 : f32
    %247 = vector.broadcast %cst_95 : f32 to vector<160x128xf32>
    %248 = arith.cmpf oge, %246, %247 : vector<160x128xf32>
    %cst_96 = arith.constant 0.00999999977 : f32
    %249 = vector.broadcast %cst_96 : f32 to vector<160x128xf32>
    %250 = arith.mulf %249, %246 : vector<160x128xf32>
    %251 = arith.select %248, %246, %250 : vector<160x128xi1>, vector<160x128xf32>
    %252 = vector.broadcast %0 : vector<160x1xf32> to vector<160x128xf32>
    %253 = arith.mulf %251, %252 : vector<160x128xf32>
    %254 = arith.truncf %253 : vector<160x128xf32> to vector<160x128xbf16>
    %c24_97 = arith.constant 24 : index
    %c0_98 = arith.constant 0 : index
    %255 = vector.load %arg7[%c24_97, %c0_98] : memref<208x128xbf16, #tpu.memory_space<vmem>>, vector<160x128xbf16>
    tpu.vector_store %arg7[%c24_97, %c0_98], %254 {strides = array<i32>} : memref<208x128xbf16, #tpu.memory_space<vmem>>, vector<160x128xbf16>,
    %cst_99 = arith.constant 0.000000e+00 : bf16
    %256 = vector.broadcast %cst_99 : bf16 to vector<160x128xbf16>
    %c7_100 = arith.constant 7 : index
    %c0_101 = arith.constant 0 : index
    %257 = vector.load %arg7[%c7_100, %c0_101] : memref<208x128xbf16, #tpu.memory_space<vmem>>, vector<160x128xbf16>
    %258 = vector.shape_cast %11 : vector<1x128xi1> to vector<1x128xi1>
    %259 = vector.broadcast %258 : vector<1x128xi1> to vector<160x128xi1>
    %260 = arith.select %259, %257, %256 : vector<160x128xi1>, vector<160x128xbf16>
    %c8_102 = arith.constant 8 : index
    %c0_103 = arith.constant 0 : index
    %261 = vector.load %arg7[%c8_102, %c0_103] : memref<208x128xbf16, #tpu.memory_space<vmem>>, vector<160x128xbf16>
    %262 = vector.shape_cast %16 : vector<1x128xi1> to vector<1x128xi1>
    %263 = vector.broadcast %262 : vector<1x128xi1> to vector<160x128xi1>
    %264 = arith.select %263, %261, %260 : vector<160x128xi1>, vector<160x128xbf16>
    %c9_104 = arith.constant 9 : index
    %c0_105 = arith.constant 0 : index
    %265 = vector.load %arg7[%c9_104, %c0_105] : memref<208x128xbf16, #tpu.memory_space<vmem>>, vector<160x128xbf16>
    %266 = vector.shape_cast %21 : vector<1x128xi1> to vector<1x128xi1>
    %267 = vector.broadcast %266 : vector<1x128xi1> to vector<160x128xi1>
    %268 = arith.select %267, %265, %264 : vector<160x128xi1>, vector<160x128xbf16>
    %c23_106 = arith.constant 23 : index
    %c0_107 = arith.constant 0 : index
    %269 = vector.load %arg7[%c23_106, %c0_107] : memref<208x128xbf16, #tpu.memory_space<vmem>>, vector<160x128xbf16>
    %270 = vector.shape_cast %26 : vector<1x128xi1> to vector<1x128xi1>
    %271 = vector.broadcast %270 : vector<1x128xi1> to vector<160x128xi1>
    %272 = arith.select %271, %269, %268 : vector<160x128xi1>, vector<160x128xbf16>
    %c24_108 = arith.constant 24 : index
    %c0_109 = arith.constant 0 : index
    %273 = vector.load %arg7[%c24_108, %c0_109] : memref<208x128xbf16, #tpu.memory_space<vmem>>, vector<160x128xbf16>
    %274 = vector.shape_cast %31 : vector<1x128xi1> to vector<1x128xi1>
    %275 = vector.broadcast %274 : vector<1x128xi1> to vector<160x128xi1>
    %276 = arith.select %275, %273, %272 : vector<160x128xi1>, vector<160x128xbf16>
    %c25_110 = arith.constant 25 : index
    %c0_111 = arith.constant 0 : index
    %277 = vector.load %arg7[%c25_110, %c0_111] : memref<208x128xbf16, #tpu.memory_space<vmem>>, vector<160x128xbf16>
    %278 = vector.shape_cast %36 : vector<1x128xi1> to vector<1x128xi1>
    %279 = vector.broadcast %278 : vector<1x128xi1> to vector<160x128xi1>
    %280 = arith.select %279, %277, %276 : vector<160x128xi1>, vector<160x128xbf16>
    %c39_112 = arith.constant 39 : index
    %c0_113 = arith.constant 0 : index
    %281 = vector.load %arg7[%c39_112, %c0_113] : memref<208x128xbf16, #tpu.memory_space<vmem>>, vector<160x128xbf16>
    %282 = vector.shape_cast %41 : vector<1x128xi1> to vector<1x128xi1>
    %283 = vector.broadcast %282 : vector<1x128xi1> to vector<160x128xi1>
    %284 = arith.select %283, %281, %280 : vector<160x128xi1>, vector<160x128xbf16>
    %c40_114 = arith.constant 40 : index
    %c0_115 = arith.constant 0 : index
    %285 = vector.load %arg7[%c40_114, %c0_115] : memref<208x128xbf16, #tpu.memory_space<vmem>>, vector<160x128xbf16>
    %286 = vector.shape_cast %46 : vector<1x128xi1> to vector<1x128xi1>
    %287 = vector.broadcast %286 : vector<1x128xi1> to vector<160x128xi1>
    %288 = arith.select %287, %285, %284 : vector<160x128xi1>, vector<160x128xbf16>
    %c41_116 = arith.constant 41 : index
    %c0_117 = arith.constant 0 : index
    %289 = vector.load %arg7[%c41_116, %c0_117] : memref<208x128xbf16, #tpu.memory_space<vmem>>, vector<160x128xbf16>
    %290 = vector.shape_cast %51 : vector<1x128xi1> to vector<1x128xi1>
    %291 = vector.broadcast %290 : vector<1x128xi1> to vector<160x128xi1>
    %292 = arith.select %291, %289, %288 : vector<160x128xi1>, vector<160x128xbf16>
    %c2 = arith.constant 2 : index
    %c0_118 = arith.constant 0 : index
    %c0_119 = arith.constant 0 : index
    %293 = vector.load %arg4[%c2, %c0_118, %c0_119] : memref<3x128x128xbf16, #tpu.memory_space<vmem>>, vector<1x128x128xbf16>
    %294 = vector.shape_cast %293 : vector<1x128x128xbf16> to vector<128x128xbf16>
    %cst_120 = arith.constant dense<0.000000e+00> : vector<160x128xf32>
    %295 = tpu.matmul %292, %294, %cst_120 {dimension_numbers = #tpu.dot_dimension_numbers<[1], [0], [0], [1], [0, 0, 1, 1], [], []>} : vector<160x128xbf16>, vector<128x128xbf16>, vector<160x128xf32> -> vector<160x128xf32>
    %296 = vector.broadcast %0 : vector<160x1xf32> to vector<160x128xf32>
    %297 = arith.mulf %295, %296 : vector<160x128xf32>
    %cst_121 = arith.constant dense<0.000000e+00> : vector<128xf32>
    %298 = vector.multi_reduction <add>, %297, %cst_121 [0] : vector<160x128xf32> to vector<128xf32>
    %299 = vector.shape_cast %298 : vector<128xf32> to vector<1x128xf32>
    %300 = arith.mulf %297, %297 : vector<160x128xf32>
    %cst_122 = arith.constant dense<0.000000e+00> : vector<128xf32>
    %301 = vector.multi_reduction <add>, %300, %cst_122 [0] : vector<160x128xf32> to vector<128xf32>
    %302 = vector.shape_cast %301 : vector<128xf32> to vector<1x128xf32>
    %cst_123 = arith.constant 1.562500e-02 : f32
    %303 = vector.broadcast %cst_123 : f32 to vector<1x128xf32>
    %304 = arith.mulf %299, %303 : vector<1x128xf32>
    %cst_124 = arith.constant 1.562500e-02 : f32
    %305 = vector.broadcast %cst_124 : f32 to vector<1x128xf32>
    %306 = arith.mulf %302, %305 : vector<1x128xf32>
    %307 = arith.mulf %304, %304 : vector<1x128xf32>
    %308 = arith.subf %306, %307 : vector<1x128xf32>
    %cst_125 = arith.constant 0.000000e+00 : f32
    %309 = vector.broadcast %cst_125 : f32 to vector<1x128xf32>
    %310 = arith.maximumf %308, %309 : vector<1x128xf32>
    %311 = vector.broadcast %304 : vector<1x128xf32> to vector<160x128xf32>
    %312 = arith.subf %297, %311 : vector<160x128xf32>
    %cst_126 = arith.constant 9.99999974E-6 : f32
    %313 = vector.broadcast %cst_126 : f32 to vector<1x128xf32>
    %314 = arith.addf %310, %313 : vector<1x128xf32>
    %315 = math.rsqrt %314 : vector<1x128xf32>
    %316 = vector.broadcast %315 : vector<1x128xf32> to vector<160x128xf32>
    %317 = arith.mulf %312, %316 : vector<160x128xf32>
    %c24_127 = arith.constant 24 : index
    %c0_128 = arith.constant 0 : index
    %318 = vector.load %arg6[%c24_127, %c0_128] : memref<208x128xbf16, #tpu.memory_space<vmem>>, vector<160x128xbf16>
    %319 = arith.extf %318 : vector<160x128xbf16> to vector<160x128xf32>
    %320 = arith.addf %317, %319 : vector<160x128xf32>
    %cst_129 = arith.constant 0.000000e+00 : f32
    %321 = vector.broadcast %cst_129 : f32 to vector<160x128xf32>
    %322 = arith.cmpf oge, %320, %321 : vector<160x128xf32>
    %cst_130 = arith.constant 0.00999999977 : f32
    %323 = vector.broadcast %cst_130 : f32 to vector<160x128xf32>
    %324 = arith.mulf %323, %320 : vector<160x128xf32>
    %325 = arith.select %322, %320, %324 : vector<160x128xi1>, vector<160x128xf32>
    %326 = vector.broadcast %0 : vector<160x1xf32> to vector<160x128xf32>
    %327 = arith.mulf %325, %326 : vector<160x128xf32>
    %c0_131 = arith.constant 0 : index
    %c0_132 = arith.constant 0 : index
    %c0_133 = arith.constant 0 : index
    %328 = vector.load %arg5[%c0_131, %c0_132, %c0_133] : memref<1x160x128xf32, #tpu.memory_space<vmem>>, vector<1x160x128xf32>
    %329 = vector.shape_cast %328 : vector<1x160x128xf32> to vector<160x128xf32>
    %330 = vector.shape_cast %327 : vector<160x128xf32> to vector<1x160x128xf32>
    tpu.vector_store %arg5[%c0_131, %c0_132, %c0_133], %330 {strides = array<i32>} : memref<1x160x128xf32, #tpu.memory_space<vmem>>, vector<1x160x128xf32>,
    return
  }
  func.func @transform_0(%arg0: i32) -> (i32, i32, i32) {
    %c0_i32 = arith.constant 0 : i32
    %c0_i32_0 = arith.constant 0 : i32
    %c0_i32_1 = arith.constant 0 : i32
    return %arg0, %c0_i32, %c0_i32_0 : i32, i32, i32
  }
  func.func @transform_1(%arg0: i32) -> (i32, i32) {
    %c0_i32 = arith.constant 0 : i32
    %c0_i32_0 = arith.constant 0 : i32
    %c0_i32_1 = arith.constant 0 : i32
    return %c0_i32, %c0_i32_0 : i32, i32
  }
  func.func @transform_2(%arg0: i32) -> (i32, i32, i32) {
    %c0_i32 = arith.constant 0 : i32
    %c0_i32_0 = arith.constant 0 : i32
    %c0_i32_1 = arith.constant 0 : i32
    %c0_i32_2 = arith.constant 0 : i32
    return %c0_i32, %c0_i32_0, %c0_i32_1 : i32, i32, i32
  }
  func.func @transform_3(%arg0: i32) -> (i32, i32, i32) {
    %c0_i32 = arith.constant 0 : i32
    %c0_i32_0 = arith.constant 0 : i32
    %c0_i32_1 = arith.constant 0 : i32
    %c0_i32_2 = arith.constant 0 : i32
    return %c0_i32, %c0_i32_0, %c0_i32_1 : i32, i32, i32
  }
  func.func @transform_4(%arg0: i32) -> (i32, i32, i32) {
    %c0_i32 = arith.constant 0 : i32
    %c0_i32_0 = arith.constant 0 : i32
    %c0_i32_1 = arith.constant 0 : i32
    return %arg0, %c0_i32, %c0_i32_0 : i32, i32, i32
  }
}

</mosaic_0001>

<bundles_post_ra>
// kernel: encoder_residual_block.1
= control target key start
LH: loop header
LB: loop body
LE: loop exit
PB: predicated region body
PF: predicated region fallthrough
CT: control target
= control target key end

     0   :  { %s6024_s15 = smov 0   ;;  %s9491_s0 = inlined_call_operand.vmem [shape: bf16[2,160,128], index: 0, kind: input, shape index: {}]   ;;  %s9492_s1 = inlined_call_operand.vmem [shape: f32[160,1], index: 1, kind: input, shape index: {}]   ;;  %s9493_s2 = inlined_call_operand.vmem [shape: bf16[2,128,128], index: 2, kind: input, shape index: {}]   ;;  %s9494_s3 = inlined_call_operand.vmem [shape: bf16[3,128,128], index: 3, kind: input, shape index: {}]   ;;  %s9495_s4 = inlined_call_operand.vmem [shape: f32[2,160,128], index: 4, kind: output, shape index: {}]  }
   0x1 LB: > { %s5523_s16 = sadd.s32 4294967295, %s5996_s15   ;;  %p5527_p0 = scmp.ge.s32.totalorder %s5996_s15, 1  ;;  %s5996_s15 = sphi %s6024_s15, %s14_s15  }
   0x2   : > { %p162_p1 = scmp.lt.s32.totalorder %s5996_s15, 3 }
   0x4   : > { %p163_p2 = pnand %p5527_p0, %p162_p1 }
   0x6   : > { %166 = sbr.rel (%p163_p2) target bundleno = 1721 (0x6b9), region = 36 }
   0xd   : > { %v5929_v0 = vld [vmem:[%s9493_s2] sm:$0xff]   ;;  %p188_p3 = scmp.lt.s32.totalorder %s5523_s16, 1  ;;  %v5930_v1 = vld [vmem:[%s9493_s2 + $0x8] sm:$0xff]   ;;  %v9501_v2 = vmov 0   ;;  %v5931_v3 = vld [vmem:[%s9493_s2 + $0x10] sm:$0xff]  }
   0xe   : > { %5720 = vmatprep.subr.bf16.mxu0 %v5929_v0  ;;  %5927 = vset.pattern.permute.xlu0 %v9501_v2  ;;  %221 = vst [vmem:[#allocation2] sm:$0xff] %v9501_v2  ;;  %222 = vst [vmem:[#allocation2 + $0x8] sm:$0xf] %v9501_v2  ;;  %v5932_v4 = vld [vmem:[%s9493_s2 + $0x18] sm:$0xff]   ;;  %v5933_v6 = vld [vmem:[%s9493_s2 + $0x20] sm:$0xff]  }
   0xf   : > { %s10133_s16 = smov (!%p188_p3, %s5523_s16), 1  ;;  %223 = vst [vmem:[#allocation2 + $0x58] sm:$0xf0] %v9501_v2  ;;  %224 = vst [vmem:[#allocation2 + $0x60] sm:$0xff] %v9501_v2  ;;  %5721 = vmatpush3.bf16.msra.mxu0 %v5929_v0  ;;  %5928 = vset.pattern.permute.xlu1 %v9501_v2  ;;  %v5934_v7 = vld [vmem:[%s9493_s2 + $0x28] sm:$0xff]   ;;  %v5935_v8 = vld [vmem:[%s9493_s2 + $0x30] sm:$0xff]  }
  0x10   : > { %225 = vst [vmem:[#allocation3] sm:$0xff] %v9501_v2  ;;  %226 = vst [vmem:[#allocation3 + $0x8] sm:$0xf] %v9501_v2  ;;  %5722 = vmatprep.subr.bf16.mxu0 %v5930_v1  ;;  %s5916_s23 = smul.u32 80, %s10133_s16  ;;  %v5936_v9 = vld [vmem:[%s9493_s2 + $0x38] sm:$0xff]   ;;  %v201_v10 = vld [vmem:[%s9492_s1] sm:$0xff] }
  0x11   : > { %227 = vst [vmem:[#allocation3 + $0x58] sm:$0xf0] %v9501_v2  ;;  %228 = vst [vmem:[#allocation3 + $0x60] sm:$0xff] %v9501_v2  ;;  %v203_v11 = vld [vmem:[%s9492_s1 + $0x10] sm:$0xff]  ;;  %517 = vperm.xlu0 %5927, %v201_v10   ;;  %v5941_v12 = vld [vmem:[%s9493_s2 + $0x40] sm:$0xff]  }
  0x12   : > { %s6057_s26 = scalar_lea.vmem %s9491_s0, %s5916_s23  ;;  %527 = vperm.xlu1 %5928, %v203_v11   ;;  %v202_v13 = vld [vmem:[%s9492_s1 + $0x8] sm:$0xff]  ;;  %v204_v14 = vld [vmem:[%s9492_s1 + $0x18] sm:$0xff]  ;;  %v205_v18 = vld [vmem:[%s9492_s1 + $0x20] sm:$0xff] }
  0x13   : > { %5723 = vmatpush3.bf16.msra.mxu0 %v5930_v1  ;;  %v6063_v5 = vld [vmem:[%s6057_s26] sm:$0xff]   ;;  %v6094_v15 = vld [vmem:[%s6057_s26 + $0x8] sm:$0xff]   ;;  %v6097_v16 = vld [vmem:[%s6057_s26 + $0x10] sm:$0xff]  }
  0x14   : > { %5724 = vmatprep.subr.bf16.mxu0 %v5931_v3  ;;  %5736 = vmatprep.mubr.bf16.mxu0 %v6063_v5  ;;  %v5942_v17 = vld [vmem:[%s9493_s2 + $0x48] sm:$0xff]   ;;  %v6111_v20 = vld [vmem:[%s6057_s26 + $0x18] sm:$0xff]   ;;  %v5945_v21 = vld [vmem:[%s9493_s2 + $0x50] sm:$0xff]  }
  0x15   : > { %522 = vperm.xlu0 %5927, %v202_v13   ;;  %v206_v19 = vld [vmem:[%s9492_s1 + $0x28] sm:$0xff]  ;;  %v207_v22 = vld [vmem:[%s9492_s1 + $0x30] sm:$0xff]  ;;  %v208_v23 = vld [vmem:[%s9492_s1 + $0x38] sm:$0xff] }
  0x16   : > { %532 = vperm.xlu1 %5928, %v204_v14   ;;  %v5943_v24 = vld [vmem:[%s6057_s26 + $0x20] sm:$0xff]   ;;  %v5946_v25 = vld [vmem:[%s9493_s2 + $0x58] sm:$0xff]   ;;  %v210_v27 = vld [vmem:[%s9492_s1 + $0x48] sm:$0xff] }
  0x17   : > { %5725 = vmatpush3.bf16.msra.mxu0 %v5931_v3  ;;  %v209_v26 = vld [vmem:[%s9492_s1 + $0x40] sm:$0xff]  ;;  %v5944_v28 = vld [vmem:[%s6057_s26 + $0x28] sm:$0xff]   ;;  %v5947_v30 = vld [vmem:[%s6057_s26 + $0x30] sm:$0xff]  }
  0x18   : > { %5726 = vmatprep.subr.bf16.mxu0 %v5932_v4  ;;  %v5949_v29 = vld [vmem:[%s9493_s2 + $0x60] sm:$0xff]   ;;  %v211_v31 = vld [vmem:[%s9492_s1 + $0x50] sm:$0xff]  ;;  %v5950_v32 = vld [vmem:[%s9493_s2 + $0x68] sm:$0xff]  }
  0x19   : > { %537 = vperm.xlu0 %5927, %v205_v18   ;;  %v212_v33 = vld [vmem:[%s9492_s1 + $0x58] sm:$0xff]  ;;  %v213_v34 = vld [vmem:[%s9492_s1 + $0x60] sm:$0xff]  ;;  %v214_v35 = vld [vmem:[%s9492_s1 + $0x68] sm:$0xff] }
  0x1a   : > { %542 = vperm.xlu1 %5928, %v206_v19   ;;  %v5953_v36 = vld [vmem:[%s9493_s2 + $0x70] sm:$0xff]   ;;  %v5948_v38 = vld [vmem:[%s6057_s26 + $0x38] sm:$0xff]   ;;  %v5951_v40 = vld [vmem:[%s6057_s26 + $0x40] sm:$0xff]  }
  0x1b   : > { %5727 = vmatpush3.bf16.msra.mxu0 %v5932_v4  ;;  %v215_v37 = vld [vmem:[%s9492_s1 + $0x70] sm:$0xff]  ;;  %v216_v39 = vld [vmem:[%s9492_s1 + $0x78] sm:$0xff]  ;;  %v217_v42 = vld [vmem:[%s9492_s1 + $0x80] sm:$0xff] }
  0x1c   : > { %5728 = vmatprep.subr.bf16.mxu0 %v5933_v6  ;;  %v5954_v41 = vld [vmem:[%s9493_s2 + $0x78] sm:$0xff]   ;;  %v218_v43 = vld [vmem:[%s9492_s1 + $0x88] sm:$0xff]  ;;  %v219_v44 = vld [vmem:[%s9492_s1 + $0x90] sm:$0xff] }
  0x1d   : > { %547 = vperm.xlu0 %5927, %v207_v22   ;;  %v5952_v45 = vld [vmem:[%s6057_s26 + $0x48] sm:$0xff]   ;;  %v220_v46 = vld [vmem:[%s9492_s1 + $0x98] sm:$0xff]  ;;  %v5955_v63 = vld [vmem:[%s9494_s3] sm:$0xff]   ;;  %s5917_s26 = smul.u32 160, %s10133_s16 }
  0x1e   : > { %552 = vperm.xlu1 %5928, %v208_v23   ;;  %v5956_v0 = vld [vmem:[%s9494_s3 + $0x8] sm:$0xff]   ;;  %5756 = vmatprep.subr.bf16.mxu1 %v5955_v63  ;;  %v5957_v11 = vld [vmem:[%s9494_s3 + $0x10] sm:$0xff]  }
  0x1f   : > { %5729 = vmatpush3.bf16.msra.mxu0 %v5933_v6  ;;  %5757 = vmatpush3.bf16.msra.mxu1 %v5955_v63  ;;  %s9428_s25 = scalar_lea.vmem %s9495_s4, %s5917_s26 }
  0x20   : > { %5730 = vmatprep.subr.bf16.mxu0 %v5934_v7  ;;  %5758 = vmatprep.subr.bf16.mxu1 %v5956_v0 }
  0x21   : > { %557 = vperm.xlu0 %5927, %v209_v26   ;;  %v5958_v26 = vld [vmem:[%s9494_s3 + $0x18] sm:$0xff]  }
  0x22   : > { %562 = vperm.xlu1 %5928, %v210_v27  }
  0x23   : > { %5731 = vmatpush3.bf16.msra.mxu0 %v5934_v7  ;;  %5759 = vmatpush3.bf16.msra.mxu1 %v5956_v0 }
  0x24   : > { %5732 = vmatprep.subr.bf16.mxu0 %v5935_v8  ;;  %5760 = vmatprep.subr.bf16.mxu1 %v5957_v11 }
  0x25   : > { %567 = vperm.xlu0 %5927, %v211_v31  }
  0x26   : > { %572 = vperm.xlu1 %5928, %v212_v33  }
  0x27   : > { %5733 = vmatpush3.bf16.msra.mxu0 %v5935_v8  ;;  %5761 = vmatpush3.bf16.msra.mxu1 %v5957_v11 }
  0x28   : > { %5734 = vmatprep.subr.bf16.mxu0 %v5936_v9  ;;  %5762 = vmatprep.subr.bf16.mxu1 %v5958_v26 }
  0x29   : > { %577 = vperm.xlu0 %5927, %v213_v34  }
  0x2a   : > { %582 = vperm.xlu1 %5928, %v214_v35  }
  0x2b   : > { %5735 = vmatpush3.bf16.msra.mxu0 %v5936_v9  ;;  %5763 = vmatpush3.bf16.msra.mxu1 %v5958_v26 }
  0x2c   : > { %5792 = vmatprep.subr.bf16.mxu0 %v5941_v12 }
  0x2d   : > { %587 = vperm.xlu0 %5927, %v215_v37  }
  0x2e   : > { %5737 = vmatmul.mubr.bf16.vlgmr.msra.gmra.mrb[0].mxu0 %v6094_v15  ;;  %592 = vperm.xlu1 %5928, %v216_v39  }
  0x2f   : > { %5740 = vmatprep.mubr.bf16.mxu0 %v6097_v16  ;;  %5793 = vmatpush3.bf16.msra.mxu0 %v5941_v12  ;;  %v229_v12 = vlaneseq }
  0x30   : > { %5794 = vmatprep.subr.bf16.mxu0 %v5942_v17 }
  0x31   : > { %597 = vperm.xlu0 %5927, %v217_v42   ;;  %v6254_v27 = vand.u32 127, %v229_v12 }
  0x32   : > { %602 = vperm.xlu1 %5928, %v218_v43  }
  0x33   : > { %5795 = vmatpush3.bf16.msra.mxu0 %v5942_v17  ;;  %vm232_vm0 = vcmp.lt.s32.totalorder %v6254_v27, 8  ;;  %vm234_vm2 = vcmp.ge.s32.totalorder %v6254_v27, 8  ;;  %vm235_vm3 = vcmp.lt.s32.totalorder %v6254_v27, 16  ;;  %vm237_vm7 = vcmp.ge.s32.totalorder %v6254_v27, 16 }
  0x34   : > { %5796 = vmatprep.subr.bf16.mxu0 %v5945_v21  ;;  %vm907_vm1 = vmpackc.low %vm232_vm0, %vm232_vm0  ;;  %vm238_vm8 = vcmp.lt.s32.totalorder %v6254_v27, 24  ;;  %vm240_vm9 = vcmp.ge.s32.totalorder %v6254_v27, 24  ;;  %vm241_vm11 = vcmp.lt.s32.totalorder %v6254_v27, 32  ;;  %vm243_vm12 = vcmp.ge.s32.totalorder %v6254_v27, 32 }
  0x35   : > { %607 = vperm.xlu0 %5927, %v219_v44   ;;  %v908_v11 = vsel %vm907_vm1, 65537, %v9501_v2  ;;  %vm6348_vm4 = vmand %vm234_vm2, %vm235_vm3  ;;  %vm244_vm13 = vcmp.lt.s32.totalorder %v6254_v27, 40  ;;  %vm246_vm14 = vcmp.ge.s32.totalorder %v6254_v27, 40  ;;  %vm247_vm15 = vcmp.lt.s32.totalorder %v6254_v27, 48 }
  0x36   : > { %5741 = vmatmul.mubr.bf16.gmra.mrb[4].mxu0 %v6111_v20  ;;  %612 = vperm.xlu1 %5928, %v220_v46   ;;  %vm928_vm6 = vmpackc.low %vm6348_vm4, %vm6348_vm4  ;;  %vm249_vm0 = vcmp.ge.s32.totalorder %v6254_v27, 48  ;;  %vm250_vm3 = vcmp.lt.s32.totalorder %v6254_v27, 56 }
  0x37   : > { %5744 = vmatprep.mubr.bf16.mxu0 %v5943_v24  ;;  %5797 = vmatpush3.bf16.msra.mxu0 %v5945_v21  ;;  %vm6407_vm10 = vmand %vm237_vm7, %vm238_vm8 }
  0x38   : > { %5798 = vmatprep.subr.bf16.mxu0 %v5946_v25  ;;  %vm1048_vm1 = vmpackc.low %vm6407_vm10, %vm6407_vm10  ;;  %vm252_vm10 = vcmp.ge.s32.totalorder %v6254_v27, 56 }
  0x39   : > { %vm6440_vm2 = vmand %vm240_vm9, %vm241_vm11 }
  0x3a   : > { %vm6470_vm7 = vmand %vm246_vm14, %vm247_vm15  ;;  %vm255_vm14 = vcmp.ge.s32.totalorder %v6254_v27, 64  ;;  %vm256_vm15 = vcmp.lt.s32.totalorder %v6254_v27, 72 }
  0x3b   : > { %5799 = vmatpush3.bf16.msra.mxu0 %v5946_v25  ;;  %vm6491_vm8 = vmand %vm249_vm0, %vm250_vm3 }
  0x3c   : > { %5800 = vmatprep.subr.bf16.mxu0 %v5949_v29  ;;  %vm1169_vm9 = vmpackc.low %vm6440_vm2, %vm6440_vm2 }
  0x3d   : > { %vm1482_vm0 = vmpackc.low %vm6491_vm8, %vm6491_vm8 }
  0x3e   : > { %5745 = vmatmul.mubr.bf16.gmra.mrb[8].mxu0 %v5944_v28  ;;  %vm6621_vm3 = vmand %vm255_vm14, %vm256_vm15 }
  0x3f   : > { %5748 = vmatprep.mubr.bf16.mxu0 %v5947_v30  ;;  %5801 = vmatpush3.bf16.msra.mxu0 %v5949_v29 }
  0x40   : > { %5802 = vmatprep.subr.bf16.mxu0 %v5950_v32 }
  0x43   : > { %5803 = vmatpush3.bf16.msra.mxu0 %v5950_v32 }
  0x44   : > { %5804 = vmatprep.subr.bf16.mxu0 %v5953_v36 }
  0x46   : > { %5749 = vmatmul.mubr.bf16.gmra.mrb[12].mxu0 %v5948_v38 }
  0x47   : > { %5752 = vmatprep.mubr.bf16.mxu0 %v5951_v40  ;;  %5805 = vmatpush3.bf16.msra.mxu0 %v5953_v36 }
  0x48   : > { %5806 = vmatprep.subr.bf16.mxu0 %v5954_v41 }
  0x4b   : > { %5807 = vmatpush3.bf16.msra.mxu0 %v5954_v41 }
  0x4e   : > { %5753 = vmatmul.mubr.bf16.gmra.mrb[16].mxu0 %v5952_v45 }
  0x4f   : > { %5808 = vmatprep.mubr.bf16.mxu0 %v6063_v5 }
  0x56   : > { %5809 = vmatmul.mubr.bf16.vlgmr.msra.gmra.mrb[20].mxu0 %v6094_v15 }
  0x57   : > { %5812 = vmatprep.mubr.bf16.mxu0 %v6097_v16 }
  0x5e   : > { %5813 = vmatmul.mubr.bf16.gmra.mrb[24].mxu0 %v6111_v20 }
  0x5f   : > { %5816 = vmatprep.mubr.bf16.mxu0 %v5943_v24 }
  0x66   : > { %5817 = vmatmul.mubr.bf16.gmra.mrb[28].mxu0 %v5944_v28 }
  0x67   : > { %5820 = vmatprep.mubr.bf16.mxu0 %v5947_v30 }
  0x6e   : > { %5821 = vmatmul.mubr.bf16.gmra.mrb[32].mxu0 %v5948_v38  ;;  %v5959_v38 = vld [vmem:[%s9494_s3 + $0x20] sm:$0xff]  }
  0x6f   : > { %5824 = vmatprep.mubr.bf16.mxu0 %v5951_v40  ;;  %5764 = vmatprep.subr.bf16.mxu1 %v5959_v38 }
  0x70   : > { %5765 = vmatpush3.bf16.msra.mxu1 %v5959_v38 }
  0x76   : > { %5825 = vmatmul.mubr.bf16.gmra.mrb[36].mxu0 %v5952_v45  ;;  %v910_v45 = vshrl.u32 %v229_v12, 7 }
  0x90   : > { %v6184_v47 = vpop.permute.xlu0 %517 }
  0x91   : > { %9645 = vst [vmem:[#allocation4_spill] sm:$0xff] %v6184_v47  ;;  %v6186_v48 = vpop.permute.xlu1 %527 }
  0x92   : > { %9646 = vst [vmem:[#allocation5_spill] sm:$0xff] %v6186_v48 }
  0x94   : > { %v6188_v49 = vpop.permute.xlu0 %522 }
  0x95   : > { %9647 = vst [vmem:[#allocation6_spill] sm:$0xff] %v6188_v49  ;;  %v6190_v50 = vpop.permute.xlu1 %532 }
  0x96   : > { %9648 = vst [vmem:[#allocation7_spill] sm:$0xff] %v6190_v50 }
  0x98   : > { %v6192_v51 = vpop.permute.xlu0 %537 }
  0x99   : > { %9649 = vst [vmem:[#allocation8_spill] sm:$0xff] %v6192_v51  ;;  %v6194_v52 = vpop.permute.xlu1 %542 }
  0x9a   : > { %9650 = vst [vmem:[#allocation9_spill] sm:$0xff] %v6194_v52 }
  0x9c   : > { %v6196_v53 = vpop.permute.xlu0 %547 }
  0x9d   : > { %9651 = vst [vmem:[#allocation10_spill] sm:$0xff] %v6196_v53  ;;  %v6198_v55 = vpop.permute.xlu1 %552 }
  0x9e   : > { %9652 = vst [vmem:[#allocation11_spill] sm:$0xff] %v6198_v55 }
  0xa0   : > { %v6203_v60 = vpop.permute.xlu0 %557 }
  0xa1   : > { %9653 = vst [vmem:[#allocation12_spill] sm:$0xff] %v6203_v60  ;;  %v6226_v6 = vpop.permute.xlu1 %562 }
  0xa2   : > { %9654 = vst [vmem:[#allocation13_spill] sm:$0xff] %v6226_v6 }
  0xa4   : > { %v6234_v14 = vpop.permute.xlu0 %567 }
  0xa5   : > { %9655 = vst [vmem:[#allocation14_spill] sm:$0xff] %v6234_v14  ;;  %v6256_v28 = vpop.permute.xlu1 %572 }
  0xa6   : > { %9656 = vst [vmem:[#allocation15_spill] sm:$0xff] %v6256_v28 }
  0xa8   : > { %v6264_v33 = vpop.permute.xlu0 %577 }
  0xa9   : > { %9657 = vst [vmem:[#allocation16_spill] sm:$0xff] %v6264_v33  ;;  %v6279_v46 = vpop.permute.xlu1 %582 }
  0xaa   : > { %9658 = vst [vmem:[#allocation17_spill] sm:$0xff] %v6279_v46 }
 0x101   : > { %v5738_v54 = vpop.f32.mrb[0].mxu0 }
 0x102   : > { %v436_v56 = vpop.f32.mrb[1].mxu0  ;;  %v6206_v61 = vmul.f32 %v5738_v54, %v6186_v48 }
 0x103   : > { %v6201_v57 = vmul.f32 %v6184_v47, %v436_v56  ;;  %v5739_v58 = vpop.f32.mrb[2].mxu0 }
 0x104   : > { %v439_v59 = vpop.f32.mrb[3].mxu0  ;;  %v6220_v3 = vmul.f32 %v5739_v58, %v6190_v50  ;;  %v662_v7 = vmul.f32 %v6206_v61, %v6206_v61 }
 0x105   : > { %v6209_v62 = vmul.f32 %v6188_v49, %v439_v59  ;;  %v660_v1 = vmul.f32 %v6201_v57, %v6201_v57 }
 0x106   : > { %v663_v15 = vmul.f32 %v6220_v3, %v6220_v3 }
 0x107   : > { %v635_v4 = vadd.f32 %v6209_v62, %v6201_v57  ;;  %v661_v5 = vmul.f32 %v6209_v62, %v6209_v62 }
 0x109   : > { %v636_v8 = vadd.f32 %v635_v4, %v6206_v61  ;;  %v680_v9 = vadd.f32 %v661_v5, %v660_v1  ;;  %v5742_v10 = vpop.f32.mrb[4].mxu0  ;;  %v5960_v1 = vld [vmem:[%s9494_s3 + $0x28] sm:$0xff]   ;;  %v6296_v4 = vpop.permute.xlu0 %587 }
 0x10a   : > { %v452_v13 = vpop.f32.mrb[5].mxu0  ;;  %v6243_v20 = vmul.f32 %v5742_v10, %v6196_v53  ;;  %9659 = vst [vmem:[#allocation18_spill] sm:$0xff] %v6296_v4  ;;  %v6304_v10 = vsub.s32 0, %v910_v45  ;;  %5766 = vmatprep.subr.bf16.mxu1 %v5960_v1 }
 0x10b   : > { %v681_v16 = vadd.f32 %v680_v9, %v662_v7  ;;  %v6239_v17 = vmul.f32 %v6192_v51, %v452_v13  ;;  %v637_v18 = vadd.f32 %v636_v8, %v6220_v3  ;;  %v5743_v19 = vpop.f32.mrb[6].mxu0  ;;  %5767 = vmatpush3.bf16.msra.mxu1 %v5960_v1 }
 0x10c   : > { %v455_v21 = vpop.f32.mrb[7].mxu0  ;;  %v6259_v30 = vmul.f32 %v5743_v19, %v6198_v55  ;;  %v666_v34 = vmul.f32 %v6243_v20, %v6243_v20  ;;  %9660 = vst [vmem:[#allocation19_spill] sm:$0xff] %v6304_v10  ;;  %v6313_v19 = vpop.permute.xlu1 %592 }
 0x10d   : > { %v638_v22 = vadd.f32 %v637_v18, %v6239_v17  ;;  %v664_v23 = vmul.f32 %v6239_v17, %v6239_v17  ;;  %v682_v24 = vadd.f32 %v681_v16, %v663_v15  ;;  %v6249_v25 = vmul.f32 %v6194_v52, %v455_v21  ;;  %v5961_v18 = vld [vmem:[%s9494_s3 + $0x30] sm:$0xff]   ;;  %9661 = vst [vmem:[#allocation20_spill] sm:$0xff] %v6313_v19 }
 0x10e   : > { %v667_v40 = vmul.f32 %v6259_v30, %v6259_v30  ;;  %5768 = vmatprep.subr.bf16.mxu1 %v5961_v18 }
 0x10f   : > { %v683_v29 = vadd.f32 %v682_v24, %v664_v23  ;;  %v639_v31 = vadd.f32 %v638_v22, %v6249_v25  ;;  %v665_v32 = vmul.f32 %v6249_v25, %v6249_v25  ;;  %5769 = vmatpush3.bf16.msra.mxu1 %v5961_v18 }
 0x111   : > { %v640_v35 = vadd.f32 %v639_v31, %v6243_v20  ;;  %v684_v36 = vadd.f32 %v683_v29, %v665_v32  ;;  %v5746_v37 = vpop.f32.mrb[8].mxu0  ;;  %v912_v31 = vrot.slane %v908_v11, %v6304_v10 }
 0x112   : > { %v468_v39 = vpop.f32.mrb[9].mxu0  ;;  %v6282_v54 = vmul.f32 %v5746_v37, %v6234_v14 }
 0x113   : > { %v685_v41 = vadd.f32 %v684_v36, %v666_v34  ;;  %v6276_v42 = vmul.f32 %v6203_v60, %v468_v39  ;;  %v641_v43 = vadd.f32 %v640_v35, %v6259_v30  ;;  %v5747_v44 = vpop.f32.mrb[10].mxu0  ;;  %v6327_v35 = vpop.permute.xlu0 %597  ;;  %vm6352_vm5 = vcmp.ne.s16.totalorder %v912_v31, 0 }
 0x114   : > { %v471_v56 = vpop.f32.mrb[11].mxu0  ;;  %v6299_v7 = vmul.f32 %v5747_v44, %v6256_v28  ;;  %v670_v12 = vmul.f32 %v6282_v54, %v6282_v54  ;;  %9662 = vst [vmem:[#allocation21_spill] sm:$0xff] %v6327_v35 }
 0x115   : > { %v642_v58 = vadd.f32 %v641_v43, %v6276_v42  ;;  %v668_v59 = vmul.f32 %v6276_v42, %v6276_v42  ;;  %v686_v63 = vadd.f32 %v685_v41, %v667_v40  ;;  %v6288_v0 = vmul.f32 %v6226_v6, %v471_v56  ;;  %v5962_v40 = vld [vmem:[%s9494_s3 + $0x38] sm:$0xff]   ;;  %v894_v41 = vld [vmem:[#allocation3] sm:$0xf8] }
 0x116   : > { %v671_v22 = vmul.f32 %v6299_v7, %v6299_v7  ;;  %5770 = vmatprep.subr.bf16.mxu1 %v5962_v40  ;;  %v914_v11 = vsel %vm6352_vm5, %v894_v41, 0 }
 0x117   : > { %v687_v5 = vadd.f32 %v686_v63, %v668_v59  ;;  %v643_v8 = vadd.f32 %v642_v58, %v6288_v0  ;;  %v669_v9 = vmul.f32 %v6288_v0, %v6288_v0  ;;  %v9665_v59 = vmov 0  ;;  %v6356_v63 = vpop.permute.xlu1 %602  ;;  %5771 = vmatpush3.bf16.msra.mxu1 %v5962_v40 }
 0x118   : > { %v9666_v59 = vsel %vm6352_vm5, 4294967295, %v9665_v59  ;;  %9668 = vst [vmem:[#allocation23_spill] sm:$0xff] %v6356_v63 }
 0x119   : > { %v644_v13 = vadd.f32 %v643_v8, %v6282_v54  ;;  %v688_v15 = vadd.f32 %v687_v5, %v669_v9  ;;  %v5750_v16 = vpop.f32.mrb[12].mxu0  ;;  %9667 = vst [vmem:[#allocation22_spill] sm:$0xff] %v9666_v59 }
 0x11a   : > { %v484_v21 = vpop.f32.mrb[13].mxu0  ;;  %v6325_v32 = vmul.f32 %v5750_v16, %v6296_v4 }
 0x11b   : > { %v689_v23 = vadd.f32 %v688_v15, %v670_v12  ;;  %v6318_v24 = vmul.f32 %v6264_v33, %v484_v21  ;;  %v645_v26 = vadd.f32 %v644_v13, %v6299_v7  ;;  %v5751_v29 = vpop.f32.mrb[14].mxu0  ;;  %v6366_v13 = vpop.permute.xlu0 %607 }
 0x11c   : > { %v487_v34 = vpop.f32.mrb[15].mxu0  ;;  %v6339_v44 = vmul.f32 %v5751_v29, %v6313_v19  ;;  %v674_v1 = vmul.f32 %v6325_v32, %v6325_v32  ;;  %9669 = vst [vmem:[#allocation24_spill] sm:$0xff] %v6366_v13  ;;  %v937_v29 = vshrl.u32 %v914_v11, 16  ;;  %v6391_v40 = vpop.permute.xlu1 %612 }
 0x11d   : > { %v646_v36 = vadd.f32 %v645_v26, %v6318_v24  ;;  %v672_v37 = vmul.f32 %v6318_v24, %v6318_v24  ;;  %v690_v38 = vadd.f32 %v689_v23, %v671_v22  ;;  %v6333_v39 = vmul.f32 %v6279_v46, %v487_v34  ;;  %9670 = vst [vmem:[#allocation25_spill] sm:$0xff] %v6391_v40 }
 0x11e   : > { %v675_v15 = vmul.f32 %v6339_v44, %v6339_v44 }
 0x11f   : > { %v691_v43 = vadd.f32 %v690_v38, %v672_v37  ;;  %v647_v45 = vadd.f32 %v646_v36, %v6333_v39  ;;  %v673_v56 = vmul.f32 %v6333_v39, %v6333_v39  ;;  %v929_v38 = vsel %vm928_vm6, 65537, %v9501_v2  ;;  %vm6458_vm6 = vmand %vm243_vm12, %vm244_vm13 }
 0x120   : > { %vm1234_vm11 = vmpackc.low %vm6458_vm6, %vm6458_vm6  ;;  %vm253_vm12 = vcmp.lt.s32.totalorder %v6254_v27, 64 }
 0x121   : > { %v648_v5 = vadd.f32 %v647_v45, %v6325_v32  ;;  %v692_v8 = vadd.f32 %v691_v43, %v673_v56  ;;  %v5754_v9 = vpop.f32.mrb[16].mxu0  ;;  %vm1353_vm13 = vmpackc.low %vm6470_vm7, %vm6470_vm7 }
 0x122   : > { %v500_v12 = vpop.f32.mrb[17].mxu0  ;;  %v6375_v23 = vmul.f32 %v5754_v9, %v6366_v13  ;;  %vm1665_vm7 = vmpackc.low %vm6621_vm3, %vm6621_vm3  ;;  %vm9591_vm3 = vcmask 1043456  }
 0x123   : > { %v693_v16 = vadd.f32 %v692_v8, %v674_v1  ;;  %v6371_v18 = vmul.f32 %v6327_v35, %v500_v12  ;;  %v649_v21 = vadd.f32 %v648_v5, %v6339_v44  ;;  %v5755_v22 = vpop.f32.mrb[18].mxu0  ;;  %v6399_v1 = vrot.slane %v937_v29, 7 }
 0x124   : > { %v503_v26 = vpop.f32.mrb[19].mxu0  ;;  %v6394_v43 = vmul.f32 %v5755_v22, %v6391_v40  ;;  %v940_v5 = vshll.u32 %v914_v11, 16  ;;  %v678_v58 = vmul.f32 %v6375_v23, %v6375_v23  ;;  %v933_v11 = vrot.slane %v929_v38, %v6304_v10 }
 0x125   : > { %v650_v31 = vadd.f32 %v649_v21, %v6371_v18  ;;  %v676_v34 = vmul.f32 %v6371_v18, %v6371_v18  ;;  %v694_v36 = vadd.f32 %v693_v16, %v675_v15  ;;  %v6381_v37 = vmul.f32 %v6356_v63, %v503_v26  ;;  %9671 = vst [vmem:[#allocation26_spill] sm:$0xff] %v6399_v1 }
 0x126   : > { %v679_v21 = vmul.f32 %v6394_v43, %v6394_v43  ;;  %v942_v38 = vor.u32 %v940_v5, %v6399_v1  ;;  %vm6445_vm4 = vcmp.ne.s16.totalorder %v933_v11, 0  ;;  %v9679_v5 = vmov 0 }
 0x127   : > { %v695_v41 = vadd.f32 %v694_v36, %v676_v34  ;;  %v651_v45 = vadd.f32 %v650_v31, %v6381_v37  ;;  %v677_v56 = vmul.f32 %v6381_v37, %v6381_v37  ;;  %v9680_v5 = vsel %vm6445_vm4, 4294967295, %v9679_v5 }
 0x128   : > { %9681 = vst [vmem:[#allocation30_spill] sm:$0xff] %v9680_v5 }
 0x129   : > { %v652_v8 = vadd.f32 %v651_v45, %v6375_v23  ;;  %v696_v9 = vadd.f32 %v695_v41, %v677_v56  ;;  %v5810_v12 = vpop.f32.mrb[20].mxu0 }
 0x12a   : > { %v2303_v16 = vpop.f32.mrb[21].mxu0  ;;  %v6424_v34 = vmul.f32 %v5810_v12, %v6186_v48 }
 0x12b   : > { %v653_v22 = vadd.f32 %v652_v8, %v6394_v43  ;;  %v697_v26 = vadd.f32 %v696_v9, %v678_v58  ;;  %v6419_v29 = vmul.f32 %v2303_v16, %v6184_v47  ;;  %v5811_v31 = vpop.f32.mrb[22].mxu0  ;;  %v6434_v58 = vld [vmem:[#allocation3] sm:$0xf0] }
 0x12c   : > { %9675 = vst [vmem:[#allocation28_spill] sm:$0xff] %v6424_v34  ;;  %v2306_v36 = vpop.f32.mrb[23].mxu0  ;;  %v6452_v12 = vmul.f32 %v5811_v31, %v6190_v50 }
 0x12d   : > { %9674 = vst [vmem:[#allocation27_spill] sm:$0xff] %v6419_v29  ;;  %v654_v41 = vrot.slane %v653_v22, 4  ;;  %v698_v45 = vadd.f32 %v697_v26, %v679_v21  ;;  %v6432_v56 = vmul.f32 %v2306_v36, %v6188_v49  ;;  %v2427_v9 = vmul.f32 %v6419_v29, %v6419_v29 }
 0x12e   : > { %9682 = vst [vmem:[#allocation31_spill] sm:$0xff] %v6452_v12 }
 0x12f   : > { %9676 = vst [vmem:[#allocation29_spill] sm:$0xff] %v6432_v56  ;;  %v655_v21 = vadd.f32 %v654_v41, %v653_v22  ;;  %v699_v26 = vrot.slane %v698_v45, 4  ;;  %v2402_v11 = vadd.f32 %v6432_v56, %v6419_v29  ;;  %v2428_v36 = vmul.f32 %v6432_v56, %v6432_v56 }
 0x130   : > { %v6480_v22 = vsel %vm1048_vm1, 65537, %v9501_v2  ;;  %v2429_v41 = vmul.f32 %v6424_v34, %v6424_v34  ;;  %v6487_v56 = vsel %vm6445_vm4, %v6434_v58, %v942_v38  ;;  %v2430_v38 = vmul.f32 %v6452_v12, %v6452_v12  ;;  %vm6595_vm1 = vmand %vm252_vm10, %vm253_vm12 }
 0x131   : > { %v656_v1 = vrot.slane %v655_v21, 2  ;;  %v700_v59 = vadd.f32 %v699_v26, %v698_v45  ;;  %v2403_v15 = vadd.f32 %v2402_v11, %v6424_v34  ;;  %v2447_v2 = vadd.f32 %v2428_v36, %v2427_v9  ;;  %v5814_v50 = vpop.f32.mrb[24].mxu0  ;;  %vm1546_vm6 = vmpackc.low %vm6595_vm1, %vm6595_vm1 }
 0x132   : > { %v2319_v5 = vpop.f32.mrb[25].mxu0  ;;  %v1053_v36 = vrot.slane %v6480_v22, %v6304_v10  ;;  %v9690_v22 = vmov 0  }
 0x133   : > { %v657_v48 = vadd.f32 %v656_v1, %v655_v21  ;;  %v701_v45 = vrot.slane %v700_v59, 2  ;;  %v2448_v26 = vadd.f32 %v2447_v2, %v2429_v41  ;;  %v6506_v9 = vmul.f32 %v2319_v5, %v6192_v51  ;;  %v5815_v11 = vpop.f32.mrb[26].mxu0 }
 0x134   : > { %v2404_v34 = vadd.f32 %v2403_v15, %v6452_v12  ;;  %v2322_v49 = vpop.f32.mrb[27].mxu0  ;;  %v1056_v1 = vshrl.u32 %v6487_v56, 16  ;;  %v6529_v15 = vsel %vm1169_vm9, 65537, %v9690_v22  ;;  %v6532_v12 = vmul.f32 %v5814_v50, %v6196_v53 }
 0x135   : > { %9689 = vst [vmem:[#allocation32_spill] sm:$0xff] %v6506_v9  ;;  %v658_v2 = vrot.slane %v657_v48, 1  ;;  %v702_v5 = vadd.f32 %v701_v45, %v700_v59  ;;  %v2431_v21 = vmul.f32 %v6506_v9, %v6506_v9  ;;  %v2449_v41 = vadd.f32 %v2448_v26, %v2430_v38  ;;  %9691 = vst [vmem:[#allocation33_spill] sm:$0xff] %v6529_v15 }
 0x136   : > { %9692 = vst [vmem:[#allocation34_spill] sm:$0xff] %v6532_v12  ;;  %v2405_v29 = vadd.f32 %v2404_v34, %v6506_v9  ;;  %v6536_v51 = vmul.f32 %v2322_v49, %v6194_v52  ;;  %v6544_v59 = vsel %vm1234_vm11, 65537, %v9690_v22  ;;  %v6552_v50 = vsel %vm1353_vm13, 65537, %v9690_v22 }
 0x137   : > { %9694 = vst [vmem:[#allocation36_spill] sm:$0xff] %v6544_v59  ;;  %v659_v8 = vadd.f32 %v658_v2, %v657_v48  ;;  %v703_v38 = vrot.slane %v702_v5, 1  ;;  %v2450_v45 = vadd.f32 %v2449_v41, %v2431_v21  ;;  %9695 = vst [vmem:[#allocation37_spill] sm:$0xff] %v6552_v50  ;;  %v6555_v49 = vsel %vm1482_vm0, 65537, %v9690_v22 }
 0x138   : > { %9693 = vst [vmem:[#allocation35_spill] sm:$0xff] %v6536_v51  ;;  %9696 = vst [vmem:[#allocation38_spill] sm:$0xff] %v6555_v49  ;;  %v2406_v34 = vadd.f32 %v2405_v29, %v6536_v51  ;;  %v2432_v16 = vmul.f32 %v6536_v51, %v6536_v51  ;;  %v6562_v21 = vrot.slane %v1056_v1, 7  ;;  %v1059_v41 = vshll.u32 %v6487_v56, 16 }
 0x139   : > { %v704_v26 = vadd.f32 %v703_v38, %v702_v5  ;;  %v6560_v48 = vmul.f32 0.015625, %v659_v8  ;;  %v5818_v2 = vpop.f32.mrb[28].mxu0  ;;  %v2433_v31 = vmul.f32 %v6532_v12, %v6532_v12  ;;  %v6568_v9 = vmul.f32 %v5815_v11, %v6198_v55 }
 0x13a   : > { %9697 = vst [vmem:[#allocation39_spill] sm:$0xff] %v6562_v21  ;;  %v2407_v22 = vadd.f32 %v2406_v34, %v6532_v12  ;;  %v2451_v29 = vadd.f32 %v2450_v45, %v2432_v16  ;;  %v2335_v53 = vpop.f32.mrb[29].mxu0  ;;  %vm6599_vm2 = vcmp.ne.s16.totalorder %v1053_v36, 0  ;;  %v9701_v34 = vmov 0 }
 0x13b   : > { %9698 = vst [vmem:[#allocation40_spill] sm:$0xff] %v6568_v9  ;;  %v706_v52 = vmul.f32 0.015625, %v704_v26  ;;  %v707_v5 = vmul.f32 %v6560_v48, %v6560_v48  ;;  %v5819_v8 = vpop.f32.mrb[30].mxu0  ;;  %v9702_v34 = vsel %vm6599_vm2, 4294967295, %v9701_v34  ;;  %v6608_v38 = vmul.f32 %v2335_v53, %v6203_v60 }
 0x13c   : > { %v2338_v16 = vpop.f32.mrb[31].mxu0  ;;  %9703 = vst [vmem:[#allocation41_spill] sm:$0xff] %v9702_v34  ;;  %v2452_v56 = vadd.f32 %v2451_v29, %v2433_v31  ;;  %v6611_v11 = vmul.f32 %v5818_v2, %v6234_v14  ;;  %v2408_v12 = vadd.f32 %v2407_v22, %v6568_v9  ;;  %v1061_v51 = vor.u32 %v1059_v41, %v6562_v21 }
 0x13d   : > { %v708_v26 = vsub.f32 %v706_v52, %v707_v5  ;;  %v2434_v5 = vmul.f32 %v6568_v9, %v6568_v9  ;;  %9704 = vst [vmem:[#allocation42_spill] sm:$0xff] %v6608_v38  ;;  %v6615_v36 = vmul.f32 %v2338_v16, %v6226_v6  ;;  %v2435_v53 = vmul.f32 %v6608_v38, %v6608_v38 }
 0x13e   : > { %v2409_v27 = vadd.f32 %v2408_v12, %v6608_v38  ;;  %v6636_v16 = vmul.f32 %v5819_v8, %v6256_v28 }
 0x13f   : > { %v709_v1 = vmax.f32 %v708_v26, 0.0  ;;  %9705 = vst [vmem:[#allocation43_spill] sm:$0xff] %v6615_v36  ;;  %v2453_v31 = vadd.f32 %v2452_v56, %v2434_v5  ;;  %v2436_v26 = vmul.f32 %v6615_v36, %v6615_v36 }
 0x140   : > { %9708 = vst [vmem:[#allocation44_spill] sm:$0xff] %v6636_v16  ;;  %v2410_v12 = vadd.f32 %v2409_v27, %v6615_v36  ;;  %v2438_v52 = vmul.f32 %v6636_v16, %v6636_v16 }
 0x141   : > { %v730_v29 = vadd.f32 1e-05, %v709_v1  ;;  %v5822_v56 = vpop.f32.mrb[32].mxu0  ;;  %v2454_v5 = vadd.f32 %v2453_v31, %v2435_v53  ;;  %v5989_v53 = vld [vmem:[#allocation2] sm:$0xff] }
 0x142   : > { %v2351_v9 = vpop.f32.mrb[33].mxu0  ;;  %v6659_v41 = vsel %vm1546_vm6, 65537, %v5989_v53  ;;  %v2411_v38 = vadd.f32 %v2410_v12, %v6611_v11  ;;  %v6679_v27 = vsel %vm1665_vm7, 65537, %v5989_v53 }
 0x143   : > { %5979 = vrsqrt.f32 %v730_v29  ;;  %v6647_v1 = vmul.f32 %v2351_v9, %v6264_v33  ;;  %v5823_v8 = vpop.f32.mrb[34].mxu0  ;;  %9710 = vst [vmem:[#allocation46_spill] sm:$0xff] %v6659_v41  ;;  %v2437_v9 = vmul.f32 %v6611_v11, %v6611_v11  ;;  %v2455_v31 = vadd.f32 %v2454_v5, %v2436_v26  ;;  %9712 = vst [vmem:[#allocation48_spill] sm:$0xff] %v6679_v27 }
 0x144   : > { %v2354_v29 = vpop.f32.mrb[35].mxu0  ;;  %v2412_v12 = vadd.f32 %v2411_v38, %v6636_v16  ;;  %v6691_v26 = vmul.f32 %v5823_v8, %v6313_v19  ;;  %v9717_v27 = vsub.f32 %v6299_v7, %v6560_v48  ;;  %v9721_v7 = vsub.f32 %v6339_v44, %v6560_v48 }
 0x145   : > { %9709 = vst [vmem:[#allocation45_spill] sm:$0xff] %v6647_v1  ;;  %v6669_v22 = vmul.f32 %v2354_v29, %v6279_v46  ;;  %v2456_v2 = vadd.f32 %v2455_v31, %v2437_v9  ;;  %v2439_v36 = vmul.f32 %v6647_v1, %v6647_v1  ;;  %v1153_v29 = vsel %vm6599_vm2, %v6434_v58, %v1061_v51 }
 0x146   : > { %v6688_v31 = vmul.f32 %v5822_v56, %v6296_v4  ;;  %9714 = vst [vmem:[#allocation50_spill] sm:$0xff] %v6691_v26  ;;  %v2413_v58 = vadd.f32 %v2412_v12, %v6647_v1  ;;  %v6715_v1 = vrot.slane %v1153_v29, 1  ;;  %v9725_v44 = vsub.f32 %v6394_v43, %v6560_v48 }
 0x147   : > { %9711 = vst [vmem:[#allocation47_spill] sm:$0xff] %v6669_v22  ;;  %v2457_v45 = vadd.f32 %v2456_v2, %v2438_v52  ;;  %v2440_v53 = vmul.f32 %v6669_v22, %v6669_v22 }
 0x148   : > { %9713 = vst [vmem:[#allocation49_spill] sm:$0xff] %v6688_v31  ;;  %v2414_v16 = vadd.f32 %v2413_v58, %v6669_v22  ;;  %9715 = vst [vmem:[#allocation51_spill] sm:$0xff] %v6715_v1  ;;  %v2441_v2 = vmul.f32 %v6688_v31, %v6688_v31 }
 0x149   : > { %v5826_v56 = vpop.f32.mrb[36].mxu0  ;;  %v2458_v52 = vadd.f32 %v2457_v45, %v2439_v36  ;;  %v6721_v36 = vmul.f32 %v6691_v26, %v6691_v26 }
 0x14a   : > { %v6707_v9 = vmul.f32 %v5826_v56, %v6366_v13  ;;  %v2367_v38 = vpop.f32.mrb[37].mxu0 }
 0x14b   : > { %v6713_v51 = vmul.f32 %v2367_v38, %v6327_v35  ;;  %v5827_v12 = vpop.f32.mrb[38].mxu0  ;;  %v2459_v45 = vadd.f32 %v2458_v52, %v2440_v53  ;;  %v2415_v38 = vadd.f32 %v2414_v16, %v6688_v31  ;;  %v9716_v53 = vsub.f32 %v6282_v54, %v6560_v48 }
 0x14c   : > { %v6725_v56 = vmul.f32 %v6707_v9, %v6707_v9  ;;  %v2370_v5 = vpop.f32.mrb[39].mxu0  ;;  %v6735_v8 = vmul.f32 %v5827_v12, %v6391_v40  ;;  %v9718_v31 = vsub.f32 %v6318_v24, %v6560_v48  ;;  %v9719_v12 = vsub.f32 %v6333_v39, %v6560_v48 }
 0x14d   : > { %v6727_v58 = vpop.eup %5979  ;;  %v6732_v29 = vmul.f32 %v6713_v51, %v6713_v51  ;;  %v6738_v22 = vmul.f32 %v2370_v5, %v6356_v63  ;;  %v9720_v54 = vsub.f32 %v6325_v32, %v6560_v48  ;;  %v9722_v24 = vsub.f32 %v6371_v18, %v6560_v48 }
 0x14e   : > { %v742_v52 = vmul.f32 %v6727_v58, %v9716_v53  ;;  %v743_v16 = vmul.f32 %v6727_v58, %v9717_v27  ;;  %v744_v41 = vmul.f32 %v6727_v58, %v9718_v31  ;;  %v745_v5 = vmul.f32 %v6727_v58, %v9719_v12 }
 0x14f   : > { %v746_v53 = vmul.f32 %v6727_v58, %v9720_v54  ;;  %v747_v27 = vmul.f32 %v6727_v58, %v9721_v7  ;;  %v748_v31 = vmul.f32 %v6727_v58, %v9722_v24  ;;  %v9723_v39 = vsub.f32 %v6381_v37, %v6560_v48 }
 0x150   : > { %v9724_v32 = vsub.f32 %v6375_v23, %v6560_v48  ;;  %v751_v7 = vmul.f32 %v6727_v58, %v9725_v44  ;;  %vm762_vm8 = vcmp.ge.f32.partialorder %v742_v52, 0.0  ;;  %vm763_vm9 = vcmp.ge.f32.partialorder %v743_v16, 0.0 }
 0x151   : > { %v749_v12 = vmul.f32 %v6727_v58, %v9723_v39  ;;  %vm764_vm10 = vcmp.ge.f32.partialorder %v744_v41, 0.0  ;;  %vm765_vm11 = vcmp.ge.f32.partialorder %v745_v5, 0.0  ;;  %vm766_vm12 = vcmp.ge.f32.partialorder %v746_v53, 0.0 }
 0x152   : > { %v750_v54 = vmul.f32 %v6727_v58, %v9724_v32  ;;  %vm767_vm13 = vcmp.ge.f32.partialorder %v747_v27, 0.0  ;;  %vm768_vm14 = vcmp.ge.f32.partialorder %v748_v31, 0.0  ;;  %vm771_vm1 = vcmp.ge.f32.partialorder %v751_v7, 0.0 }
 0x153   : > { %vm769_vm15 = vcmp.ge.f32.partialorder %v749_v12, 0.0  ;;  %v782_v18 = vmul.f32 0.01, %v742_v52  ;;  %v783_v37 = vmul.f32 0.01, %v743_v16  ;;  %v2460_v24 = vadd.f32 %v2459_v45, %v2441_v2 }
 0x154   : > { %vm770_vm0 = vcmp.ge.f32.partialorder %v750_v54, 0.0  ;;  %v784_v23 = vmul.f32 0.01, %v744_v41  ;;  %v785_v39 = vmul.f32 0.01, %v745_v5  ;;  %v2416_v43 = vadd.f32 %v2415_v38, %v6691_v26 }
 0x155   : > { %v786_v32 = vmul.f32 0.01, %v746_v53  ;;  %v787_v49 = vmul.f32 0.01, %v747_v27  ;;  %v788_v44 = vmul.f32 0.01, %v748_v31  ;;  %v802_v59 = vsel %vm762_vm8, %v742_v52, %v782_v18 }
 0x156   : > { %v789_v50 = vmul.f32 0.01, %v749_v12  ;;  %v790_v1 = vmul.f32 0.01, %v750_v54  ;;  %v791_v21 = vmul.f32 0.01, %v751_v7  ;;  %v803_v34 = vsel %vm763_vm9, %v743_v16, %v783_v37 }
 0x157   : > { %v804_v10 = vsel %vm764_vm10, %v744_v41, %v784_v23  ;;  %v805_v15 = vsel %vm765_vm11, %v745_v5, %v785_v39  ;;  %v806_v2 = vsel %vm766_vm12, %v746_v53, %v786_v32  ;;  %v807_v45 = vsel %vm767_vm13, %v747_v27, %v787_v49 }
 0x158   : > { %v808_v6 = vsel %vm768_vm14, %v748_v31, %v788_v44  ;;  %v809_v38 = vsel %vm769_vm15, %v749_v12, %v789_v50  ;;  %v810_v26 = vsel %vm770_vm0, %v750_v54, %v790_v1  ;;  %v811_v60 = vsel %vm771_vm1, %v751_v7, %v791_v21 }
 0x159   : > { %v822_v52 = vmul.f32 %v802_v59, %v6234_v14  ;;  %v823_v16 = vmul.f32 %v803_v34, %v6256_v28  ;;  %v824_v41 = vmul.f32 %v804_v10, %v6264_v33  ;;  %v825_v5 = vmul.f32 %v805_v15, %v6279_v46 }
 0x15a   : > { %v826_v53 = vmul.f32 %v806_v2, %v6296_v4  ;;  %v827_v49 = vmul.f32 %v807_v45, %v6313_v19  ;;  %v828_v27 = vmul.f32 %v808_v6, %v6327_v35  ;;  %v829_v50 = vmul.f32 %v809_v38, %v6356_v63 }
 0x15b   : > { %v830_v1 = vmul.f32 %v810_v26, %v6366_v13  ;;  %v831_v21 = vmul.f32 %v811_v60, %v6391_v40  ;;  %v837_v31 = vpack.c.bf16 %v823_v16, %v822_v52  ;;  %v838_v59 = vpack.c.bf16 %v825_v5, %v824_v41 }
 0x15c   : > { %v839_v12 = vpack.c.bf16 %v827_v49, %v826_v53  ;;  %v2417_v34 = vadd.f32 %v2416_v43, %v6713_v51  ;;  %v840_v10 = vpack.c.bf16 %v829_v50, %v828_v27  ;;  %v2461_v15 = vadd.f32 %v2460_v24, %v6721_v36 }
 0x15d   : > { %v841_v54 = vpack.c.bf16 %v831_v21, %v830_v1  ;;  %v2446_v7 = vmul.f32 %v6735_v8, %v6735_v8  ;;  %v6805_v18 = vrot.slane %v837_v31, 4  ;;  %v864_v6 = vrot.slane %v838_v59, 4 }
 0x15e   : > { %v866_v37 = vrot.slane %v839_v12, 4  ;;  %v2418_v26 = vadd.f32 %v2417_v34, %v6738_v22  ;;  %v868_v23 = vrot.slane %v840_v10, 4  ;;  %v2462_v39 = vadd.f32 %v2461_v15, %v6732_v29 }
 0x15f   : > { %v870_v60 = vrot.slane %v841_v54, 4  ;;  %v2444_v32 = vmul.f32 %v6738_v22, %v6738_v22  ;;  %v865_v43 = vsel %vm9591_vm3, %v6805_v18, %v864_v6  ;;  %v9726_v44 = vsub.f32 %v6201_v57, %v6560_v48 }
 0x160   : > { %v867_v36 = vsel %vm9591_vm3, %v864_v6, %v866_v37  ;;  %v2419_v24 = vadd.f32 %v2418_v26, %v6707_v9  ;;  %v869_v45 = vsel %vm9591_vm3, %v866_v37, %v868_v23  ;;  %889 = vst [vmem:[#allocation3 + $0x38] sm:$0xff] %v865_v43  ;;  %v9727_v52 = vsub.f32 %v6209_v62, %v6560_v48 }
 0x161   : > { %v732_v2 = vmul.f32 %v6727_v58, %v9726_v44  ;;  %v871_v38 = vsel %vm9591_vm3, %v868_v23, %v870_v60  ;;  %890 = vst [vmem:[#allocation3 + $0x40] sm:$0xff] %v867_v36  ;;  %893 = vst [vmem:[#allocation3 + $0x58] sm:$0xf] %v870_v60  ;;  %v2463_v29 = vadd.f32 %v2462_v39, %v2444_v32  ;;  %v9732_v32 = vld [vmem:[#allocation6_spill] sm:$0xff]  ;;  %vm9590_vm13 = vsmask.f32 256 }
 0x162   : > { %v733_v16 = vmul.f32 %v6727_v58, %v9727_v52  ;;  %891 = vst [vmem:[#allocation3 + $0x48] sm:$0xff] %v869_v45  ;;  %892 = vst [vmem:[#allocation3 + $0x50] sm:$0xff] %v871_v38  ;;  %v2420_v41 = vadd.f32 %v2419_v24, %v6735_v8  ;;  %v9728_v57 = vsub.f32 %v6206_v61, %v6560_v48  ;;  %v9733_v24 = vld [vmem:[#allocation5_spill] sm:$0xff]  ;;  %v9735_v38 = vld [vmem:[#allocation8_spill] sm:$0xff]  ;;  %vm9589_vm1 = vcmask 1046528  }
 0x163   : > { %v9729_v53 = vsub.f32 %v6220_v3, %v6560_v48  ;;  %v9730_v27 = vsub.f32 %v6239_v17, %v6560_v48  ;;  %v2464_v50 = vadd.f32 %v2463_v29, %v6725_v56  ;;  %v9731_v1 = vsub.f32 %v6249_v25, %v6560_v48 }
 0x164   : > { %v734_v5 = vmul.f32 %v6727_v58, %v9728_v57  ;;  %vm752_vm6 = vcmp.ge.f32.partialorder %v732_v2, 0.0  ;;  %vm753_vm7 = vcmp.ge.f32.partialorder %v733_v16, 0.0  ;;  %v2421_v61 = vrot.slane %v2420_v41, 4 }
 0x165   : > { %v735_v49 = vmul.f32 %v6727_v58, %v9729_v53  ;;  %v736_v62 = vmul.f32 %v6727_v58, %v9730_v27  ;;  %v737_v21 = vmul.f32 %v6727_v58, %v9731_v1  ;;  %v2465_v3 = vadd.f32 %v2464_v50, %v2446_v7 }
 0x166   : > { %vm754_vm8 = vcmp.ge.f32.partialorder %v734_v5, 0.0  ;;  %v772_v31 = vmul.f32 0.01, %v732_v2  ;;  %v773_v59 = vmul.f32 0.01, %v733_v16  ;;  %v2422_v17 = vadd.f32 %v2421_v61, %v2420_v41 }
 0x167   : > { %vm755_vm9 = vcmp.ge.f32.partialorder %v735_v49, 0.0  ;;  %vm756_vm10 = vcmp.ge.f32.partialorder %v736_v62, 0.0  ;;  %vm757_vm11 = vcmp.ge.f32.partialorder %v737_v21, 0.0  ;;  %v774_v12 = vmul.f32 0.01, %v734_v5 }
 0x168   : > { %v775_v34 = vmul.f32 0.01, %v735_v49  ;;  %v776_v10 = vmul.f32 0.01, %v736_v62  ;;  %v2466_v56 = vrot.slane %v2465_v3, 4  ;;  %v792_v25 = vsel %vm752_vm6, %v732_v2, %v772_v31  ;;  %v9734_v2 = vld [vmem:[#allocation7_spill] sm:$0xff] }
 0x169   : > { %v777_v54 = vmul.f32 0.01, %v737_v21  ;;  %v793_v15 = vsel %vm753_vm7, %v733_v16, %v773_v59  ;;  %v2423_v6 = vrot.slane %v2422_v17, 2  ;;  %v794_v37 = vsel %vm754_vm8, %v734_v5, %v774_v12  ;;  %v9736_v16 = vld [vmem:[#allocation9_spill] sm:$0xff] }
 0x16a   : > { %v795_v26 = vsel %vm755_vm9, %v735_v49, %v775_v34  ;;  %v796_v7 = vsel %vm756_vm10, %v736_v62, %v776_v10  ;;  %v2467_v23 = vadd.f32 %v2466_v56, %v2465_v3  ;;  %v812_v39 = vmul.f32 %v792_v25, %v6184_v47 }
 0x16b   : > { %v797_v60 = vsel %vm757_vm11, %v737_v21, %v777_v54  ;;  %v813_v43 = vmul.f32 %v793_v15, %v9732_v32  ;;  %v2424_v36 = vadd.f32 %v2423_v6, %v2422_v17  ;;  %v814_v44 = vmul.f32 %v794_v37, %v9733_v24  ;;  %v7717_v37 = vld [vmem:[#allocation2] sm:$0xf0] }
 0x16c   : > { %v815_v45 = vmul.f32 %v795_v26, %v9734_v2  ;;  %v816_v29 = vmul.f32 %v796_v7, %v9735_v38  ;;  %v2468_v52 = vrot.slane %v2467_v23, 2  ;;  %v817_v41 = vmul.f32 %v797_v60, %v9736_v16 }
 0x16d   : > { %v832_v57 = vpack.c.bf16 %v813_v43, %v812_v39  ;;  %v9737_v5 = vsub.f32 %v6243_v20, %v6560_v48  ;;  %v2425_v49 = vrot.slane %v2424_v36, 1  ;;  %v9738_v62 = vsub.f32 %v6259_v30, %v6560_v48 }
 0x16e   : > { %v833_v27 = vpack.c.bf16 %v815_v45, %v814_v44  ;;  %v9739_v1 = vsub.f32 %v6276_v42, %v6560_v48  ;;  %v2469_v61 = vadd.f32 %v2468_v52, %v2467_v23  ;;  %v834_v3 = vpack.c.bf16 %v817_v41, %v816_v29  ;;  %v6890_v44 = vld [vmem:[#allocation3 + $0x38] sm:$0xff] }
 0x16f   : > { %v738_v53 = vmul.f32 %v6727_v58, %v9737_v5  ;;  %v739_v50 = vmul.f32 %v6727_v58, %v9738_v62  ;;  %v853_v31 = vrot.slane %v832_v57, 4  ;;  %v2426_v59 = vadd.f32 %v2425_v49, %v2424_v36  ;;  %v9742_v29 = vld [vmem:[#allocation10_spill] sm:$0xff] }
 0x170   : > { %v740_v21 = vmul.f32 %v6727_v58, %v9739_v1  ;;  %v854_v20 = vrot.slane %v833_v27, 4  ;;  %v2470_v12 = vrot.slane %v2469_v61, 1  ;;  %v856_v34 = vrot.slane %v834_v3, 4 }
 0x171   : > { %vm758_vm12 = vcmp.ge.f32.partialorder %v738_v53, 0.0  ;;  %vm759_vm14 = vcmp.ge.f32.partialorder %v739_v50, 0.0  ;;  %v778_v17 = vmul.f32 0.01, %v738_v53  ;;  %883 = vst [vmem:[#allocation3 + $0x8] sm:$0xf0] %v853_v31  ;;  %v9740_v10 = vsub.f32 %v6288_v0, %v6560_v48 }
 0x172   : > { %v779_v30 = vmul.f32 0.01, %v739_v50  ;;  %v6871_v56 = vmul.f32 0.015625, %v2426_v59  ;;  %v6874_v54 = vsel %vm9591_vm3, %v853_v31, %v854_v20  ;;  %vm760_vm15 = vcmp.ge.f32.partialorder %v740_v21, 0.0 }
 0x173   : > { %v741_v42 = vmul.f32 %v6727_v58, %v9740_v10  ;;  %v798_v25 = vsel %vm758_vm12, %v738_v53, %v778_v17  ;;  %v2471_v15 = vadd.f32 %v2470_v12, %v2469_v61  ;;  %v6877_v6 = vsel %vm9591_vm3, %v854_v20, %v856_v34  ;;  %884 = vst [vmem:[#allocation3 + $0x10] sm:$0xff] %v6874_v54  ;;  %v9743_v10 = vld [vmem:[#allocation12_spill] sm:$0xff] }
 0x174   : > { %v916_v26 = vsel %vm6352_vm5, %v6874_v54, 0  ;;  %v799_v0 = vsel %vm759_vm14, %v739_v50, %v779_v30  ;;  %v2474_v48 = vmul.f32 %v6871_v56, %v6871_v56  ;;  %v2494_v58 = vsub.f32 %v6738_v22, %v6871_v56 }
 0x175   : > { %v917_v7 = vsel %vm6352_vm5, %v6877_v6, 0  ;;  %v952_v23 = vshrl.u32 %v916_v26, 16  ;;  %v2473_v60 = vmul.f32 0.015625, %v2471_v15  ;;  %v955_v39 = vshll.u32 %v916_v26, 16 }
 0x176   : > { %v960_v43 = vshrl.u32 %v917_v7, 16  ;;  %v963_v36 = vshll.u32 %v917_v7, 16  ;;  %v818_v52 = vmul.f32 %v798_v25, %v9742_v29  ;;  %v819_v41 = vmul.f32 %v799_v0, %v6198_v55 }
 0x177   : > { %v954_v45 = vrot.slane %v952_v23, 7  ;;  %vm761_vm0 = vcmp.ge.f32.partialorder %v741_v42, 0.0  ;;  %v2475_v57 = vsub.f32 %v2473_v60, %v2474_v48  ;;  %v780_v53 = vmul.f32 0.01, %v740_v21  ;;  %v9744_v48 = vld [vmem:[#allocation13_spill] sm:$0xff] }
 0x178   : > { %v962_v5 = vrot.slane %v960_v43, 7  ;;  %v781_v49 = vmul.f32 0.01, %v741_v42  ;;  %v6894_v27 = vld [vmem:[#allocation3 + $0x8] sm:$0xff]  ;;  %v835_v50 = vpack.c.bf16 %v819_v41, %v818_v52  ;;  %v921_v1 = vsel %vm6352_vm5, %v6890_v44, 0 }
 0x179   : > { %v957_v62 = vor.u32 %v955_v39, %v954_v45  ;;  %v2476_v3 = vmax.f32 %v2475_v57, 0.0  ;;  %v915_v31 = vsel %vm6352_vm5, %v6894_v27, 0  ;;  %v800_v20 = vsel %vm760_vm15, %v740_v21, %v780_v53 }
 0x17a   : > { %v965_v59 = vor.u32 %v963_v36, %v962_v5  ;;  %v944_v17 = vshrl.u32 %v915_v31, 16  ;;  %v947_v12 = vshll.u32 %v915_v31, 16  ;;  %v801_v30 = vsel %vm761_vm0, %v741_v42, %v781_v49  ;;  %v9746_v31 = vld [vmem:[#allocation26_spill] sm:$0xff] }
 0x17b   : > { %v820_v25 = vmul.f32 %v800_v20, %v9743_v10  ;;  %v2497_v15 = vadd.f32 1e-05, %v2476_v3  ;;  %v858_v0 = vrot.slane %v835_v50, 4  ;;  %v821_v7 = vmul.f32 %v801_v30, %v9744_v48 }
 0x17c   : > { %v966_v26 = vsel %vm9590_vm13, %v954_v45, %v965_v59  ;;  %v946_v23 = vrot.slane %v944_v17, 7  ;;  %v992_v43 = vshrl.u32 %v921_v1, 16  ;;  %v995_v36 = vshll.u32 %v921_v1, 16 }
 0x17d   : > { %v1037_v39 = vsel %vm6445_vm4, %v6877_v6, %v966_v26  ;;  %5981 = vrsqrt.f32 %v2497_v15  ;;  %v6913_v42 = vsel %vm9591_vm3, %v856_v34, %v858_v0  ;;  %v836_v53 = vpack.c.bf16 %v821_v7, %v820_v25  ;;  %v9747_v15 = vld [vmem:[#allocation33_spill] sm:$0xff]  ;;  %v9748_v26 = vld [vmem:[#allocation19_spill] sm:$0xff] }
 0x17e   : > { %v1079_v21 = vshrl.u32 %v1037_v39, 16  ;;  %v1082_v52 = vshll.u32 %v1037_v39, 16  ;;  %v949_v41 = vor.u32 %v947_v12, %v946_v23  ;;  %v958_v57 = vsel %vm9590_vm13, %v946_v23, %v957_v62 }
 0x17f   : > { %v918_v45 = vsel %vm6352_vm5, %v6913_v42, 0  ;;  %v1036_v49 = vsel %vm6445_vm4, %v6874_v54, %v958_v57  ;;  %v860_v17 = vrot.slane %v836_v53, 4  ;;  %v6930_v25 = vrot.slane %v992_v43, 7 }
 0x180   : > { %v6922_v50 = vrot.slane %v1079_v21, 7  ;;  %v968_v1 = vshrl.u32 %v918_v45, 16  ;;  %v971_v3 = vshll.u32 %v918_v45, 16  ;;  %v950_v34 = vsel %vm9590_vm13, %v9746_v31, %v949_v41 }
 0x181   : > { %v1071_v59 = vshrl.u32 %v1036_v49, 16  ;;  %v1074_v20 = vshll.u32 %v1036_v49, 16  ;;  %v1035_v62 = vsel %vm6445_vm4, %v6894_v27, %v950_v34  ;;  %v9749_v7 = vrot.slane %v9747_v15, %v9748_v26 }
 0x182   : > { %v1084_v12 = vor.u32 %v1082_v52, %v6922_v50  ;;  %v970_v30 = vrot.slane %v968_v1, 7  ;;  %v9750_v23 = vmov 0  ;;  %v1063_v39 = vshrl.u32 %v1035_v62, 16 }
 0x183   : > { %vm6935_vm6 = vcmp.ne.s16.totalorder %v9749_v7, 0  ;;  %v1066_v21 = vshll.u32 %v1035_v62, 16  ;;  %v1073_v41 = vrot.slane %v1071_v59, 7  ;;  %v6940_v57 = vsel %vm9591_vm3, %v858_v0, %v860_v17 }
 0x184   : > { %v9751_v23 = vsel %vm6935_vm6, 4294967295, %v9750_v23  ;;  %v973_v45 = vor.u32 %v971_v3, %v970_v30  ;;  %v919_v52 = vsel %vm6352_vm5, %v6940_v57, 0  ;;  %v6947_v43 = vsel %vm9591_vm3, %v860_v17, %v6805_v18 }
 0x185   : > { %9752 = vst [vmem:[#allocation30_spill] sm:$0xff] %v9751_v23  ;;  %v997_v53 = vor.u32 %v995_v36, %v6930_v25  ;;  %v1065_v49 = vrot.slane %v1063_v39, 7  ;;  %v1076_v1 = vor.u32 %v1074_v20, %v1073_v41  ;;  %v1085_v31 = vsel %vm9590_vm13, %v1073_v41, %v1084_v12 }
 0x186   : > { %v976_v34 = vshrl.u32 %v919_v52, 16  ;;  %v1156_v0 = vsel %vm6599_vm2, %v6877_v6, %v1085_v31  ;;  %v974_v3 = vsel %vm9590_vm13, %v962_v5, %v973_v45  ;;  %v979_v62 = vshll.u32 %v919_v52, 16  ;;  %v6967_v45 = vld [vmem:[#allocation3 + $0x40] sm:$0xff] }
 0x187   : > { %v920_v15 = vsel %vm6352_vm5, %v6947_v43, 0  ;;  %v1068_v18 = vor.u32 %v1066_v21, %v1065_v49  ;;  %v1077_v17 = vsel %vm9590_vm13, %v1065_v49, %v1076_v1  ;;  %v1193_v36 = vrot.slane %v1156_v0, 1  ;;  %v6962_v12 = vpop.eup %5981  ;;  %v9755_v52 = vld [vmem:[#allocation39_spill] sm:$0xff] }
 0x188   : > { %v1038_v20 = vsel %vm6445_vm4, %v6913_v42, %v974_v3  ;;  %v1155_v7 = vsel %vm6599_vm2, %v6874_v54, %v1077_v17  ;;  %v978_v41 = vrot.slane %v976_v34, 7  ;;  %v6973_v21 = vmul.f32 %v6962_v12, %v2494_v58 }
 0x189   : > { %v1087_v5 = vshrl.u32 %v1038_v20, 16  ;;  %v1090_v39 = vshll.u32 %v1038_v20, 16  ;;  %v1069_v49 = vsel %vm9590_vm13, %v9755_v52, %v1068_v18  ;;  %v1191_v1 = vrot.slane %v1155_v7, 1  ;;  %v9756_v18 = vld [vmem:[#allocation36_spill] sm:$0xff] }
 0x18a   : > { %9754 = vst [vmem:[#allocation26_spill] sm:$0xff] %v6973_v21  ;;  %v984_v31 = vshrl.u32 %v920_v15, 16  ;;  %v1154_v0 = vsel %vm6599_vm2, %v6894_v27, %v1069_v49  ;;  %v981_v34 = vor.u32 %v979_v62, %v978_v41  ;;  %v987_v17 = vshll.u32 %v920_v15, 16  ;;  %v1164_v49 = vld [vmem:[#allocation3 + $0x8] sm:$0xf8] }
 0x18b   : > { %v6980_v3 = vrot.slane %v1087_v5, 7  ;;  %v1189_v20 = vrot.slane %v1154_v0, 1  ;;  %v1194_v61 = vsel %vm9589_vm1, %v1191_v1, %v1193_v36  ;;  %v6986_v58 = vsel %vm6352_vm5, %v6967_v45, 0 }
 0x18c   : > { %v986_v22 = vrot.slane %v984_v31, 7  ;;  %v9757_v7 = vrot.slane %v9756_v18, %v9748_v26  ;;  %v9758_v52 = vmov 0  ;;  %v1222_v27 = vsel %vm6935_vm6, %v6877_v6, %v1194_v61  ;;  %v9761_v31 = vld [vmem:[#allocation51_spill] sm:$0xff] }
 0x18d   : > { %v1092_v62 = vor.u32 %v1090_v39, %v6980_v3  ;;  %v982_v15 = vsel %vm9590_vm13, %v970_v30, %v981_v34  ;;  %v1000_v5 = vshrl.u32 %v6986_v58, 16  ;;  %v1190_v0 = vsel %vm9589_vm1, %v9761_v31, %v1189_v20 }
 0x18e   : > { %vm6991_vm7 = vcmp.ne.s16.totalorder %v9757_v7, 0  ;;  %v1192_v18 = vsel %vm9589_vm1, %v1189_v20, %v1191_v1  ;;  %v1257_v7 = vshrl.u32 %v1222_v27, 16  ;;  %v1260_v21 = vshll.u32 %v1222_v27, 16 }
 0x18f   : > { %v9759_v52 = vsel %vm6991_vm7, 4294967295, %v9758_v52  ;;  %v1220_v40 = vsel %vm6935_vm6, %v1164_v49, %v1190_v0  ;;  %v1221_v61 = vsel %vm6935_vm6, %v6874_v54, %v1192_v18  ;;  %v1093_v30 = vsel %vm9590_vm13, %v6922_v50, %v1092_v62 }
 0x190   : > { %9760 = vst [vmem:[#allocation33_spill] sm:$0xff] %v9759_v52  ;;  %v1039_v39 = vsel %vm6445_vm4, %v6940_v57, %v982_v15  ;;  %v1242_v34 = vshrl.u32 %v1220_v40, 16  ;;  %v1245_v31 = vshll.u32 %v1220_v40, 16  ;;  %v1249_v63 = vshrl.u32 %v1221_v61, 16  ;;  %v9762_v40 = vld [vmem:[#allocation37_spill] sm:$0xff] }
 0x191   : > { %v1252_v1 = vshll.u32 %v1221_v61, 16  ;;  %v1259_v20 = vrot.slane %v1257_v7, 7  ;;  %v1157_v27 = vsel %vm6599_vm2, %v6913_v42, %v1093_v30  ;;  %v1095_v49 = vshrl.u32 %v1039_v39, 16 }
 0x192   : > { %v1098_v0 = vshll.u32 %v1039_v39, 16  ;;  %v1244_v13 = vrot.slane %v1242_v34, 7  ;;  %v1251_v18 = vrot.slane %v1249_v63, 7  ;;  %v1195_v35 = vrot.slane %v1157_v27, 1 }
 0x193   : > { %v989_v19 = vor.u32 %v987_v17, %v986_v22  ;;  %v1262_v50 = vor.u32 %v1260_v21, %v1259_v20  ;;  %v7017_v62 = vrot.slane %v1095_v49, 7  ;;  %v998_v15 = vsel %vm9590_vm13, %v986_v22, %v997_v53  ;;  %v1231_v21 = vld [vmem:[#allocation3 + $0x8] sm:$0xf0] }
 0x194   : > { %v7020_v46 = vrot.slane %v1000_v5, 7  ;;  %v9763_v7 = vrot.slane %v9762_v40, %v9748_v26  ;;  %v9764_v61 = vmov 0  ;;  %v1247_v30 = vor.u32 %v1245_v31, %v1244_v13 }
 0x195   : > { %v1254_v39 = vor.u32 %v1252_v1, %v1251_v18  ;;  %v1196_v63 = vsel %vm9589_vm1, %v1193_v36, %v1195_v35  ;;  %v990_v17 = vsel %vm9590_vm13, %v978_v41, %v989_v19  ;;  %v1263_v34 = vsel %vm9590_vm13, %v1251_v18, %v1262_v50 }
 0x196   : > { %vm7025_vm8 = vcmp.ne.s16.totalorder %v9763_v7, 0  ;;  %v1223_v53 = vsel %vm6935_vm6, %v6913_v42, %v1196_v63  ;;  %v1100_v22 = vor.u32 %v1098_v0, %v7017_v62  ;;  %v1040_v5 = vsel %vm6445_vm4, %v6947_v43, %v990_v17  ;;  %v9767_v17 = vld [vmem:[#allocation38_spill] sm:$0xff] }
 0x197   : > { %v9765_v61 = vsel %vm7025_vm8, 4294967295, %v9764_v61  ;;  %v1255_v31 = vsel %vm9590_vm13, %v1244_v13, %v1254_v39  ;;  %v1339_v36 = vsel %vm6991_vm7, %v1231_v21, %v1247_v30  ;;  %v1341_v19 = vsel %vm6991_vm7, %v6877_v6, %v1263_v34 }
 0x198   : > { %9766 = vst [vmem:[#allocation19_spill] sm:$0xff] %v9765_v61  ;;  %v1265_v41 = vshrl.u32 %v1223_v53, 16  ;;  %v1340_v1 = vsel %vm6991_vm7, %v6874_v54, %v1255_v31  ;;  %v1361_v27 = vshrl.u32 %v1339_v36, 16  ;;  %v1364_v49 = vshll.u32 %v1339_v36, 16 }
 0x199   : > { %v1376_v0 = vshrl.u32 %v1341_v19, 16  ;;  %v1368_v18 = vshrl.u32 %v1340_v1, 16  ;;  %v1371_v50 = vshll.u32 %v1340_v1, 16  ;;  %v1379_v40 = vshll.u32 %v1341_v19, 16 }
 0x19a   : > { %v1267_v7 = vrot.slane %v1265_v41, 7  ;;  %v1363_v13 = vrot.slane %v1361_v27, 7  ;;  %v1268_v63 = vshll.u32 %v1223_v53, 16  ;;  %v1101_v30 = vsel %vm9590_vm13, %v6980_v3, %v1100_v22 }
 0x19b   : > { %v1378_v39 = vrot.slane %v1376_v0, 7  ;;  %v9768_v34 = vrot.slane %v9767_v17, %v9748_v26  ;;  %v9769_v4 = vmov 0  ;;  %v1370_v31 = vrot.slane %v1368_v18, 7 }
 0x19c   : > { %v1158_v36 = vsel %vm6599_vm2, %v6940_v57, %v1101_v30  ;;  %v1103_v19 = vshrl.u32 %v1040_v5, 16  ;;  %v1106_v41 = vshll.u32 %v1040_v5, 16  ;;  %v1366_v1 = vor.u32 %v1364_v49, %v1363_v13 }
 0x19d   : > { %vm7053_vm9 = vcmp.ne.s16.totalorder %v9768_v34, 0  ;;  %v1381_v27 = vor.u32 %v1379_v40, %v1378_v39  ;;  %v1270_v53 = vor.u32 %v1268_v63, %v1267_v7  ;;  %v1197_v0 = vrot.slane %v1158_v36, 1  ;;  %v9772_v36 = vld [vmem:[#allocation46_spill] sm:$0xff] }
 0x19e   : > { %v9770_v4 = vsel %vm7053_vm9, 4294967295, %v9769_v4  ;;  %v1373_v33 = vor.u32 %v1371_v50, %v1370_v31  ;;  %v1105_v3 = vrot.slane %v1103_v19, 7  ;;  %v1041_v22 = vsel %vm6445_vm4, %v6890_v44, %v998_v15 }
 0x19f   : > { %9771 = vst [vmem:[#allocation39_spill] sm:$0xff] %v9770_v4  ;;  %v1003_v17 = vshll.u32 %v6986_v58, 16  ;;  %v1382_v18 = vsel %vm9590_vm13, %v1370_v31, %v1381_v27  ;;  %v1458_v34 = vsel %vm7025_vm8, %v1231_v21, %v1366_v1  ;;  %v1271_v30 = vsel %vm9590_vm13, %v1259_v20, %v1270_v53 }
 0x1a0   : > { %v1198_v5 = vsel %vm9589_vm1, %v1195_v35, %v1197_v0  ;;  %v1374_v49 = vsel %vm9590_vm13, %v1363_v13, %v1373_v33  ;;  %v1460_v50 = vsel %vm7025_vm8, %v6877_v6, %v1382_v18  ;;  %v1500_v40 = vrot.slane %v1458_v34, 1  ;;  %v1469_v34 = vld [vmem:[#allocation3 + $0x10] sm:$0xf8] }
 0x1a1   : > { %v1342_v58 = vsel %vm6991_vm7, %v6913_v42, %v1271_v30  ;;  %v1459_v15 = vsel %vm7025_vm8, %v6874_v54, %v1374_v49  ;;  %v1503_v21 = vrot.slane %v1460_v50, 1  ;;  %v1224_v33 = vsel %vm6935_vm6, %v6940_v57, %v1198_v5 }
 0x1a2   : > { %v1384_v63 = vshrl.u32 %v1342_v58, 16  ;;  %v1387_v20 = vshll.u32 %v1342_v58, 16  ;;  %v1501_v31 = vrot.slane %v1459_v15, 1  ;;  %v1108_v35 = vor.u32 %v1106_v41, %v1105_v3 }
 0x1a3   : > { %v1111_v13 = vshrl.u32 %v1041_v22, 16  ;;  %v9773_v19 = vrot.slane %v9772_v36, %v9748_v26  ;;  %v9774_v1 = vmov 0  ;;  %v1273_v54 = vshrl.u32 %v1224_v33, 16 }
 0x1a4   : > { %v7089_v27 = vrot.slane %v1384_v63, 7  ;;  %v1276_v53 = vshll.u32 %v1224_v33, 16  ;;  %v1114_v18 = vshll.u32 %v1041_v22, 16  ;;  %v1502_v30 = vsel %vm9589_vm1, %v1500_v40, %v1501_v31 }
 0x1a5   : > { %vm7085_vm10 = vcmp.ne.s16.totalorder %v9773_v19, 0  ;;  %v1504_v49 = vsel %vm9589_vm1, %v1501_v31, %v1503_v21  ;;  %v1109_v41 = vsel %vm9590_vm13, %v7017_v62, %v1108_v35  ;;  %v7095_v5 = vrot.slane %v1111_v13, 7 }
 0x1a6   : > { %v9775_v1 = vsel %vm7085_vm10, 4294967295, %v9774_v1  ;;  %v1532_v50 = vsel %vm7053_vm9, %v1469_v34, %v1502_v30  ;;  %v1533_v58 = vsel %vm7053_vm9, %v6877_v6, %v1504_v49  ;;  %v1389_v15 = vor.u32 %v1387_v20, %v7089_v27 }
 0x1a7   : > { %9776 = vst [vmem:[#allocation36_spill] sm:$0xff] %v9775_v1  ;;  %v1275_v22 = vrot.slane %v1273_v54, 7  ;;  %v1554_v63 = vshrl.u32 %v1532_v50, 16  ;;  %v1557_v33 = vshll.u32 %v1532_v50, 16  ;;  %v1561_v40 = vshrl.u32 %v1533_v58, 16  ;;  %v9777_v50 = vld [vmem:[#allocation48_spill] sm:$0xff] }
 0x1a8   : > { %v1564_v36 = vshll.u32 %v1533_v58, 16  ;;  %v1390_v31 = vsel %vm9590_vm13, %v1378_v39, %v1389_v15  ;;  %v1159_v62 = vsel %vm6599_vm2, %v6947_v43, %v1109_v41  ;;  %v1116_v35 = vor.u32 %v1114_v18, %v7095_v5 }
 0x1a9   : > { %v1278_v19 = vor.u32 %v1276_v53, %v1275_v22  ;;  %v1556_v13 = vrot.slane %v1554_v63, 7  ;;  %v1563_v34 = vrot.slane %v1561_v40, 7  ;;  %v1461_v20 = vsel %vm7025_vm8, %v6913_v42, %v1390_v31  ;;  %v1543_v40 = vld [vmem:[#allocation3 + $0x10] sm:$0xf0] }
 0x1aa   : > { %v7111_v54 = vrot.slane %v1159_v62, 1  ;;  %v1505_v30 = vrot.slane %v1461_v20, 1  ;;  %v1117_v39 = vsel %vm9590_vm13, %v1105_v3, %v1116_v35  ;;  %v1005_v53 = vor.u32 %v1003_v17, %v7020_v46 }
 0x1ab   : > { %v1279_v49 = vsel %vm9590_vm13, %v1267_v7, %v1278_v19  ;;  %v9778_v41 = vrot.slane %v9777_v50, %v9748_v26  ;;  %v9779_v18 = vmov 0  ;;  %v1559_v58 = vor.u32 %v1557_v33, %v1556_v13 }
 0x1ac   : > { %v1566_v15 = vor.u32 %v1564_v36, %v1563_v34  ;;  %v1343_v63 = vsel %vm6991_vm7, %v6940_v57, %v1279_v49  ;;  %v1200_v7 = vsel %vm9589_vm1, %v1197_v0, %v7111_v54  ;;  %v1506_v3 = vsel %vm9589_vm1, %v1503_v21, %v1505_v30 }
 0x1ad   : > { %vm7119_vm11 = vcmp.ne.s16.totalorder %v9778_v41, 0  ;;  %v1392_v17 = vshrl.u32 %v1343_v63, 16  ;;  %v1395_v31 = vshll.u32 %v1343_v63, 16  ;;  %v1225_v26 = vsel %vm6935_vm6, %v6947_v43, %v1200_v7 }
 0x1ae   : > { %v9780_v18 = vsel %vm7119_vm11, 4294967295, %v9779_v18  ;;  %v1567_v19 = vsel %vm9590_vm13, %v1556_v13, %v1566_v15  ;;  %v1651_v33 = vsel %vm7085_vm10, %v1543_v40, %v1559_v58  ;;  %v1534_v36 = vsel %vm7053_vm9, %v6913_v42, %v1506_v3  ;;  %v7147_v3 = vld [vmem:[#allocation3 + $0x48] sm:$0xff] }
 0x1af   : > { %9781 = vst [vmem:[#allocation51_spill] sm:$0xff] %v9780_v18  ;;  %v1281_v62 = vshrl.u32 %v1225_v26, 16  ;;  %v1652_v0 = vsel %vm7085_vm10, %v6877_v6, %v1567_v19  ;;  %v1673_v21 = vshrl.u32 %v1651_v33, 16  ;;  %v1676_v35 = vshll.u32 %v1651_v33, 16 }
 0x1b0   : > { %v1569_v20 = vshrl.u32 %v1534_v36, 16  ;;  %v1680_v49 = vshrl.u32 %v1652_v0, 16  ;;  %v1683_v50 = vshll.u32 %v1652_v0, 16  ;;  %v1572_v41 = vshll.u32 %v1534_v36, 16 }
 0x1b1   : > { %v7141_v63 = vrot.slane %v1392_v17, 7  ;;  %v1675_v13 = vrot.slane %v1673_v21, 7  ;;  %v7145_v58 = vrot.slane %v1281_v62, 7  ;;  %v1284_v7 = vshll.u32 %v1225_v26, 16 }
 0x1b2   : > { %v7143_v15 = vrot.slane %v1569_v20, 7  ;;  %v1682_v28 = vrot.slane %v1680_v49, 7  ;;  %v1160_v19 = vsel %vm6599_vm2, %v6890_v44, %v1117_v39  ;;  %v1006_v33 = vsel %vm9590_vm13, %v6930_v25, %v1005_v53 }
 0x1b3   : > { %v1397_v48 = vor.u32 %v1395_v31, %v7141_v63  ;;  %v1678_v17 = vor.u32 %v1676_v35, %v1675_v13  ;;  %v1286_v0 = vor.u32 %v1284_v7, %v7145_v58  ;;  %v7157_v62 = vrot.slane %v1160_v19, 1 }
 0x1b4   : > { %v1574_v36 = vor.u32 %v1572_v41, %v7143_v15  ;;  %v1685_v26 = vor.u32 %v1683_v50, %v1682_v28  ;;  %v1042_v31 = vsel %vm6445_vm4, %v6967_v45, %v1006_v33  ;;  %v7167_v39 = vsel %vm6352_vm5, %v7147_v3, 0 }
 0x1b5   : > { %v1398_v21 = vsel %vm9590_vm13, %v7089_v27, %v1397_v48  ;;  %v1770_v25 = vsel %vm7119_vm11, %v1543_v40, %v1678_v17  ;;  %vm9588_vm12 = vsmask.f32 3328  ;;  %v1287_v48 = vsel %vm9590_vm13, %v1275_v22, %v1286_v0 }
 0x1b6   : > { %v1575_v53 = vsel %vm9590_vm13, %v1563_v34, %v1574_v36  ;;  %v1462_v35 = vsel %vm7025_vm8, %v6940_v57, %v1398_v21  ;;  %v1686_v27 = vsel %vm9590_vm13, %v1675_v13, %v1685_v26  ;;  %v1799_v20 = vshrl.u32 %v1770_v25, 16 }
 0x1b7   : > { %v1802_v49 = vshll.u32 %v1770_v25, 16  ;;  %v1653_v50 = vsel %vm7085_vm10, %v6913_v42, %v1575_v53  ;;  %v1771_v40 = vsel %vm7119_vm11, %v6877_v6, %v1686_v27  ;;  %v1507_v7 = vrot.slane %v1462_v35, 1 }
 0x1b8   : > { %v1688_v41 = vshrl.u32 %v1653_v50, 16  ;;  %v1691_v34 = vshll.u32 %v1653_v50, 16  ;;  %v1801_v19 = vrot.slane %v1799_v20, 4  ;;  %v1807_v17 = vshrl.u32 %v1771_v40, 16 }
 0x1b9   : > { %v1804_v33 = vrot.slane %v1802_v49, 5  ;;  %v1810_v36 = vshll.u32 %v1771_v40, 16  ;;  %v1508_v13 = vsel %vm9589_vm1, %v1505_v30, %v1507_v7  ;;  %v1344_v0 = vsel %vm6991_vm7, %v6947_v43, %v1287_v48 }
 0x1ba   : > { %v7183_v22 = vrot.slane %v1688_v41, 7  ;;  %v1202_v26 = vsel %vm9589_vm1, %v7111_v54, %v7157_v62  ;;  %v1809_v21 = vrot.slane %v1807_v17, 4  ;;  %v1535_v53 = vsel %vm7053_vm9, %v6940_v57, %v1508_v13 }
 0x1bb   : > { %v1805_v6 = vor.u32 %v1804_v33, %v1801_v19  ;;  %v1812_v25 = vrot.slane %v1810_v36, 5  ;;  %v1577_v27 = vshrl.u32 %v1535_v53, 16  ;;  %v1580_v20 = vshll.u32 %v1535_v53, 16 }
 0x1bc   : > { %v1693_v35 = vor.u32 %v1691_v34, %v7183_v22  ;;  %v1400_v30 = vshrl.u32 %v1344_v0, 16  ;;  %v1403_v50 = vshll.u32 %v1344_v0, 16  ;;  %v1226_v48 = vsel %vm6935_vm6, %v6890_v44, %v1202_v26 }
 0x1bd   : > { %v1813_v49 = vor.u32 %v1812_v25, %v1809_v21  ;;  %v1119_v40 = vshrl.u32 %v1042_v31, 16  ;;  %v7200_v41 = vrot.slane %v1577_v27, 7  ;;  %v1289_v33 = vshrl.u32 %v1226_v48, 16 }
 0x1be   : > { %v1694_v54 = vsel %vm9590_vm13, %v1682_v28, %v1693_v35  ;;  %v1402_v19 = vrot.slane %v1400_v30, 7  ;;  %v1292_v36 = vshll.u32 %v1226_v48, 16  ;;  %v1122_v53 = vshll.u32 %v1042_v31, 16 }
 0x1bf   : > { %v1814_v17 = vsel %vm9588_vm12, %v1805_v6, %v1813_v49  ;;  %v1772_v34 = vsel %vm7119_vm11, %v6913_v42, %v1694_v54  ;;  %v7206_v13 = vrot.slane %v1119_v40, 7  ;;  %v1582_v26 = vor.u32 %v1580_v20, %v7200_v41  ;;  %v7217_v40 = vld [vmem:[#allocation3 + $0x50] sm:$0xf] }
 0x1c0   : > { %5772 = vmatprep.mubr.bf16.mxu1 %v1814_v17  ;;  %v1816_v0 = vshrl.u32 %v1772_v34, 16  ;;  %v1819_v21 = vshll.u32 %v1772_v34, 16  ;;  %v1405_v25 = vor.u32 %v1403_v50, %v1402_v19  ;;  %v7209_v28 = vrot.slane %v1289_v33, 7 }
 0x1c1   : > { %v1008_v35 = vshrl.u32 %v7167_v39, 16  ;;  %v1011_v6 = vshll.u32 %v7167_v39, 16  ;;  %v1583_v42 = vsel %vm9590_vm13, %v7143_v15, %v1582_v26  ;;  %v1124_v50 = vor.u32 %v1122_v53, %v7206_v13 }
 0x1c2   : > { %v1818_v27 = vrot.slane %v1816_v0, 4  ;;  %v1821_v30 = vrot.slane %v1819_v21, 5  ;;  %v1406_v48 = vsel %vm9590_vm13, %v7141_v63, %v1405_v25  ;;  %v1654_v20 = vsel %vm7085_vm10, %v6940_v57, %v1583_v42 }
 0x1c3   : > { %v1463_v31 = vsel %vm7025_vm8, %v6947_v43, %v1406_v48  ;;  %v1294_v39 = vor.u32 %v1292_v36, %v7209_v28  ;;  %v1696_v33 = vshrl.u32 %v1654_v20, 16  ;;  %v1699_v15 = vshll.u32 %v1654_v20, 16 }
 0x1c4   : > { %v1822_v54 = vor.u32 %v1821_v30, %v1818_v27  ;;  %v1509_v17 = vrot.slane %v1463_v31, 1  ;;  %v1125_v34 = vsel %vm9590_vm13, %v7095_v5, %v1124_v50  ;;  %v7231_v0 = vrot.slane %v1008_v35, 7 }
 0x1c5   : > { %v1295_v63 = vsel %vm9590_vm13, %v7145_v58, %v1294_v39  ;;  %v924_v21 = vsel %vm6352_vm5, %v7217_v40, 0  ;;  %v7237_v26 = vrot.slane %v1696_v33, 7  ;;  %v1161_v27 = vsel %vm6599_vm2, %v6967_v45, %v1125_v34 }
 0x1c6   : > { %v1823_v36 = vsel %vm9588_vm12, %v1813_v49, %v1822_v54  ;;  %v1510_v25 = vsel %vm9589_vm1, %v1507_v7, %v1509_v17  ;;  %v1345_v53 = vsel %vm6991_vm7, %v6890_v44, %v1295_v63  ;;  %v7250_v7 = vrot.slane %v1161_v27, 1 }
 0x1c7   : > { %5773 = vmatmul.mubr.bf16.vlgmr.msra.gmra.mrb[0].mxu1 %v1823_v36  ;;  %v1536_v5 = vsel %vm7053_vm9, %v6947_v43, %v1510_v25  ;;  %v1408_v58 = vshrl.u32 %v1345_v53, 16  ;;  %v1411_v35 = vshll.u32 %v1345_v53, 16  ;;  %v1701_v49 = vor.u32 %v1699_v15, %v7237_v26  ;;  %v9782_v15 = vld [vmem:[#allocation44_spill] sm:$0xff] }
 0x1c8   : > { %v1585_v30 = vshrl.u32 %v1536_v5, 16  ;;  %v1588_v42 = vshll.u32 %v1536_v5, 16  ;;  %v1013_v20 = vor.u32 %v1011_v6, %v7231_v0  ;;  %v1016_v31 = vshrl.u32 %v924_v21, 16 }
 0x1c9   : > { %v7252_v48 = vrot.slane %v1408_v58, 7  ;;  %v1019_v39 = vshll.u32 %v924_v21, 16  ;;  %v1702_v50 = vsel %vm9590_vm13, %v7183_v22, %v1701_v49  ;;  %v1204_v63 = vsel %vm9589_vm1, %v7157_v62, %v7250_v7 }
 0x1ca   : > { %v1587_v33 = vrot.slane %v1585_v30, 7  ;;  %v2488_v34 = vsub.f32 %v9782_v15, %v6871_v56  ;;  %v1773_v36 = vsel %vm7119_vm11, %v6940_v57, %v1702_v50  ;;  %v1227_v6 = vsel %vm6935_vm6, %v6967_v45, %v1204_v63 }
 0x1cb   : > { %v1413_v25 = vor.u32 %v1411_v35, %v7252_v48  ;;  %v1014_v22 = vsel %vm9590_vm13, %v7020_v46, %v1013_v20  ;;  %v1825_v21 = vshrl.u32 %v1773_v36, 16  ;;  %v1828_v53 = vshll.u32 %v1773_v36, 16 }
 0x1cc   : > { %v1590_v5 = vor.u32 %v1588_v42, %v1587_v33  ;;  %v1297_v62 = vshrl.u32 %v1227_v6, 16  ;;  %v1300_v27 = vshll.u32 %v1227_v6, 16  ;;  %v1043_v57 = vsel %vm6445_vm4, %v7147_v3, %v1014_v22 }
 0x1cd   : > { %v1414_v58 = vsel %vm9590_vm13, %v1402_v19, %v1413_v25  ;;  %v1018_v49 = vrot.slane %v1016_v31, 7  ;;  %v1827_v35 = vrot.slane %v1825_v21, 4  ;;  %v1830_v30 = vrot.slane %v1828_v53, 5 }
 0x1ce   : > { %v1591_v50 = vsel %vm9590_vm13, %v7200_v41, %v1590_v5  ;;  %v1464_v46 = vsel %vm7025_vm8, %v6890_v44, %v1414_v58  ;;  %v7285_v20 = vrot.slane %v1297_v62, 7  ;;  %v1127_v63 = vshrl.u32 %v1043_v57, 16 }
 0x1cf   : > { %v1655_v42 = vsel %vm7085_vm10, %v6947_v43, %v1591_v50  ;;  %v7283_v19 = vrot.slane %v1464_v46, 1  ;;  %v1831_v36 = vor.u32 %v1830_v30, %v1827_v35  ;;  %v1130_v6 = vshll.u32 %v1043_v57, 16  ;;  %v9783_v50 = vld [vmem:[#allocation45_spill] sm:$0xff] }
 0x1d0   : > { %v1704_v31 = vshrl.u32 %v1655_v42, 16  ;;  %v1707_v25 = vshll.u32 %v1655_v42, 16  ;;  %v1302_v22 = vor.u32 %v1300_v27, %v7285_v20  ;;  %v1129_v21 = vrot.slane %v1127_v63, 7 }
 0x1d1   : > { %v1512_v41 = vsel %vm9589_vm1, %v1509_v17, %v7283_v19  ;;  %v1021_v53 = vor.u32 %v1019_v39, %v1018_v49  ;;  %v1832_v5 = vsel %vm9588_vm12, %v1822_v54, %v1831_v36  ;;  %v2489_v35 = vsub.f32 %v9783_v50, %v6871_v56  ;;  %v9784_v49 = vld [vmem:[#allocation47_spill] sm:$0xff] }
 0x1d2   : > { %v1706_v58 = vrot.slane %v1704_v31, 7  ;;  %v1537_v62 = vsel %vm7053_vm9, %v6890_v44, %v1512_v41  ;;  %5776 = vmatprep.mubr.bf16.mxu1 %v1832_v5  ;;  %v1303_v17 = vsel %vm9590_vm13, %v7209_v28, %v1302_v22  ;;  %v1132_v46 = vor.u32 %v1130_v6, %v1129_v21  ;;  %v9785_v6 = vld [vmem:[#allocation49_spill] sm:$0xff] }
 0x1d3   : > { %v1593_v30 = vshrl.u32 %v1537_v62, 16  ;;  %v1596_v57 = vshll.u32 %v1537_v62, 16  ;;  %v1346_v54 = vsel %vm6991_vm7, %v6967_v45, %v1303_v17  ;;  %v1022_v39 = vsel %vm9590_vm13, %v7231_v0, %v1021_v53 }
 0x1d4   : > { %v1709_v27 = vor.u32 %v1707_v25, %v1706_v58  ;;  %v2490_v42 = vsub.f32 %v9784_v49, %v6871_v56  ;;  %v1416_v31 = vshrl.u32 %v1346_v54, 16  ;;  %v1419_v41 = vshll.u32 %v1346_v54, 16 }
 0x1d5   : > { %v7305_v63 = vrot.slane %v1593_v30, 7  ;;  %v1133_v5 = vsel %vm9590_vm13, %v7206_v13, %v1132_v46  ;;  %v1044_v0 = vsel %vm6445_vm4, %v7217_v40, %v1022_v39  ;;  %v2491_v22 = vsub.f32 %v9785_v6, %v6871_v56  ;;  %v9786_v39 = vld [vmem:[#allocation50_spill] sm:$0xff] }
 0x1d6   : > { %v1710_v28 = vsel %vm9590_vm13, %v7237_v26, %v1709_v27  ;;  %v1162_v25 = vsel %vm6599_vm2, %v7147_v3, %v1133_v5  ;;  %v7323_v62 = vrot.slane %v1416_v31, 7  ;;  %v1135_v17 = vshrl.u32 %v1044_v0, 16 }
 0x1d7   : > { %v1774_v53 = vsel %vm7119_vm11, %v6947_v43, %v1710_v28  ;;  %v1598_v13 = vor.u32 %v1596_v57, %v7305_v63  ;;  %v1205_v26 = vrot.slane %v1162_v25, 1  ;;  %v1138_v46 = vshll.u32 %v1044_v0, 16 }
 0x1d8   : > { %v1834_v50 = vshrl.u32 %v1774_v53, 16  ;;  %v1837_v30 = vshll.u32 %v1774_v53, 16  ;;  %v1421_v40 = vor.u32 %v1419_v41, %v7323_v62  ;;  %v2492_v49 = vsub.f32 %v9786_v39, %v6871_v56 }
 0x1d9   : > { %v1599_v27 = vsel %vm9590_vm13, %v1587_v33, %v1598_v13  ;;  %v1206_v54 = vsel %vm9589_vm1, %v7250_v7, %v1205_v26  ;;  %v1137_v53 = vrot.slane %v1135_v17, 7  ;;  %v2496_v39 = vsub.f32 %v6735_v8, %v6871_v56 }
 0x1da   : > { %v1836_v43 = vrot.slane %v1834_v50, 4  ;;  %v1839_v5 = vrot.slane %v1837_v30, 5  ;;  %v1656_v57 = vsel %vm7085_vm10, %v6890_v44, %v1599_v27  ;;  %v1228_v31 = vsel %vm6935_vm6, %v7147_v3, %v1206_v54 }
 0x1db   : > { %v1712_v28 = vshrl.u32 %v1656_v57, 16  ;;  %v1715_v33 = vshll.u32 %v1656_v57, 16  ;;  %v1422_v41 = vsel %vm9590_vm13, %v7252_v48, %v1421_v40  ;;  %v1305_v25 = vshrl.u32 %v1228_v31, 16 }
 0x1dc   : > { %v1840_v7 = vor.u32 %v1839_v5, %v1836_v43  ;;  %v1465_v0 = vsel %vm7025_vm8, %v6967_v45, %v1422_v41  ;;  %v1308_v6 = vshll.u32 %v1228_v31, 16  ;;  %v2493_v27 = vsub.f32 %v6713_v51, %v6871_v56 }
 0x1dd   : > { %v7342_v13 = vrot.slane %v1712_v28, 7  ;;  %v7344_v50 = vrot.slane %v1465_v0, 1  ;;  %v7346_v30 = vrot.slane %v1305_v25, 7  ;;  %v1140_v48 = vor.u32 %v1138_v46, %v1137_v53 }
 0x1de   : > { %v1841_v54 = vsel %vm9588_vm12, %v1831_v36, %v1840_v7  ;;  %v2495_v40 = vsub.f32 %v6707_v9, %v6871_v56  ;;  %v9787_v51 = vsub.f32 %v6611_v11, %v6871_v56  ;;  %v7374_v46 = vmul.f32 %v6962_v12, %v2488_v34 }
 0x1df   : > { %5777 = vmatmul.mubr.bf16.gmra.mrb[4].mxu1 %v1841_v54  ;;  %v1717_v17 = vor.u32 %v1715_v33, %v7342_v13  ;;  %v1514_v43 = vsel %vm9589_vm1, %v7283_v19, %v7344_v50  ;;  %v1310_v5 = vor.u32 %v1308_v6, %v7346_v30  ;;  %v1141_v8 = vsel %vm9590_vm13, %v1129_v21, %v1140_v48  ;;  %v1045_v33 = vld [vmem:[#allocation3 + $0x50] sm:$0x1f] }
 0x1e0   : > { %v7364_v36 = vmul.f32 %v6962_v12, %v9787_v51  ;;  %v1538_v9 = vsel %vm7053_vm9, %v6967_v45, %v1514_v43  ;;  %v7377_v19 = vmul.f32 %v6962_v12, %v2489_v35  ;;  %v1163_v34 = vsel %vm6599_vm2, %v1045_v33, %v1141_v8 }
 0x1e1   : > { %v1718_v11 = vsel %vm9590_vm13, %v1706_v58, %v1717_v17  ;;  %v1601_v57 = vshrl.u32 %v1538_v9, 16  ;;  %v1604_v31 = vshll.u32 %v1538_v9, 16  ;;  %v1311_v28 = vsel %vm9590_vm13, %v7285_v20, %v1310_v5  ;;  %v7404_v5 = vld [vmem:[#allocation3 + $0x50] sm:$0xff] }
 0x1e2   : > { %v1775_v21 = vsel %vm7119_vm11, %v6890_v44, %v1718_v11  ;;  %v1347_v15 = vsel %vm6991_vm7, %v7147_v3, %v1311_v28  ;;  %v7391_v35 = vmul.f32 %v6962_v12, %v2490_v42  ;;  %v1207_v6 = vrot.slane %v1163_v34, 1  ;;  %v1166_v42 = vld [vmem:[#allocation3 + $0x58] sm:$0xf] }
 0x1e3   : > { %v1843_v58 = vshrl.u32 %v1775_v21, 16  ;;  %v1846_v41 = vshll.u32 %v1775_v21, 16  ;;  %v7393_v25 = vrot.slane %v1601_v57, 7  ;;  %v1424_v20 = vshrl.u32 %v1347_v15, 16 }
 0x1e4   : > { %v1427_v0 = vshll.u32 %v1347_v15, 16  ;;  %v7396_v53 = vmul.f32 %v6962_v12, %v2491_v22  ;;  %v7399_v44 = vmul.f32 %v6962_v12, %v2492_v49  ;;  %v1208_v51 = vsel %vm9589_vm1, %v1205_v26, %v1207_v6 }
 0x1e5   : > { %v1845_v54 = vrot.slane %v1843_v58, 4  ;;  %v1848_v48 = vrot.slane %v1846_v41, 5  ;;  %v1606_v17 = vor.u32 %v1604_v31, %v7393_v25  ;;  %v7402_v43 = vrot.slane %v1424_v20, 7 }
 0x1e6   : > { %v1230_v9 = vsel %vm6935_vm6, %v1166_v42, %v1207_v6  ;;  %v7410_v22 = vmul.f32 %v6962_v12, %v2493_v27  ;;  %v7413_v49 = vmul.f32 %v6962_v12, %v2495_v40  ;;  %v1229_v26 = vsel %vm6935_vm6, %v7404_v5, %v1208_v51  ;;  %v9789_v51 = vld [vmem:[#allocation29_spill] sm:$0xff] }
 0x1e7   : > { %v7415_v8 = vor.u32 %v1848_v48, %v1845_v54  ;;  %v1607_v11 = vsel %vm9590_vm13, %v7305_v63, %v1606_v17  ;;  %v1429_v57 = vor.u32 %v1427_v0, %v7402_v43  ;;  %v1313_v27 = vshrl.u32 %v1229_v26, 16 }
 0x1e8   : > { %v1657_v31 = vsel %vm7085_vm10, %v6967_v45, %v1607_v11  ;;  %v1316_v28 = vshll.u32 %v1229_v26, 16  ;;  %v1321_v33 = vshrl.u32 %v1230_v9, 16  ;;  %v1324_v20 = vshll.u32 %v1230_v9, 16 }
 0x1e9   : > { %v1850_v40 = vsel %vm9588_vm12, %v1840_v7, %v7415_v8  ;;  %v1720_v21 = vshrl.u32 %v1657_v31, 16  ;;  %v1723_v15 = vshll.u32 %v1657_v31, 16  ;;  %v1430_v63 = vsel %vm9590_vm13, %v7323_v62, %v1429_v57  ;;  %v9788_v7 = vld [vmem:[#allocation27_spill] sm:$0xff]  ;;  %v9790_v57 = vld [vmem:[#allocation28_spill] sm:$0xff] }
 0x1ea   : > { %5780 = vmatprep.mubr.bf16.mxu1 %v1850_v40  ;;  %v1466_v34 = vsel %vm7025_vm8, %v7147_v3, %v1430_v63  ;;  %v1315_v58 = vrot.slane %v1313_v27, 7  ;;  %v1323_v41 = vrot.slane %v1321_v33, 7  ;;  %v7438_v54 = vmul.f32 %v6962_v12, %v2496_v39  ;;  %v9791_v39 = vld [vmem:[#allocation31_spill] sm:$0xff]  ;;  %v9792_v33 = vld [vmem:[#allocation32_spill] sm:$0xff] }
 0x1eb   : > { %v7433_v0 = vrot.slane %v1720_v21, 7  ;;  %v7435_v6 = vrot.slane %v1466_v34, 1  ;;  %v2477_v48 = vsub.f32 %v9788_v7, %v6871_v56  ;;  %v2478_v11 = vsub.f32 %v9789_v51, %v6871_v56 }
 0x1ec   : > { %v1318_v17 = vor.u32 %v1316_v28, %v1315_v58  ;;  %v1326_v62 = vor.u32 %v1324_v20, %v1323_v41  ;;  %v2479_v26 = vsub.f32 %v9790_v57, %v6871_v56  ;;  %v2480_v27 = vsub.f32 %v9791_v39, %v6871_v56 }
 0x1ed   : > { %v1725_v9 = vor.u32 %v1723_v15, %v7433_v0  ;;  %v1516_v31 = vsel %vm9589_vm1, %v7344_v50, %v7435_v6  ;;  %v2481_v40 = vsub.f32 %v9792_v33, %v6871_v56  ;;  %v9793_v15 = vld [vmem:[#allocation35_spill] sm:$0xff]  ;;  %v7475_v33 = vmul.f32 %v6962_v12, %v2477_v48 }
 0x1ee   : > { %v1539_v28 = vsel %vm7053_vm9, %v7147_v3, %v1516_v31  ;;  %v1319_v21 = vsel %vm9590_vm13, %v7346_v30, %v1318_v17  ;;  %v1327_v63 = vsel %vm9590_vm13, %v1315_v58, %v1326_v62  ;;  %v2482_v34 = vsub.f32 %v9793_v15, %v6871_v56 }
 0x1ef   : > { %v1726_v50 = vsel %vm9590_vm13, %v7342_v13, %v1725_v9  ;;  %v1609_v41 = vshrl.u32 %v1539_v28, 16  ;;  %v1612_v20 = vshll.u32 %v1539_v28, 16  ;;  %v1348_v7 = vsel %vm6991_vm7, %v7404_v5, %v1319_v21 }
 0x1f0   : > { %v1776_v51 = vsel %vm7119_vm11, %v6967_v45, %v1726_v50  ;;  %v1432_v57 = vshrl.u32 %v1348_v7, 16  ;;  %v1435_v30 = vshll.u32 %v1348_v7, 16  ;;  %v1349_v58 = vsel %vm6991_vm7, %v1166_v42, %v1327_v63 }
 0x1f1   : > { %v1852_v17 = vshrl.u32 %v1776_v51, 16  ;;  %v1855_v62 = vshll.u32 %v1776_v51, 16  ;;  %v7472_v31 = vrot.slane %v1609_v41, 7  ;;  %v1440_v13 = vshrl.u32 %v1349_v58, 16 }
 0x1f2   : > { %v1434_v9 = vrot.slane %v1432_v57, 7  ;;  %v1443_v39 = vshll.u32 %v1349_v58, 16  ;;  %v7478_v28 = vmul.f32 %v6962_v12, %v2478_v11  ;;  %v7482_v42 = vmul.f32 %v6962_v12, %v2479_v26 }
 0x1f3   : > { %v1854_v21 = vrot.slane %v1852_v17, 4  ;;  %v1857_v45 = vrot.slane %v1855_v62, 5  ;;  %v1614_v15 = vor.u32 %v1612_v20, %v7472_v31  ;;  %v1442_v50 = vrot.slane %v1440_v13, 7 }
 0x1f4   : > { %9794 = vst [vmem:[#allocation37_spill] sm:$0xff] %v7478_v28  ;;  %v1437_v7 = vor.u32 %v1435_v30, %v1434_v9  ;;  %9795 = vst [vmem:[#allocation38_spill] sm:$0xff] %v7482_v42  ;;  %v7485_v63 = vmul.f32 %v6962_v12, %v2480_v27  ;;  %v7488_v41 = vmul.f32 %v6962_v12, %v2481_v40  ;;  %v9799_v27 = vld [vmem:[#allocation34_spill] sm:$0xff]  ;;  %v9800_v40 = vld [vmem:[#allocation40_spill] sm:$0xff] }
 0x1f5   : > { %v1858_v48 = vor.u32 %v1857_v45, %v1854_v21  ;;  %v1615_v11 = vsel %vm9590_vm13, %v7393_v25, %v1614_v15  ;;  %v1445_v51 = vor.u32 %v1443_v39, %v1442_v50  ;;  %v7493_v57 = vmul.f32 %v6962_v12, %v2482_v34  ;;  %v1350_v39 = vld [vmem:[#allocation3 + $0x58] sm:$0x1f]  ;;  %v1479_v50 = vld [vmem:[#allocation3 + $0x60] sm:$0xf] }
 0x1f6   : > { %9796 = vst [vmem:[#allocation46_spill] sm:$0xff] %v7485_v63  ;;  %9797 = vst [vmem:[#allocation48_spill] sm:$0xff] %v7488_v41  ;;  %v1658_v20 = vsel %vm7085_vm10, %v7147_v3, %v1615_v11  ;;  %v1438_v26 = vsel %vm9590_vm13, %v7402_v43, %v1437_v7  ;;  %v2483_v30 = vsub.f32 %v9799_v27, %v6871_v56  ;;  %v9803_v7 = vld [vmem:[#allocation42_spill] sm:$0xff] }
 0x1f7   : > { %9798 = vst [vmem:[#allocation44_spill] sm:$0xff] %v7493_v57  ;;  %v2484_v58 = vsub.f32 %v9800_v40, %v6871_v56  ;;  %v1859_v25 = vsel %vm9588_vm12, %v7415_v8, %v1858_v48  ;;  %v1728_v17 = vshrl.u32 %v1658_v20, 16  ;;  %v1731_v62 = vshll.u32 %v1658_v20, 16  ;;  %v9804_v20 = vld [vmem:[#allocation43_spill] sm:$0xff] }
 0x1f8   : > { %v1467_v34 = vsel %vm7025_vm8, %v7404_v5, %v1438_v26  ;;  %5781 = vmatmul.mubr.bf16.gmra.mrb[8].mxu1 %v1859_v25  ;;  %v1446_v43 = vsel %vm9590_vm13, %v1434_v9, %v1445_v51  ;;  %v7511_v21 = vmul.f32 %v6962_v12, %v2483_v30  ;;  %v2485_v11 = vsub.f32 %v9803_v7, %v6871_v56 }
 0x1f9   : > { %v1517_v13 = vrot.slane %v1467_v34, 1  ;;  %v7514_v45 = vmul.f32 %v6962_v12, %v2484_v58  ;;  %v1730_v15 = vrot.slane %v1728_v17, 7  ;;  %v1468_v8 = vsel %vm7025_vm8, %v1350_v39, %v1446_v43  ;;  %v1478_v17 = vld [vmem:[#allocation3 + $0x58] sm:$0xff] }
 0x1fa   : > { %9801 = vst [vmem:[#allocation45_spill] sm:$0xff] %v7511_v21  ;;  %v2486_v26 = vsub.f32 %v9804_v20, %v6871_v56  ;;  %v1519_v51 = vrot.slane %v1468_v8, 1  ;;  %v7528_v40 = vmul.f32 %v6962_v12, %v2485_v11 }
 0x1fb   : > { %9802 = vst [vmem:[#allocation47_spill] sm:$0xff] %v7514_v45  ;;  %v1518_v9 = vsel %vm9589_vm1, %v7435_v6, %v1517_v13  ;;  %v1733_v27 = vor.u32 %v1731_v62, %v1730_v15 }
 0x1fc   : > { %v1540_v30 = vsel %vm7053_vm9, %v7404_v5, %v1518_v9  ;;  %9805 = vst [vmem:[#allocation49_spill] sm:$0xff] %v7528_v40  ;;  %v7531_v58 = vmul.f32 %v6962_v12, %v2486_v26  ;;  %v1520_v34 = vsel %vm9589_vm1, %v1517_v13, %v1519_v51  ;;  %v1542_v56 = vsel %vm7053_vm9, %v1479_v50, %v1519_v51 }
 0x1fd   : > { %v1617_v25 = vshrl.u32 %v1540_v30, 16  ;;  %v1734_v6 = vsel %vm9590_vm13, %v7433_v0, %v1733_v27  ;;  %v1541_v62 = vsel %vm7053_vm9, %v1478_v17, %v1520_v34  ;;  %v1633_v39 = vshrl.u32 %v1542_v56, 16 }
 0x1fe   : > { %9806 = vst [vmem:[#allocation50_spill] sm:$0xff] %v7531_v58  ;;  %v1777_v43 = vsel %vm7119_vm11, %v7147_v3, %v1734_v6  ;;  %v1620_v8 = vshll.u32 %v1540_v30, 16  ;;  %v1625_v7 = vshrl.u32 %v1541_v62, 16  ;;  %v1636_v26 = vshll.u32 %v1542_v56, 16  ;;  %v9814_v58 = vld [vmem:[#allocation24_spill] sm:$0xff] }
 0x1ff   : > { %v1619_v12 = vrot.slane %v1617_v25, 7  ;;  %v1861_v11 = vshrl.u32 %v1777_v43, 16  ;;  %v1864_v20 = vshll.u32 %v1777_v43, 16  ;;  %v1635_v13 = vrot.slane %v1633_v39, 7 }
 0x200   : > { %v1627_v51 = vrot.slane %v1625_v7, 7  ;;  %v1628_v61 = vshll.u32 %v1541_v62, 16 }
 0x201   : > { %v1622_v9 = vor.u32 %v1620_v8, %v1619_v12  ;;  %v1863_v52 = vrot.slane %v1861_v11, 4  ;;  %v1866_v0 = vrot.slane %v1864_v20, 5  ;;  %v1638_v27 = vor.u32 %v1636_v26, %v1635_v13  ;;  %v1662_v26 = vld [vmem:[#allocation3 + $0x60] sm:$0x1f] }
 0x202   : > { %v1630_v4 = vor.u32 %v1628_v61, %v1627_v51 }
 0x203   : > { %v1623_v34 = vsel %vm9590_vm13, %v7472_v31, %v1622_v9  ;;  %v1867_v23 = vor.u32 %v1866_v0, %v1863_v52  ;;  %v1639_v30 = vsel %vm9590_vm13, %v1627_v51, %v1638_v27 }
 0x204   : > { %v1659_v3 = vsel %vm7085_vm10, %v7404_v5, %v1623_v34  ;;  %v1631_v56 = vsel %vm9590_vm13, %v1619_v12, %v1630_v4  ;;  %v1661_v6 = vsel %vm7085_vm10, %v1479_v50, %v1639_v30 }
 0x205   : > { %v1736_v25 = vshrl.u32 %v1659_v3, 16  ;;  %v1868_v62 = vsel %vm9588_vm12, %v1858_v48, %v1867_v23  ;;  %v1660_v39 = vsel %vm7085_vm10, %v1478_v17, %v1631_v56  ;;  %v1752_v31 = vshrl.u32 %v1661_v6, 16 }
 0x206   : > { %5784 = vmatprep.mubr.bf16.mxu1 %v1868_v62  ;;  %v1739_v61 = vshll.u32 %v1659_v3, 16  ;;  %v1744_v43 = vshrl.u32 %v1660_v39, 16  ;;  %v1755_v7 = vshll.u32 %v1661_v6, 16  ;;  %v1747_v13 = vshll.u32 %v1660_v39, 16 }
 0x207   : > { %v1738_v52 = vrot.slane %v1736_v25, 7  ;;  %v1754_v8 = vrot.slane %v1752_v31, 7 }
 0x208   : > { %v1746_v20 = vrot.slane %v1744_v43, 7 }
 0x209   : > { %v1741_v11 = vor.u32 %v1739_v61, %v1738_v52  ;;  %v1757_v4 = vor.u32 %v1755_v7, %v1754_v8 }
 0x20a   : > { %v1749_v50 = vor.u32 %v1747_v13, %v1746_v20 }
 0x20b   : > { %v1742_v12 = vsel %vm9590_vm13, %v1730_v15, %v1741_v11  ;;  %v1758_v9 = vsel %vm9590_vm13, %v1746_v20, %v1757_v4 }
 0x20c   : > { %v1778_v48 = vsel %vm7119_vm11, %v7404_v5, %v1742_v12  ;;  %v1750_v27 = vsel %vm9590_vm13, %v1738_v52, %v1749_v50  ;;  %v1780_v34 = vsel %vm7119_vm11, %v1662_v26, %v1758_v9 }
 0x20d   : > { %v1870_v51 = vshrl.u32 %v1778_v48, 16  ;;  %v1873_v0 = vshll.u32 %v1778_v48, 16  ;;  %v1779_v3 = vsel %vm7119_vm11, %v1478_v17, %v1750_v27  ;;  %v1888_v30 = vshrl.u32 %v1780_v34, 16 }
 0x20e   : > { %v1891_v25 = vshll.u32 %v1780_v34, 16  ;;  %v1879_v6 = vshrl.u32 %v1779_v3, 16  ;;  %v1882_v62 = vshll.u32 %v1779_v3, 16 }
 0x20f   : > { %v1872_v15 = vrot.slane %v1870_v51, 4  ;;  %v1875_v56 = vrot.slane %v1873_v0, 5  ;;  %v1890_v39 = vrot.slane %v1888_v30, 4 }
 0x210   : > { %v1893_v5 = vrot.slane %v1891_v25, 5  ;;  %v1881_v61 = vrot.slane %v1879_v6, 4  ;;  %v1884_v43 = vrot.slane %v1882_v62, 5  ;;  %v5963_v6 = vld [vmem:[%s9494_s3 + $0x40] sm:$0xff]   ;;  %v5964_v62 = vld [vmem:[%s9494_s3 + $0x48] sm:$0xff]  }
 0x211   : > { %v1876_v31 = vor.u32 %v1875_v56, %v1872_v15  ;;  %5828 = vmatprep.subr.bf16.mxu1 %v5963_v6 }
 0x212   : > { %v1885_v52 = vor.u32 %v1884_v43, %v1881_v61  ;;  %v1894_v7 = vor.u32 %v1893_v5, %v1890_v39  ;;  %5829 = vmatpush3.bf16.msra.mxu1 %v5963_v6  ;;  %v5965_v43 = vld [vmem:[%s9494_s3 + $0x50] sm:$0xff]  }
 0x213   : > { %v1877_v8 = vsel %vm9588_vm12, %v1867_v23, %v1876_v31  ;;  %5830 = vmatprep.subr.bf16.mxu1 %v5964_v62 }
 0x214   : > { %5785 = vmatmul.mubr.bf16.gmra.mrb[12].mxu1 %v1877_v8  ;;  %v1886_v11 = vsel %vm9588_vm12, %v1876_v31, %v1885_v52  ;;  %v1895_v17 = vsel %vm9588_vm12, %v1885_v52, %v1894_v7 }
 0x215   : > { %5788 = vmatprep.mubr.bf16.mxu1 %v1886_v11 }
 0x216   : > { %5831 = vmatpush3.bf16.msra.mxu1 %v5964_v62 }
 0x217   : > { %5832 = vmatprep.subr.bf16.mxu1 %v5965_v43 }
 0x21a   : > { %5833 = vmatpush3.bf16.msra.mxu1 %v5965_v43 }
 0x21c   : > { %5789 = vmatmul.mubr.bf16.gmra.mrb[16].mxu1 %v1895_v17  ;;  %v5966_v17 = vld [vmem:[%s9494_s3 + $0x58] sm:$0xff]  }
 0x21d   : > { %5834 = vmatprep.subr.bf16.mxu1 %v5966_v17 }
 0x21e   : > { %5835 = vmatpush3.bf16.msra.mxu1 %v5966_v17  ;;  %v9807_v17 = vld [vmem:[#allocation13_spill] sm:$0xff] }
 0x29a   : > { %v5774_v20 = vpop.f32.mrb[0].mxu1 }
 0x29b   : > { %v1988_v13 = vpop.f32.mrb[1].mxu1  ;;  %v7577_v9 = vmul.f32 %v5774_v20, %v9733_v24 }
 0x29c   : > { %v5775_v26 = vpop.f32.mrb[2].mxu1  ;;  %v7572_v50 = vmul.f32 %v1988_v13, %v6184_v47 }
 0x29d   : > { %v1991_v4 = vpop.f32.mrb[3].mxu1  ;;  %v2114_v25 = vmul.f32 %v7577_v9, %v7577_v9  ;;  %v7586_v15 = vmul.f32 %v5775_v26, %v9734_v2 }
 0x29e   : > { %v7569_v12 = vmul.f32 %v1991_v4, %v9732_v32  ;;  %v2112_v51 = vmul.f32 %v7572_v50, %v7572_v50 }
 0x29f   : > { %v2115_v31 = vmul.f32 %v7586_v15, %v7586_v15 }
 0x2a0   : > { %v2113_v23 = vmul.f32 %v7569_v12, %v7569_v12  ;;  %v2087_v0 = vadd.f32 %v7569_v12, %v7572_v50 }
 0x2a2   : > { %v2132_v3 = vadd.f32 %v2113_v23, %v2112_v51  ;;  %v2088_v56 = vadd.f32 %v2087_v0, %v7577_v9  ;;  %v5967_v23 = vld [vmem:[%s9494_s3 + $0x60] sm:$0xff]  }
 0x2a3   : > { %5836 = vmatprep.subr.bf16.mxu1 %v5967_v23 }
 0x2a4   : > { %v2133_v39 = vadd.f32 %v2132_v3, %v2114_v25  ;;  %v2089_v61 = vadd.f32 %v2088_v56, %v7586_v15  ;;  %5837 = vmatpush3.bf16.msra.mxu1 %v5967_v23  ;;  %v9808_v23 = vld [vmem:[#allocation15_spill] sm:$0xff] }
 0x2a6   : > { %v2134_v52 = vadd.f32 %v2133_v39, %v2115_v31 }
 0x2b2   : > { %v5778_v48 = vpop.f32.mrb[4].mxu1 }
 0x2b3   : > { %v2004_v27 = vpop.f32.mrb[5].mxu1  ;;  %v7616_v26 = vmul.f32 %v5778_v48, %v9742_v29  ;;  %v5968_v48 = vld [vmem:[%s9494_s3 + $0x68] sm:$0xff]  }
 0x2b4   : > { %v5779_v34 = vpop.f32.mrb[6].mxu1  ;;  %v7596_v5 = vmul.f32 %v2004_v27, %v9735_v38  ;;  %5838 = vmatprep.subr.bf16.mxu1 %v5968_v48  ;;  %v2680_v38 = vld [vmem:[#allocation2] sm:$0xf8] }
 0x2b5   : > { %v2007_v30 = vpop.f32.mrb[7].mxu1  ;;  %v2118_v0 = vmul.f32 %v7616_v26, %v7616_v26  ;;  %v7625_v27 = vmul.f32 %v5779_v34, %v6198_v55  ;;  %v5969_v34 = vld [vmem:[%s9494_s3 + $0x70] sm:$0xff]   ;;  %5839 = vmatpush3.bf16.msra.mxu1 %v5968_v48 }
 0x2b6   : > { %v2116_v8 = vmul.f32 %v7596_v5, %v7596_v5  ;;  %v7607_v7 = vmul.f32 %v2007_v30, %v9736_v16  ;;  %v2090_v11 = vadd.f32 %v2089_v61, %v7596_v5  ;;  %5840 = vmatprep.subr.bf16.mxu1 %v5969_v34 }
 0x2b7   : > { %v2119_v25 = vmul.f32 %v7625_v27, %v7625_v27 }
 0x2b8   : > { %v2135_v20 = vadd.f32 %v2134_v52, %v2116_v8  ;;  %v2117_v13 = vmul.f32 %v7607_v7, %v7607_v7  ;;  %v2091_v4 = vadd.f32 %v2090_v11, %v7607_v7 }
 0x2b9   : > { %5841 = vmatpush3.bf16.msra.mxu1 %v5969_v34 }
 0x2ba   : > { %v2136_v51 = vadd.f32 %v2135_v20, %v2117_v13  ;;  %v2092_v3 = vadd.f32 %v2091_v4, %v7616_v26  ;;  %v5970_v13 = vld [vmem:[%s9494_s3 + $0x78] sm:$0xff]  }
 0x2bb   : > { %5842 = vmatprep.subr.bf16.mxu1 %v5970_v13 }
 0x2bc   : > { %v2137_v30 = vadd.f32 %v2136_v51, %v2118_v0  ;;  %v2093_v6 = vadd.f32 %v2092_v3, %v7625_v27 }
 0x2bd   : > { %5843 = vmatpush3.bf16.msra.mxu1 %v5970_v13  ;;  %v9812_v13 = vld [vmem:[#allocation20_spill] sm:$0xff] }
 0x2be   : > { %v2138_v31 = vadd.f32 %v2137_v30, %v2119_v25 }
 0x2cb   : > { %v5782_v56 = vpop.f32.mrb[8].mxu1 }
 0x2cc   : > { %v2020_v62 = vpop.f32.mrb[9].mxu1  ;;  %v7641_v8 = vmul.f32 %v5782_v56, %v6234_v14 }
 0x2cd   : > { %v7638_v39 = vmul.f32 %v2020_v62, %v9743_v10  ;;  %v5783_v61 = vpop.f32.mrb[10].mxu1 }
 0x2ce   : > { %v2023_v43 = vpop.f32.mrb[11].mxu1  ;;  %v7653_v51 = vmul.f32 %v5783_v61, %v9808_v23  ;;  %v2122_v30 = vmul.f32 %v7641_v8, %v7641_v8 }
 0x2cf   : > { %v2094_v52 = vadd.f32 %v2093_v6, %v7638_v39  ;;  %v2120_v11 = vmul.f32 %v7638_v39, %v7638_v39  ;;  %v7647_v20 = vmul.f32 %v2023_v43, %v9807_v17  ;;  %v9810_v17 = vld [vmem:[#allocation18_spill] sm:$0xff] }
 0x2d0   : > { %v2123_v56 = vmul.f32 %v7653_v51, %v7653_v51 }
 0x2d1   : > { %v2139_v4 = vadd.f32 %v2138_v31, %v2120_v11  ;;  %v2095_v0 = vadd.f32 %v2094_v52, %v7647_v20  ;;  %v2121_v3 = vmul.f32 %v7647_v20, %v7647_v20  ;;  %v9809_v52 = vld [vmem:[#allocation16_spill] sm:$0xff] }
 0x2d3   : > { %v2096_v25 = vadd.f32 %v2095_v0, %v7641_v8  ;;  %v2140_v48 = vadd.f32 %v2139_v4, %v2121_v3  ;;  %v9811_v3 = vld [vmem:[#allocation17_spill] sm:$0xff] }
 0x2d5   : > { %v2141_v6 = vadd.f32 %v2140_v48, %v2122_v30  ;;  %v2097_v62 = vadd.f32 %v2096_v25, %v7653_v51 }
 0x2d7   : > { %v2142_v31 = vadd.f32 %v2141_v6, %v2123_v56 }
 0x2e7   : > { %v5786_v61 = vpop.f32.mrb[12].mxu1 }
 0x2e8   : > { %v2036_v43 = vpop.f32.mrb[13].mxu1  ;;  %v7668_v0 = vmul.f32 %v5786_v61, %v9810_v17 }
 0x2e9   : > { %v7665_v11 = vmul.f32 %v2036_v43, %v9809_v52  ;;  %v5787_v18 = vpop.f32.mrb[14].mxu1 }
 0x2ea   : > { %v2039_v1 = vpop.f32.mrb[15].mxu1  ;;  %v7677_v48 = vmul.f32 %v5787_v18, %v9812_v13  ;;  %v2126_v61 = vmul.f32 %v7668_v0, %v7668_v0 }
 0x2eb   : > { %v2098_v34 = vadd.f32 %v2097_v62, %v7665_v11  ;;  %v2124_v4 = vmul.f32 %v7665_v11, %v7665_v11  ;;  %v7674_v30 = vmul.f32 %v2039_v1, %v9811_v3 }
 0x2ec   : > { %v2127_v1 = vmul.f32 %v7677_v48, %v7677_v48 }
 0x2ed   : > { %v2143_v25 = vadd.f32 %v2142_v31, %v2124_v4  ;;  %v2099_v56 = vadd.f32 %v2098_v34, %v7674_v30  ;;  %v2125_v6 = vmul.f32 %v7674_v30, %v7674_v30  ;;  %v9813_v4 = vld [vmem:[#allocation21_spill] sm:$0xff] }
 0x2ef   : > { %v2100_v62 = vadd.f32 %v2099_v56, %v7668_v0  ;;  %v2144_v43 = vadd.f32 %v2143_v25, %v2125_v6  ;;  %v5790_v10 = vpop.f32.mrb[16].mxu1  ;;  %v9815_v6 = vld [vmem:[#allocation23_spill] sm:$0xff] }
 0x2f0   : > { %v2052_v55 = vpop.f32.mrb[17].mxu1  ;;  %v7692_v40 = vmul.f32 %v5790_v10, %v9814_v58 }
 0x2f1   : > { %v2145_v31 = vadd.f32 %v2144_v43, %v2126_v61  ;;  %v7688_v18 = vmul.f32 %v2052_v55, %v9813_v4  ;;  %v2101_v34 = vadd.f32 %v2100_v62, %v7677_v48  ;;  %v5791_v29 = vpop.f32.mrb[18].mxu1  ;;  %v9816_v43 = vld [vmem:[#allocation25_spill] sm:$0xff] }
 0x2f2   : > { %v2055_v45 = vpop.f32.mrb[19].mxu1  ;;  %v7701_v55 = vmul.f32 %v5791_v29, %v9816_v43  ;;  %v2691_v29 = vsel %vm6352_vm5, %v2680_v38, 0 }
 0x2f3   : > { %v2102_v21 = vadd.f32 %v2101_v34, %v7688_v18  ;;  %v2128_v25 = vmul.f32 %v7688_v18, %v7688_v18  ;;  %v2146_v56 = vadd.f32 %v2145_v31, %v2127_v1  ;;  %v7698_v16 = vmul.f32 %v2055_v45, %v9815_v6 }
 0x2f4   : > { %v2130_v34 = vmul.f32 %v7692_v40, %v7692_v40  ;;  %v2131_v45 = vmul.f32 %v7701_v55, %v7701_v55 }
 0x2f5   : > { %v2147_v61 = vadd.f32 %v2146_v56, %v2128_v25  ;;  %v2103_v62 = vadd.f32 %v2102_v21, %v7698_v16  ;;  %v2129_v10 = vmul.f32 %v7698_v16, %v7698_v16  ;;  %v2704_v56 = vshrl.u32 %v2691_v29, 16 }
 0x2f7   : > { %v2104_v2 = vadd.f32 %v2103_v62, %v7692_v40  ;;  %v2148_v24 = vadd.f32 %v2147_v61, %v2129_v10  ;;  %v7714_v63 = vrot.slane %v2704_v56, 7  ;;  %v2707_v62 = vshll.u32 %v2691_v29, 16 }
 0x2f9   : > { %v2105_v1 = vadd.f32 %v2104_v2, %v7701_v55  ;;  %v2149_v31 = vadd.f32 %v2148_v24, %v2130_v34  ;;  %v2709_v2 = vor.u32 %v2707_v62, %v7714_v63 }
 0x2fb   : > { %v2106_v21 = vrot.slane %v2105_v1, 4  ;;  %v2150_v25 = vadd.f32 %v2149_v31, %v2131_v45 }
 0x2fd   : > { %v2107_v32 = vadd.f32 %v2106_v21, %v2105_v1  ;;  %v2151_v47 = vrot.slane %v2150_v25, 4 }
 0x2ff   : > { %v2108_v57 = vrot.slane %v2107_v32, 2  ;;  %v2152_v41 = vadd.f32 %v2151_v47, %v2150_v25  ;;  %v2801_v47 = vsel %vm6445_vm4, %v7717_v37, %v2709_v2 }
 0x300   : > { %v2814_v56 = vshrl.u32 %v2801_v47, 16 }
 0x301   : > { %v2109_v61 = vadd.f32 %v2108_v57, %v2107_v32  ;;  %v2153_v10 = vrot.slane %v2152_v41, 2 }
 0x303   : > { %v2110_v42 = vrot.slane %v2109_v61, 1  ;;  %v2154_v28 = vadd.f32 %v2153_v10, %v2152_v41 }
 0x305   : > { %v2111_v24 = vadd.f32 %v2110_v42, %v2109_v61  ;;  %v2155_v34 = vrot.slane %v2154_v28, 1  ;;  %v2817_v61 = vshll.u32 %v2801_v47, 16 }
 0x307   : > { %v2156_v38 = vadd.f32 %v2155_v34, %v2154_v28  ;;  %v7719_v45 = vmul.f32 0.015625, %v2111_v24 }
 0x309   : > { %v2158_v1 = vmul.f32 0.015625, %v2156_v38  ;;  %v2159_v32 = vmul.f32 %v7719_v45, %v7719_v45  ;;  %v2172_v41 = vsub.f32 %v7641_v8, %v7719_v45  ;;  %v2173_v42 = vsub.f32 %v7653_v51, %v7719_v45 }
 0x30a   : > { %v2174_v57 = vsub.f32 %v7665_v11, %v7719_v45  ;;  %v2175_v28 = vsub.f32 %v7674_v30, %v7719_v45  ;;  %v2176_v31 = vsub.f32 %v7668_v0, %v7719_v45  ;;  %v2177_v29 = vsub.f32 %v7677_v48, %v7719_v45 }
 0x30b   : > { %v2160_v21 = vsub.f32 %v2158_v1, %v2159_v32  ;;  %v2178_v25 = vsub.f32 %v7688_v18, %v7719_v45  ;;  %v2179_v8 = vsub.f32 %v7698_v16, %v7719_v45  ;;  %v2180_v51 = vsub.f32 %v7692_v40, %v7719_v45 }
 0x30c   : > { %v2181_v11 = vsub.f32 %v7701_v55, %v7719_v45  ;;  %v7750_v18 = vrot.slane %v2814_v56, 7  ;;  %v2162_v55 = vsub.f32 %v7572_v50, %v7719_v45  ;;  %v2163_v10 = vsub.f32 %v7569_v12, %v7719_v45  ;;  %v9817_v50 = vld [vmem:[#allocation26_spill] sm:$0xff] }
 0x30d   : > { %v2161_v30 = vmax.f32 %v2160_v21, 0.0  ;;  %v2164_v2 = vsub.f32 %v7577_v9, %v7719_v45  ;;  %v2165_v24 = vsub.f32 %v7586_v15, %v7719_v45  ;;  %v2166_v38 = vsub.f32 %v7596_v5, %v7719_v45 }
 0x30e   : > { %v7753_v16 = vor.u32 %v2817_v61, %v7750_v18  ;;  %v2167_v47 = vsub.f32 %v7607_v7, %v7719_v45  ;;  %v9823_v7 = vld [vmem:[#allocation46_spill] sm:$0xff] }
 0x30f   : > { %v2182_v62 = vadd.f32 1e-05, %v2161_v30 }
 0x311   : > { %5983 = vrsqrt.f32 %v2182_v62 }
 0x31b   : > { %v7767_v34 = vpop.eup %5983 }
 0x31c   : > { %v2194_v32 = vmul.f32 %v7767_v34, %v2172_v41  ;;  %v2195_v21 = vmul.f32 %v7767_v34, %v2173_v42  ;;  %v2196_v30 = vmul.f32 %v7767_v34, %v2174_v57  ;;  %v2197_v56 = vmul.f32 %v7767_v34, %v2175_v28 }
 0x31d   : > { %v2198_v62 = vmul.f32 %v7767_v34, %v2176_v31  ;;  %v2199_v61 = vmul.f32 %v7767_v34, %v2177_v29  ;;  %v2200_v48 = vmul.f32 %v7767_v34, %v2178_v25  ;;  %v2201_v40 = vmul.f32 %v7767_v34, %v2179_v8 }
 0x31e   : > { %v2202_v0 = vmul.f32 %v7767_v34, %v2180_v51  ;;  %v2203_v1 = vmul.f32 %v7767_v34, %v2181_v11  ;;  %v2529_v41 = vadd.f32 %v7364_v36, %v2194_v32  ;;  %v2530_v42 = vadd.f32 %v7374_v46, %v2195_v21 }
 0x31f   : > { %v2531_v57 = vadd.f32 %v7377_v19, %v2196_v30  ;;  %v2532_v28 = vadd.f32 %v7391_v35, %v2197_v56  ;;  %v2533_v31 = vadd.f32 %v7396_v53, %v2198_v62  ;;  %v2534_v29 = vadd.f32 %v7399_v44, %v2199_v61 }
 0x320   : > { %v2535_v25 = vadd.f32 %v7410_v22, %v2200_v48  ;;  %v2536_v8 = vadd.f32 %v9817_v50, %v2201_v40  ;;  %v2537_v51 = vadd.f32 %v7413_v49, %v2202_v0  ;;  %v2538_v11 = vadd.f32 %v7438_v54, %v2203_v1 }
 0x321   : > { %vm2549_vm14 = vcmp.ge.f32.partialorder %v2529_v41, 0.0  ;;  %vm2550_vm15 = vcmp.ge.f32.partialorder %v2530_v42, 0.0  ;;  %vm2551_vm0 = vcmp.ge.f32.partialorder %v2531_v57, 0.0  ;;  %vm2552_vm12 = vcmp.ge.f32.partialorder %v2532_v28, 0.0 }
 0x322   : > { %vm2553_vm1 = vcmp.ge.f32.partialorder %v2533_v31, 0.0  ;;  %vm2554_vm13 = vcmp.ge.f32.partialorder %v2534_v29, 0.0  ;;  %vm2555_vm3 = vcmp.ge.f32.partialorder %v2535_v25, 0.0  ;;  %vm2556_vm11 = vcmp.ge.f32.partialorder %v2536_v8, 0.0 }
 0x323   : > { %vm2557_vm10 = vcmp.ge.f32.partialorder %v2537_v51, 0.0  ;;  %vm2558_vm9 = vcmp.ge.f32.partialorder %v2538_v11, 0.0  ;;  %v2569_v36 = vmul.f32 0.01, %v2529_v41  ;;  %v2570_v46 = vmul.f32 0.01, %v2530_v42 }
 0x324   : > { %v2571_v19 = vmul.f32 0.01, %v2531_v57  ;;  %v2572_v35 = vmul.f32 0.01, %v2532_v28  ;;  %v2573_v53 = vmul.f32 0.01, %v2533_v31  ;;  %v2184_v44 = vmul.f32 %v7767_v34, %v2162_v55 }
 0x325   : > { %v2574_v22 = vmul.f32 0.01, %v2534_v29  ;;  %v2575_v49 = vmul.f32 0.01, %v2535_v25  ;;  %v2576_v54 = vmul.f32 0.01, %v2536_v8  ;;  %v2589_v0 = vsel %vm2549_vm14, %v2529_v41, %v2569_v36 }
 0x326   : > { %v2577_v48 = vmul.f32 0.01, %v2537_v51  ;;  %v2578_v40 = vmul.f32 0.01, %v2538_v11  ;;  %v2590_v50 = vsel %vm2550_vm15, %v2530_v42, %v2570_v46  ;;  %v2591_v1 = vsel %vm2551_vm0, %v2531_v57, %v2571_v19 }
 0x327   : > { %v2592_v32 = vsel %vm2552_vm12, %v2532_v28, %v2572_v35  ;;  %v2593_v21 = vsel %vm2553_vm1, %v2533_v31, %v2573_v53  ;;  %v2594_v30 = vsel %vm2554_vm13, %v2534_v29, %v2574_v22  ;;  %v2595_v56 = vsel %vm2555_vm3, %v2535_v25, %v2575_v49 }
 0x328   : > { %v2596_v55 = vsel %vm2556_vm11, %v2536_v8, %v2576_v54  ;;  %v2597_v62 = vsel %vm2557_vm10, %v2537_v51, %v2577_v48  ;;  %v2598_v61 = vsel %vm2558_vm9, %v2538_v11, %v2578_v40  ;;  %v2609_v41 = vmul.f32 %v2589_v0, %v6234_v14 }
 0x329   : > { %v2610_v42 = vmul.f32 %v2590_v50, %v9808_v23  ;;  %v2611_v57 = vmul.f32 %v2591_v1, %v9809_v52  ;;  %v2612_v28 = vmul.f32 %v2592_v32, %v9811_v3  ;;  %v2613_v31 = vmul.f32 %v2593_v21, %v9810_v17  ;;  %v9819_v50 = vld [vmem:[#allocation37_spill] sm:$0xff]  ;;  %v9820_v32 = vld [vmem:[#allocation38_spill] sm:$0xff] }
 0x32a   : > { %v2614_v29 = vmul.f32 %v2594_v30, %v9812_v13  ;;  %v2615_v25 = vmul.f32 %v2595_v56, %v9813_v4  ;;  %v2616_v8 = vmul.f32 %v2596_v55, %v9815_v6  ;;  %v2617_v51 = vmul.f32 %v2597_v62, %v9814_v58  ;;  %v9824_v30 = vld [vmem:[#allocation48_spill] sm:$0xff] }
 0x32b   : > { %v2618_v11 = vmul.f32 %v2598_v61, %v9816_v43  ;;  %v2624_v36 = vpack.c.bf16 %v2610_v42, %v2609_v41  ;;  %v2625_v46 = vpack.c.bf16 %v2612_v28, %v2611_v57  ;;  %v2185_v19 = vmul.f32 %v7767_v34, %v2163_v10  ;;  %v9826_v56 = vld [vmem:[#allocation44_spill] sm:$0xff] }
 0x32c   : > { %v2626_v35 = vpack.c.bf16 %v2614_v29, %v2613_v31  ;;  %v2627_v53 = vpack.c.bf16 %v2616_v8, %v2615_v25  ;;  %v2186_v22 = vmul.f32 %v7767_v34, %v2164_v2  ;;  %v2187_v49 = vmul.f32 %v7767_v34, %v2165_v24 }
 0x32d   : > { %v2628_v54 = vpack.c.bf16 %v2618_v11, %v2617_v51  ;;  %v7830_v0 = vrot.slane %v2624_v36, 4  ;;  %v2650_v48 = vrot.slane %v2625_v46, 4  ;;  %v2188_v12 = vmul.f32 %v7767_v34, %v2166_v38  ;;  %v9828_v11 = vld [vmem:[#allocation4_spill] sm:$0xff] }
 0x32e   : > { %v2652_v10 = vrot.slane %v2626_v35, 4  ;;  %v2654_v40 = vrot.slane %v2627_v53, 4  ;;  %v2189_v9 = vmul.f32 %v7767_v34, %v2167_v47  ;;  %v2519_v15 = vadd.f32 %v7475_v33, %v2184_v44 }
 0x32f   : > { %vm9818_vm3 = vcmask 1043456   ;;  %v2656_v24 = vrot.slane %v2628_v54, 4  ;;  %v2520_v1 = vadd.f32 %v9819_v50, %v2185_v19  ;;  %v2521_v5 = vadd.f32 %v9820_v32, %v2186_v22  ;;  %v9831_v54 = vld [vmem:[#allocation5_spill] sm:$0xff] }
 0x330   : > { %v7843_v2 = vsel %vm9818_vm3, %v7830_v0, %v2650_v48  ;;  %vm9821_vm13 = vmmov %vm9818_vm3  ;;  %v2522_v47 = vadd.f32 %v9823_v7, %v2187_v49  ;;  %v2523_v33 = vadd.f32 %v9824_v30, %v2188_v12  ;;  %v2524_v55 = vadd.f32 %v9826_v56, %v2189_v9  ;;  %v9830_v49 = vld [vmem:[#allocation6_spill] sm:$0xff]  ;;  %v9832_v12 = vld [vmem:[#allocation7_spill] sm:$0xff] }
 0x331   : > { %v7848_v38 = vsel %vm9821_vm13, %v2650_v48, %v2652_v10  ;;  %vm9822_vm1 = vmmov %vm9818_vm3  ;;  %2675 = vst [vmem:[#allocation2 + $0x38] sm:$0xff] %v7843_v2  ;;  %vm2539_vm10 = vcmp.ge.f32.partialorder %v2519_v15, 0.0  ;;  %vm2540_vm11 = vcmp.ge.f32.partialorder %v2520_v1, 0.0  ;;  %vm2541_vm12 = vcmp.ge.f32.partialorder %v2521_v5, 0.0 }
 0x332   : > { %v2655_v21 = vsel %vm9822_vm1, %v2652_v10, %v2654_v40  ;;  %vm9825_vm9 = vmmov %vm9822_vm1  ;;  %2676 = vst [vmem:[#allocation2 + $0x40] sm:$0xff] %v7848_v38  ;;  %vm2542_vm14 = vcmp.ge.f32.partialorder %v2522_v47, 0.0  ;;  %vm2543_vm15 = vcmp.ge.f32.partialorder %v2523_v33, 0.0  ;;  %v2559_v62 = vmul.f32 0.01, %v2519_v15 }
 0x333   : > { %v2657_v44 = vsel %vm9825_vm9, %v2654_v40, %v2656_v24  ;;  %2677 = vst [vmem:[#allocation2 + $0x48] sm:$0xff] %v2655_v21  ;;  %2679 = vst [vmem:[#allocation2 + $0x58] sm:$0xf] %v2656_v24  ;;  %vm2544_vm0 = vcmp.ge.f32.partialorder %v2524_v55, 0.0  ;;  %v2560_v61 = vmul.f32 0.01, %v2520_v1  ;;  %v9827_v42 = vsub.f32 %v7616_v26, %v7719_v45 }
 0x334   : > { %2678 = vst [vmem:[#allocation2 + $0x50] sm:$0xff] %v2657_v44  ;;  %v2561_v41 = vmul.f32 0.01, %v2521_v5  ;;  %v2562_v28 = vmul.f32 0.01, %v2522_v47  ;;  %v2579_v25 = vsel %vm2539_vm10, %v2519_v15, %v2559_v62  ;;  %v9829_v46 = vsub.f32 %v7625_v27, %v7719_v45  ;;  %v9833_v40 = vld [vmem:[#allocation8_spill] sm:$0xff]  ;;  %vm9843_vm9 = vmmov %vm9822_vm1 }
 0x335   : > { %v2190_v57 = vmul.f32 %v7767_v34, %v9827_v42  ;;  %v2563_v31 = vmul.f32 0.01, %v2523_v33  ;;  %v2564_v29 = vmul.f32 0.01, %v2524_v55  ;;  %v2580_v8 = vsel %vm2540_vm11, %v2520_v1, %v2560_v61  ;;  %v9834_v15 = vld [vmem:[#allocation9_spill] sm:$0xff] }
 0x336   : > { %v2581_v51 = vsel %vm2541_vm12, %v2521_v5, %v2561_v41  ;;  %v2599_v36 = vmul.f32 %v2579_v25, %v9828_v11  ;;  %v2191_v19 = vmul.f32 %v7767_v34, %v9829_v46  ;;  %v2582_v35 = vsel %vm2542_vm14, %v2522_v47, %v2562_v28  ;;  %v9835_v1 = vld [vmem:[#allocation45_spill] sm:$0xff]  ;;  %v9836_v5 = vld [vmem:[#allocation47_spill] sm:$0xff]  ;;  %vm9848_vm12 = vmmov %vm9822_vm1 }
 0x337   : > { %v2583_v53 = vsel %vm2543_vm15, %v2523_v33, %v2563_v31  ;;  %v2584_v22 = vsel %vm2544_vm0, %v2524_v55, %v2564_v29  ;;  %v2600_v26 = vmul.f32 %v2580_v8, %v9830_v49  ;;  %v2601_v48 = vmul.f32 %v2581_v51, %v9831_v54  ;;  %v9841_v29 = vld [vmem:[#allocation50_spill] sm:$0xff]  ;;  %vm9851_vm0 = vmmov %vm9822_vm1 }
 0x338   : > { %v2602_v10 = vmul.f32 %v2582_v35, %v9832_v12  ;;  %v2603_v9 = vmul.f32 %v2583_v53, %v9833_v40  ;;  %v2604_v24 = vmul.f32 %v2584_v22, %v9834_v15  ;;  %v2525_v32 = vadd.f32 %v9835_v1, %v2190_v57  ;;  %v9840_v57 = vld [vmem:[#allocation49_spill] sm:$0xff]  ;;  %v9844_v51 = vld [vmem:[#allocation10_spill] sm:$0xff]  ;;  %v9845_v35 = vld [vmem:[#allocation11_spill] sm:$0xff] }
 0x339   : > { %v2619_v50 = vpack.c.bf16 %v2600_v26, %v2599_v36  ;;  %v2526_v27 = vadd.f32 %v9836_v5, %v2191_v19  ;;  %v9837_v21 = vsub.f32 %v7638_v39, %v7719_v45  ;;  %v9838_v33 = vsel %vm6599_vm2, %v7717_v37, %v7753_v16 }
 0x33a   : > { %v2620_v47 = vpack.c.bf16 %v2602_v10, %v2601_v48  ;;  %v2621_v30 = vpack.c.bf16 %v2604_v24, %v2603_v9  ;;  %v7882_v44 = vrot.slane %v9838_v33, 1  ;;  %v9839_v56 = vsub.f32 %v7647_v20, %v7719_v45 }
 0x33b   : > { %v2192_v7 = vmul.f32 %v7767_v34, %v9837_v21  ;;  %v2639_v62 = vrot.slane %v2619_v50, 4  ;;  %vm2545_vm3 = vcmp.ge.f32.partialorder %v2525_v32, 0.0  ;;  %vm2546_vm13 = vcmp.ge.f32.partialorder %v2526_v27, 0.0 }
 0x33c   : > { %v2193_v55 = vmul.f32 %v7767_v34, %v9839_v56  ;;  %v2565_v39 = vmul.f32 0.01, %v2525_v32  ;;  %v2640_v61 = vrot.slane %v2620_v47, 4  ;;  %v2642_v41 = vrot.slane %v2621_v30, 4 }
 0x33d   : > { %v2566_v42 = vmul.f32 0.01, %v2526_v27  ;;  %v2527_v28 = vadd.f32 %v9840_v57, %v2192_v7  ;;  %2669 = vst [vmem:[#allocation2 + $0x8] sm:$0xf0] %v2639_v62  ;;  %v2698_v25 = vsel %vm6352_vm5, %v7843_v2, 0  ;;  %v2699_v20 = vsel %vm6352_vm5, %v7848_v38, 0 }
 0x33e   : > { %v2585_v31 = vsel %vm2545_vm3, %v2525_v32, %v2565_v39  ;;  %v2528_v37 = vadd.f32 %v9841_v29, %v2193_v55  ;;  %v7897_v45 = vsel %vm9822_vm1, %v2639_v62, %v2640_v61  ;;  %v7900_v34 = vsel %vm9843_vm9, %v2640_v61, %v2642_v41  ;;  %v9846_v62 = vld [vmem:[#allocation12_spill] sm:$0xff]  ;;  %v9847_v61 = vld [vmem:[#allocation13_spill] sm:$0xff]  ;;  %vm9852_vm3 = vmmov %vm9851_vm0 }
 0x33f   : > { %v2586_v8 = vsel %vm2546_vm13, %v2526_v27, %v2566_v42  ;;  %v2605_v36 = vmul.f32 %v2585_v31, %v9844_v51  ;;  %2670 = vst [vmem:[#allocation2 + $0x10] sm:$0xff] %v7897_v45  ;;  %2671 = vst [vmem:[#allocation2 + $0x18] sm:$0xff] %v7900_v34  ;;  %v2693_v46 = vsel %vm6352_vm5, %v7897_v45, 0  ;;  %v2694_v19 = vsel %vm6352_vm5, %v7900_v34, 0 }
 0x340   : > { %v2606_v53 = vmul.f32 %v2586_v8, %v9845_v35  ;;  %vm2547_vm10 = vcmp.ge.f32.partialorder %v2527_v28, 0.0  ;;  %v2719_v22 = vshrl.u32 %v2693_v46, 16  ;;  %v2722_v26 = vshll.u32 %v2693_v46, 16  ;;  %v7926_v46 = vld [vmem:[#allocation2 + $0x48] sm:$0xff] }
 0x341   : > { %v2727_v48 = vshrl.u32 %v2694_v19, 16  ;;  %v2730_v10 = vshll.u32 %v2694_v19, 16  ;;  %vm2548_vm11 = vcmp.ge.f32.partialorder %v2528_v37, 0.0  ;;  %v2567_v24 = vmul.f32 0.01, %v2527_v28 }
 0x342   : > { %v2622_v9 = vpack.c.bf16 %v2606_v53, %v2605_v36  ;;  %v2568_v50 = vmul.f32 0.01, %v2528_v37  ;;  %v2721_v1 = vrot.slane %v2719_v22, 7  ;;  %v2759_v5 = vshrl.u32 %v2698_v25, 16 }
 0x343   : > { %v2729_v32 = vrot.slane %v2727_v48, 7  ;;  %v2762_v27 = vshll.u32 %v2698_v25, 16  ;;  %v2587_v7 = vsel %vm2547_vm10, %v2527_v28, %v2567_v24  ;;  %v2767_v30 = vshrl.u32 %v2699_v20, 16 }
 0x344   : > { %v2644_v21 = vrot.slane %v2622_v9, 4  ;;  %v2588_v47 = vsel %vm2548_vm11, %v2528_v37, %v2568_v50  ;;  %v7912_v33 = vld [vmem:[#allocation2 + $0x8] sm:$0xff]  ;;  %v2724_v56 = vor.u32 %v2722_v26, %v2721_v1  ;;  %v2607_v39 = vmul.f32 %v2587_v7, %v9846_v62 }
 0x345   : > { %v2732_v55 = vor.u32 %v2730_v10, %v2729_v32  ;;  %v2608_v42 = vmul.f32 %v2588_v47, %v9847_v61  ;;  %v2692_v57 = vsel %vm6352_vm5, %v7912_v33, 0  ;;  %v2761_v29 = vrot.slane %v2759_v5, 7 }
 0x346   : > { %v7920_v31 = vsel %vm9848_vm12, %v2642_v41, %v2644_v21  ;;  %v7922_v25 = vrot.slane %v2767_v30, 7  ;;  %v2711_v28 = vshrl.u32 %v2692_v57, 16  ;;  %v2714_v37 = vshll.u32 %v2692_v57, 16 }
 0x347   : > { %vm9849_vm14 = vsmask.f32 256  ;;  %2672 = vst [vmem:[#allocation2 + $0x20] sm:$0xff] %v7920_v31  ;;  %v2623_v36 = vpack.c.bf16 %v2608_v42, %v2607_v39  ;;  %v2695_v41 = vsel %vm6352_vm5, %v7920_v31, 0  ;;  %v2764_v53 = vor.u32 %v2762_v27, %v2761_v29 }
 0x348   : > { %v2733_v8 = vsel %vm9849_vm14, %v2721_v1, %v2732_v55  ;;  %v2770_v22 = vshll.u32 %v2699_v20, 16  ;;  %v2713_v26 = vrot.slane %v2711_v28, 7  ;;  %v2735_v9 = vshrl.u32 %v2695_v41, 16  ;;  %vm9850_vm15 = vmmov %vm9849_vm14 }
 0x349   : > { %v2804_v19 = vsel %vm6445_vm4, %v7900_v34, %v2733_v8  ;;  %v2738_v24 = vshll.u32 %v2695_v41, 16  ;;  %v2646_v50 = vrot.slane %v2623_v36, 4  ;;  %v7938_v5 = vsel %vm6352_vm5, %v7926_v46, 0  ;;  %vm9853_vm13 = vmmov %vm9849_vm14 }
 0x34a   : > { %v2837_v48 = vshrl.u32 %v2804_v19, 16  ;;  %v2840_v10 = vshll.u32 %v2804_v19, 16  ;;  %v2772_v1 = vor.u32 %v2770_v22, %v7922_v25  ;;  %v2716_v7 = vor.u32 %v2714_v37, %v2713_v26  ;;  %vm9854_vm1 = vmmov %vm9853_vm13 }
 0x34b   : > { %v2725_v47 = vsel %vm9850_vm15, %v2713_v26, %v2724_v56  ;;  %v2737_v55 = vrot.slane %v2735_v9, 7  ;;  %v7945_v27 = vsel %vm9851_vm0, %v2644_v21, %v2646_v50  ;;  %v7949_v39 = vsel %vm9852_vm3, %v2646_v50, %v7830_v0  ;;  %vm9855_vm9 = vmmov %vm9854_vm1 }
 0x34c   : > { %v2839_v30 = vrot.slane %v2837_v48, 7  ;;  %v2803_v20 = vsel %vm6445_vm4, %v7897_v45, %v2725_v47  ;;  %v2773_v42 = vsel %vm9853_vm13, %v2761_v29, %v2772_v1  ;;  %v2717_v57 = vsel %vm9854_vm1, %v7714_v63, %v2716_v7  ;;  %2673 = vst [vmem:[#allocation2 + $0x28] sm:$0xff] %v7945_v27  ;;  %2674 = vst [vmem:[#allocation2 + $0x30] sm:$0xff] %v7949_v39 }
 0x34d   : > { %v2829_v28 = vshrl.u32 %v2803_v20, 16  ;;  %v2832_v56 = vshll.u32 %v2803_v20, 16  ;;  %v2802_v21 = vsel %vm6445_vm4, %v7912_v33, %v2717_v57  ;;  %v2740_v8 = vor.u32 %v2738_v24, %v2737_v55  ;;  %vm9856_vm10 = vmmov %vm9854_vm1 }
 0x34e   : > { %v2842_v37 = vor.u32 %v2840_v10, %v2839_v30  ;;  %v2696_v0 = vsel %vm6352_vm5, %v7945_v27, 0  ;;  %v2697_v63 = vsel %vm6352_vm5, %v7949_v39, 0  ;;  %v2821_v29 = vshrl.u32 %v2802_v21, 16  ;;  %vm9857_vm11 = vmmov %vm9854_vm1 }
 0x34f   : > { %v2824_v36 = vshll.u32 %v2802_v21, 16  ;;  %v2831_v19 = vrot.slane %v2829_v28, 7  ;;  %v2743_v41 = vshrl.u32 %v2696_v0, 16  ;;  %v2741_v22 = vsel %vm9855_vm9, %v2729_v32, %v2740_v8  ;;  %vm9858_vm12 = vmmov %vm9854_vm1 }
 0x350   : > { %v2746_v26 = vshll.u32 %v2696_v0, 16  ;;  %v2751_v48 = vshrl.u32 %v2697_v63, 16  ;;  %v2754_v10 = vshll.u32 %v2697_v63, 16  ;;  %v2823_v9 = vrot.slane %v2821_v29, 7  ;;  %vm9859_vm14 = vmmov %vm9854_vm1 }
 0x351   : > { %v2834_v50 = vor.u32 %v2832_v56, %v2831_v19  ;;  %v2843_v24 = vsel %vm9856_vm10, %v2831_v19, %v2842_v37  ;;  %v2805_v1 = vsel %vm6445_vm4, %v7920_v31, %v2741_v22  ;;  %v2745_v57 = vrot.slane %v2743_v41, 7  ;;  %vm9860_vm15 = vmmov %vm9854_vm1 }
 0x352   : > { %v2914_v7 = vsel %vm6599_vm2, %v7900_v34, %v2843_v24  ;;  %v2845_v47 = vshrl.u32 %v2805_v1, 16  ;;  %v2848_v20 = vshll.u32 %v2805_v1, 16  ;;  %v2826_v28 = vor.u32 %v2824_v36, %v2823_v9  ;;  %vm9862_vm3 = vmmov %vm9854_vm1 }
 0x353   : > { %v2835_v32 = vsel %vm9857_vm11, %v2823_v9, %v2834_v50  ;;  %v2941_v21 = vrot.slane %v2914_v7, 1  ;;  %v2753_v8 = vrot.slane %v2751_v48, 7  ;;  %v2748_v0 = vor.u32 %v2746_v26, %v2745_v57  ;;  %vm9864_vm13 = vmmov %vm9854_vm1  ;;  %v2922_v7 = vld [vmem:[#allocation2 + $0x8] sm:$0xf8] }
 0x354   : > { %v2913_v56 = vsel %vm6599_vm2, %v7897_v45, %v2835_v32  ;;  %v2847_v37 = vrot.slane %v2845_v47, 7  ;;  %v7980_v63 = vsel %vm6445_vm4, %v7848_v38, %v2773_v42  ;;  %v2827_v29 = vsel %vm9858_vm12, %v7750_v18, %v2826_v28  ;;  %vm9868_vm11 = vmmov %vm9862_vm3 }
 0x355   : > { %v2939_v19 = vrot.slane %v2913_v56, 1  ;;  %v2756_v36 = vor.u32 %v2754_v10, %v2753_v8  ;;  %v2765_v41 = vsel %vm9859_vm14, %v2753_v8, %v2764_v53  ;;  %v2912_v22 = vsel %vm6599_vm2, %v7912_v33, %v2827_v29  ;;  %vm9869_vm12 = vmmov %vm9862_vm3 }
 0x356   : > { %v2850_v48 = vor.u32 %v2848_v20, %v2847_v37  ;;  %v2749_v9 = vsel %vm9860_vm15, %v2737_v55, %v2748_v0  ;;  %v7992_v26 = vsel %vm6445_vm4, %v7843_v2, %v2765_v41  ;;  %v2937_v42 = vrot.slane %v2912_v22, 1  ;;  %vm9870_vm14 = vmmov %vm9862_vm3 }
 0x357   : > { %vm9861_vm0 = vcmask 1046528   ;;  %v2806_v18 = vsel %vm6445_vm4, %v7945_v27, %v2749_v9  ;;  %v2757_v53 = vsel %vm9862_vm3, %v2745_v57, %v2756_v36 }
 0x358   : > { %v2942_v50 = vsel %vm9861_vm0, %v2939_v19, %v2941_v21  ;;  %v2851_v55 = vsel %vm9864_vm13, %v2839_v30, %v2850_v48  ;;  %v2853_v24 = vshrl.u32 %v2806_v18, 16  ;;  %v2856_v1 = vshll.u32 %v2806_v18, 16  ;;  %vm9865_vm1 = vmmov %vm9861_vm0 }
 0x359   : > { %v2970_v33 = vsel %vm6935_vm6, %v7900_v34, %v2942_v50  ;;  %v2938_v47 = vsel %vm9865_vm1, %v7882_v44, %v2937_v42  ;;  %vm9866_vm9 = vmmov %vm9861_vm0  ;;  %v2915_v30 = vsel %vm6599_vm2, %v7920_v31, %v2851_v55  ;;  %v2807_v48 = vsel %vm6445_vm4, %v7949_v39, %v2757_v53 }
 0x35a   : > { %v2940_v20 = vsel %vm9866_vm9, %v2937_v42, %v2939_v19  ;;  %v2996_v28 = vshrl.u32 %v2970_v33, 16  ;;  %v2999_v32 = vshll.u32 %v2970_v33, 16  ;;  %v2968_v8 = vsel %vm6935_vm6, %v2922_v7, %v2938_v47  ;;  %vm9867_vm10 = vmmov %vm9861_vm0 }
 0x35b   : > { %v2969_v57 = vsel %vm6935_vm6, %v7897_v45, %v2940_v20  ;;  %v2855_v56 = vrot.slane %v2853_v24, 7  ;;  %v2981_v0 = vshrl.u32 %v2968_v8, 16  ;;  %v2984_v29 = vshll.u32 %v2968_v8, 16  ;;  %vm9872_vm15 = vmmov %vm9861_vm0 }
 0x35c   : > { %v2988_v36 = vshrl.u32 %v2969_v57, 16  ;;  %v2991_v44 = vshll.u32 %v2969_v57, 16  ;;  %v2998_v41 = vrot.slane %v2996_v28, 7  ;;  %v2943_v19 = vrot.slane %v2915_v30, 1  ;;  %v2979_v28 = vld [vmem:[#allocation2 + $0x8] sm:$0xf0]  ;;  %vm9873_vm0 = vmmov %vm9862_vm3 }
 0x35d   : > { %v2858_v22 = vor.u32 %v2856_v1, %v2855_v56  ;;  %v2983_v9 = vrot.slane %v2981_v0, 7  ;;  %v2861_v50 = vshrl.u32 %v2807_v48, 16  ;;  %v2864_v18 = vshll.u32 %v2807_v48, 16  ;;  %vm9874_vm3 = vmmov %vm9873_vm0 }
 0x35e   : > { %v2990_v42 = vrot.slane %v2988_v36, 7  ;;  %v3001_v33 = vor.u32 %v2999_v32, %v2998_v41  ;;  %v2944_v7 = vsel %vm9867_vm10, %v2941_v21, %v2943_v19  ;;  %v2869_v24 = vshrl.u32 %v7992_v26, 16  ;;  %vm9875_vm13 = vmmov %vm9873_vm0 }
 0x35f   : > { %v2859_v55 = vsel %vm9868_vm11, %v2847_v37, %v2858_v22  ;;  %v2986_v47 = vor.u32 %v2984_v29, %v2983_v9  ;;  %v2971_v1 = vsel %vm6935_vm6, %v7920_v31, %v2944_v7  ;;  %v2863_v36 = vrot.slane %v2861_v50, 7  ;;  %vm9877_vm1 = vmmov %vm9873_vm0 }
 0x360   : > { %v2993_v20 = vor.u32 %v2991_v44, %v2990_v42  ;;  %v2916_v53 = vsel %vm6599_vm2, %v7945_v27, %v2859_v55  ;;  %v3002_v8 = vsel %vm9869_vm12, %v2990_v42, %v3001_v33  ;;  %v3004_v32 = vshrl.u32 %v2971_v1, 16  ;;  %vm9878_vm9 = vmmov %vm9873_vm0 }
 0x361   : > { %v3007_v57 = vshll.u32 %v2971_v1, 16  ;;  %v8027_v21 = vrot.slane %v2916_v53, 1  ;;  %v3078_v0 = vsel %vm6991_vm7, %v2979_v28, %v2986_v47  ;;  %v3080_v29 = vsel %vm6991_vm7, %v7900_v34, %v3002_v8  ;;  %vm9879_vm11 = vmmov %vm9867_vm10 }
 0x362   : > { %v2994_v37 = vsel %vm9870_vm14, %v2983_v9, %v2993_v20  ;;  %v3091_v22 = vshrl.u32 %v3078_v0, 16  ;;  %v3094_v48 = vshll.u32 %v3078_v0, 16  ;;  %v3106_v42 = vshrl.u32 %v3080_v29, 16  ;;  %vm9882_vm14 = vmmov %vm9873_vm0 }
 0x363   : > { %v3079_v44 = vsel %vm6991_vm7, %v7897_v45, %v2994_v37  ;;  %v3109_v55 = vshll.u32 %v3080_v29, 16  ;;  %v3006_v1 = vrot.slane %v3004_v32, 7  ;;  %v2946_v47 = vsel %vm9872_vm15, %v2943_v19, %v8027_v21  ;;  %vm9883_vm15 = vmmov %vm9867_vm10 }
 0x364   : > { %v3098_v33 = vshrl.u32 %v3079_v44, 16  ;;  %v3101_v7 = vshll.u32 %v3079_v44, 16  ;;  %v3093_v9 = vrot.slane %v3091_v22, 7  ;;  %v3108_v20 = vrot.slane %v3106_v42, 7 }
 0x365   : > { %v2866_v53 = vor.u32 %v2864_v18, %v2863_v36  ;;  %v3009_v8 = vor.u32 %v3007_v57, %v3006_v1  ;;  %v2972_v50 = vsel %vm6935_vm6, %v7945_v27, %v2946_v47  ;;  %v8043_v37 = vrot.slane %v2869_v24, 7 }
 0x366   : > { %v3100_v43 = vrot.slane %v3098_v33, 7  ;;  %v3096_v0 = vor.u32 %v3094_v48, %v3093_v9  ;;  %v3111_v6 = vor.u32 %v3109_v55, %v3108_v20  ;;  %v3012_v58 = vshrl.u32 %v2972_v50, 16 }
 0x367   : > { %v3015_v44 = vshll.u32 %v2972_v50, 16  ;;  %v3010_v32 = vsel %vm9873_vm0, %v2998_v41, %v3009_v8  ;;  %v2867_v22 = vsel %vm9874_vm3, %v2855_v56, %v2866_v53  ;;  %v2872_v19 = vshll.u32 %v7992_v26, 16  ;;  %vm9884_vm3 = vmmov %vm9867_vm10 }
 0x368   : > { %v3103_v29 = vor.u32 %v3101_v7, %v3100_v43  ;;  %v3112_v18 = vsel %vm9875_vm13, %v3100_v43, %v3111_v6  ;;  %v3188_v42 = vsel %vm7025_vm8, %v2979_v28, %v3096_v0  ;;  %v3081_v24 = vsel %vm6991_vm7, %v7920_v31, %v3010_v32  ;;  %vm9885_vm13 = vmmov %vm9873_vm0 }
 0x369   : > { %v8054_v48 = vrot.slane %v3012_v58, 7  ;;  %v3190_v41 = vsel %vm7025_vm8, %v7900_v34, %v3112_v18  ;;  %v3221_v56 = vrot.slane %v3188_v42, 1  ;;  %v3114_v7 = vshrl.u32 %v3081_v24, 16 }
 0x36a   : > { %v3104_v33 = vsel %vm9877_vm1, %v3093_v9, %v3103_v29  ;;  %v3224_v43 = vrot.slane %v3190_v41, 1  ;;  %v3117_v26 = vshll.u32 %v3081_v24, 16  ;;  %v2917_v58 = vsel %vm6599_vm2, %v7949_v39, %v2867_v22  ;;  %v9880_v22 = vld [vmem:[#allocation39_spill] sm:$0xff]  ;;  %vm9886_vm1 = vmmov %vm9873_vm0 }
 0x36b   : > { %v3189_v6 = vsel %vm7025_vm8, %v7897_v45, %v3104_v33  ;;  %v3017_v28 = vor.u32 %v3015_v44, %v8054_v48  ;;  %v3116_v47 = vrot.slane %v3114_v7, 7  ;;  %v2874_v9 = vor.u32 %v2872_v19, %v8043_v37  ;;  %v3199_v45 = vld [vmem:[#allocation2 + $0x10] sm:$0xf8] }
 0x36c   : > { %v3222_v55 = vrot.slane %v3189_v6, 1  ;;  %v2947_v8 = vrot.slane %v2917_v58, 1  ;;  %v2877_v50 = vshrl.u32 %v7980_v63, 16  ;;  %v2880_v0 = vshll.u32 %v7980_v63, 16 }
 0x36d   : > { %v3018_v53 = vsel %vm9878_vm9, %v3006_v1, %v3017_v28  ;;  %v3119_v32 = vor.u32 %v3117_v26, %v3116_v47  ;;  %vm9881_vm12 = vnez %v9880_v22  ;;  %v2875_v28 = vsel %vm9873_vm0, %v2863_v36, %v2874_v9  ;;  %v3264_v9 = vld [vmem:[#allocation2 + $0x10] sm:$0xf0] }
 0x36e   : > { %v3223_v29 = vsel %vm9867_vm10, %v3221_v56, %v3222_v55  ;;  %v3225_v44 = vsel %vm9879_vm11, %v3222_v55, %v3224_v43  ;;  %v3082_v18 = vsel %vm6991_vm7, %v7945_v27, %v3018_v53  ;;  %v2948_v26 = vsel %vm9883_vm15, %v8027_v21, %v2947_v8  ;;  %vm9889_vm10 = vmmov %vm9884_vm3 }
 0x36f   : > { %v3253_v19 = vsel %vm9881_vm12, %v3199_v45, %v3223_v29  ;;  %v3254_v1 = vsel %vm9881_vm12, %v7900_v34, %v3225_v44  ;;  %v3122_v42 = vshrl.u32 %v3082_v18, 16  ;;  %v3125_v24 = vshll.u32 %v3082_v18, 16  ;;  %vm9890_vm11 = vmmov %vm9884_vm3 }
 0x370   : > { %v3266_v63 = vshrl.u32 %v3253_v19, 16  ;;  %v3269_v33 = vshll.u32 %v3253_v19, 16  ;;  %v3273_v41 = vshrl.u32 %v3254_v1, 16  ;;  %v3276_v56 = vshll.u32 %v3254_v1, 16 }
 0x371   : > { %v3120_v7 = vsel %vm9882_vm14, %v3108_v20, %v3119_v32  ;;  %v8082_v6 = vrot.slane %v3122_v42, 7  ;;  %v2973_v45 = vsel %vm6935_vm6, %v7949_v39, %v2948_v26  ;;  %v2918_v21 = vsel %vm6599_vm2, %v7843_v2, %v2875_v28  ;;  %vm9891_vm14 = vmmov %vm9873_vm0 }
 0x372   : > { %v3268_v55 = vrot.slane %v3266_v63, 7  ;;  %v3275_v58 = vrot.slane %v3273_v41, 7  ;;  %v3191_v53 = vsel %vm7025_vm8, %v7920_v31, %v3120_v7  ;;  %v3020_v44 = vshrl.u32 %v2973_v45, 16  ;;  %v9887_v7 = vld [vmem:[#allocation36_spill] sm:$0xff] }
 0x373   : > { %v3226_v29 = vrot.slane %v3191_v53, 1  ;;  %v3127_v20 = vor.u32 %v3125_v24, %v8082_v6  ;;  %v3023_v32 = vshll.u32 %v2973_v45, 16  ;;  %v8097_v36 = vrot.slane %v2877_v50, 7 }
 0x374   : > { %v3271_v18 = vor.u32 %v3269_v33, %v3268_v55  ;;  %v3278_v19 = vor.u32 %v3276_v56, %v3275_v58  ;;  %v8101_v63 = vrot.slane %v3020_v44, 7  ;;  %v8103_v41 = vrot.slane %v2918_v21, 1 }
 0x375   : > { %v3227_v1 = vsel %vm9884_vm3, %v3224_v43, %v3226_v29  ;;  %v3128_v42 = vsel %vm9885_vm13, %v3116_v47, %v3127_v20  ;;  %vm9888_vm9 = vnez %v9887_v7  ;;  %vm9894_vm3 = vmmov %vm9873_vm0 }
 0x376   : > { %v3279_v24 = vsel %vm9886_vm1, %v3268_v55, %v3278_v19  ;;  %v3363_v33 = vsel %vm9888_vm9, %v3264_v9, %v3271_v18  ;;  %v3255_v56 = vsel %vm9881_vm12, %v7920_v31, %v3227_v1  ;;  %v3192_v50 = vsel %vm7025_vm8, %v7945_v27, %v3128_v42  ;;  %vm9895_vm13 = vmmov %vm9873_vm0 }
 0x377   : > { %v3364_v43 = vsel %vm9888_vm9, %v7900_v34, %v3279_v24  ;;  %v3376_v47 = vshrl.u32 %v3363_v33, 16  ;;  %v3379_v26 = vshll.u32 %v3363_v33, 16  ;;  %v3281_v28 = vshrl.u32 %v3255_v56, 16  ;;  %vm9896_vm1 = vmmov %vm9873_vm0 }
 0x378   : > { %v3383_v53 = vshrl.u32 %v3364_v43, 16  ;;  %v3386_v55 = vshll.u32 %v3364_v43, 16  ;;  %v3284_v45 = vshll.u32 %v3255_v56, 16  ;;  %v8117_v20 = vrot.slane %v3192_v50, 1 }
 0x379   : > { %v3378_v44 = vrot.slane %v3376_v47, 7  ;;  %v3283_v18 = vrot.slane %v3281_v28, 7  ;;  %v3025_v19 = vor.u32 %v3023_v32, %v8101_v63  ;;  %v2950_v21 = vsel %vm9889_vm10, %v2947_v8, %v8103_v41  ;;  %vm9897_vm10 = vmmov %vm9873_vm0 }
 0x37a   : > { %v3385_v1 = vrot.slane %v3383_v53, 7  ;;  %v3229_v42 = vsel %vm9890_vm11, %v3226_v29, %v8117_v20  ;;  %v2974_v24 = vsel %vm6935_vm6, %v7843_v2, %v2950_v21  ;;  %v2882_v33 = vor.u32 %v2880_v0, %v8097_v36  ;;  %v9892_v53 = vld [vmem:[#allocation51_spill] sm:$0xff]  ;;  %vm9898_vm11 = vmmov %vm9873_vm0 }
 0x37b   : > { %v3381_v56 = vor.u32 %v3379_v26, %v3378_v44  ;;  %v3286_v50 = vor.u32 %v3284_v45, %v3283_v18  ;;  %v3256_v43 = vsel %vm9881_vm12, %v7945_v27, %v3229_v42  ;;  %v3026_v32 = vsel %vm9891_vm14, %v8054_v48, %v3025_v19 }
 0x37c   : > { %v3388_v8 = vor.u32 %v3386_v55, %v3385_v1  ;;  %v3289_v47 = vshrl.u32 %v3256_v43, 16  ;;  %v3292_v28 = vshll.u32 %v3256_v43, 16  ;;  %v3083_v29 = vsel %vm6991_vm7, %v7949_v39, %v3026_v32 }
 0x37d   : > { %vm9893_vm15 = vnez %v9892_v53  ;;  %v3287_v0 = vsel %vm9873_vm0, %v3275_v58, %v3286_v50  ;;  %v3130_v26 = vshrl.u32 %v3083_v29, 16  ;;  %v3133_v45 = vshll.u32 %v3083_v29, 16 }
 0x37e   : > { %v3473_v21 = vsel %vm9893_vm15, %v3264_v9, %v3381_v56  ;;  %v3389_v4 = vsel %vm9894_vm3, %v3378_v44, %v3388_v8  ;;  %v3365_v48 = vsel %vm9888_vm9, %v7920_v31, %v3287_v0  ;;  %v8146_v32 = vrot.slane %v3289_v47, 7 }
 0x37f   : > { %v3502_v42 = vshrl.u32 %v3473_v21, 16  ;;  %v3505_v13 = vshll.u32 %v3473_v21, 16  ;;  %v3474_v55 = vsel %vm9893_vm15, %v7900_v34, %v3389_v4  ;;  %v3391_v19 = vshrl.u32 %v3365_v48, 16 }
 0x380   : > { %v3394_v43 = vshll.u32 %v3365_v48, 16  ;;  %v3510_v56 = vshrl.u32 %v3474_v55, 16  ;;  %v3513_v50 = vshll.u32 %v3474_v55, 16  ;;  %v3294_v44 = vor.u32 %v3292_v28, %v8146_v32 }
 0x381   : > { %v3504_v9 = vrot.slane %v3502_v42, 4  ;;  %v3507_v58 = vrot.slane %v3505_v13, 5  ;;  %v3393_v29 = vrot.slane %v3391_v19, 7  ;;  %v8149_v8 = vrot.slane %v3130_v26, 7 }
 0x382   : > { %v3028_v21 = vshrl.u32 %v2974_v24, 16  ;;  %v3512_v0 = vrot.slane %v3510_v56, 4  ;;  %v3515_v17 = vrot.slane %v3513_v50, 5  ;;  %v3031_v52 = vshll.u32 %v2974_v24, 16 }
 0x383   : > { %v3508_v3 = vor.u32 %v3507_v58, %v3504_v9  ;;  %v3396_v23 = vor.u32 %v3394_v43, %v3393_v29  ;;  %v3295_v4 = vsel %vm9895_vm13, %v3283_v18, %v3294_v44  ;;  %v3135_v34 = vor.u32 %v3133_v45, %v8149_v8  ;;  %vm9901_vm13 = vmmov %vm9873_vm0 }
 0x384   : > { %v8153_v47 = vrot.slane %v3028_v21, 7  ;;  %v3516_v13 = vor.u32 %v3515_v17, %v3512_v0  ;;  %v3366_v42 = vsel %vm9888_vm9, %v7945_v27, %v3295_v4  ;;  %v2883_v28 = vsel %vm9896_vm1, %v8043_v37, %v2882_v33 }
 0x385   : > { %v2775_v26 = vshrl.u32 %v7938_v5, 16  ;;  %v3397_v48 = vsel %vm9897_vm10, %v3385_v1, %v3396_v23  ;;  %v3399_v24 = vshrl.u32 %v3366_v42, 16  ;;  %v3402_v55 = vshll.u32 %v3366_v42, 16 }
 0x386   : > { %v3136_v18 = vsel %vm9898_vm11, %v8082_v6, %v3135_v34  ;;  %vm9899_vm14 = vsmask.f32 3328  ;;  %v3475_v17 = vsel %vm9893_vm15, %v7920_v31, %v3397_v48  ;;  %v3033_v37 = vor.u32 %v3031_v52, %v8153_v47  ;;  %vm9904_vm11 = vmmov %vm9873_vm0 }
 0x387   : > { %v3517_v45 = vsel %vm9899_vm14, %v3508_v3, %v3516_v13  ;;  %v3193_v19 = vsel %vm7025_vm8, %v7949_v39, %v3136_v18  ;;  %v3519_v33 = vshrl.u32 %v3475_v17, 16  ;;  %v3522_v23 = vshll.u32 %v3475_v17, 16  ;;  %vm9903_vm10 = vmmov %vm9899_vm14 }
 0x388   : > { %5844 = vmatprep.mubr.bf16.mxu1 %v3517_v45  ;;  %v8172_v1 = vrot.slane %v3399_v24, 7  ;;  %v3230_v43 = vrot.slane %v3193_v19, 1  ;;  %v3034_v6 = vsel %vm9873_vm0, %v8101_v63, %v3033_v37  ;;  %v2919_v3 = vsel %vm6599_vm2, %v7848_v38, %v2883_v28  ;;  %v2690_v28 = vld [vmem:[#allocation2 + $0x50] sm:$0xf]  ;;  %vm9905_vm14 = vmmov %vm9873_vm0 }
 0x389   : > { %v8179_v31 = vrot.slane %v2775_v26, 7  ;;  %v2778_v9 = vshll.u32 %v7938_v5, 16  ;;  %v3521_v58 = vrot.slane %v3519_v33, 4  ;;  %v3524_v56 = vrot.slane %v3522_v23, 5 }
 0x38a   : > { %v3404_v52 = vor.u32 %v3402_v55, %v8172_v1  ;;  %vm9900_vm3 = vcmask 1046528   ;;  %v3084_v63 = vsel %vm6991_vm7, %v7843_v2, %v3034_v6  ;;  %v8191_v21 = vrot.slane %v2919_v3, 1 }
 0x38b   : > { %v3231_v50 = vsel %vm9900_vm3, %v8117_v20, %v3230_v43  ;;  %v2780_v0 = vor.u32 %v2778_v9, %v8179_v31  ;;  %v3525_v5 = vor.u32 %v3524_v56, %v3521_v58  ;;  %v3138_v26 = vshrl.u32 %v3084_v63, 16  ;;  %vm9902_vm1 = vmmov %vm9900_vm3 }
 0x38c   : > { %v3257_v44 = vsel %vm9881_vm12, %v7949_v39, %v3231_v50  ;;  %v3405_v4 = vsel %vm9901_vm13, %v3393_v29, %v3404_v52  ;;  %v3141_v48 = vshll.u32 %v3084_v63, 16  ;;  %v2952_v24 = vsel %vm9902_vm1, %v8103_v41, %v8191_v21  ;;  %vm9906_vm3 = vmmov %vm9903_vm10 }
 0x38d   : > { %v3297_v34 = vshrl.u32 %v3257_v44, 16  ;;  %v3300_v42 = vshll.u32 %v3257_v44, 16  ;;  %v3476_v20 = vsel %vm9893_vm15, %v7945_v27, %v3405_v4  ;;  %v3526_v55 = vsel %vm9903_vm10, %v3516_v13, %v3525_v5  ;;  %vm9907_vm13 = vmmov %vm9902_vm1 }
 0x38e   : > { %v3528_v18 = vshrl.u32 %v3476_v20, 16  ;;  %v3531_v45 = vshll.u32 %v3476_v20, 16  ;;  %5845 = vmatmul.mubr.bf16.vlgmr.msra.gmra.mrb[20].mxu1 %v3526_v55  ;;  %v3140_v29 = vrot.slane %v3138_v26, 7  ;;  %v2975_v19 = vsel %vm6935_vm6, %v7848_v38, %v2952_v24  ;;  %vm9908_vm1 = vmmov %vm9873_vm0 }
 0x38f   : > { %v3299_v17 = vrot.slane %v3297_v34, 7  ;;  %v2781_v27 = vsel %vm9904_vm11, %v7922_v25, %v2780_v0  ;;  %v2701_v37 = vsel %vm6352_vm5, %v2690_v28, 0  ;;  %v3036_v6 = vshrl.u32 %v2975_v19, 16  ;;  %vm9909_vm10 = vmmov %vm9873_vm0 }
 0x390   : > { %v3530_v33 = vrot.slane %v3528_v18, 4  ;;  %v3533_v23 = vrot.slane %v3531_v45, 5  ;;  %v3143_v13 = vor.u32 %v3141_v48, %v3140_v29  ;;  %v2810_v3 = vsel %vm6445_vm4, %v7926_v46, %v2781_v27  ;;  %vm9910_vm11 = vmmov %vm9873_vm0 }
 0x391   : > { %v3302_v41 = vor.u32 %v3300_v42, %v3299_v17  ;;  %v2783_v9 = vshrl.u32 %v2701_v37, 16  ;;  %v8214_v52 = vrot.slane %v3036_v6, 7  ;;  %v2885_v25 = vshrl.u32 %v2810_v3, 16 }
 0x392   : > { %v3534_v58 = vor.u32 %v3533_v23, %v3530_v33  ;;  %v3144_v44 = vsel %vm9873_vm0, %v8149_v8, %v3143_v13  ;;  %v3039_v63 = vshll.u32 %v2975_v19, 16  ;;  %v2786_v24 = vshll.u32 %v2701_v37, 16 }
 0x393   : > { %v3303_v56 = vsel %vm9905_vm14, %v8146_v32, %v3302_v41  ;;  %v2785_v0 = vrot.slane %v2783_v9, 7  ;;  %v3194_v42 = vsel %vm7025_vm8, %v7843_v2, %v3144_v44  ;;  %v2888_v32 = vshll.u32 %v2810_v3, 16  ;;  %vm9911_vm14 = vmmov %vm9873_vm0 }
 0x394   : > { %v3367_v50 = vsel %vm9888_vm9, %v7949_v39, %v3303_v56  ;;  %v3535_v4 = vsel %vm9906_vm3, %v3525_v5, %v3534_v58  ;;  %v3232_v20 = vrot.slane %v3194_v42, 1  ;;  %v3041_v26 = vor.u32 %v3039_v63, %v8214_v52  ;;  %vm9912_vm0 = vmmov %vm9907_vm13 }
 0x395   : > { %v3407_v34 = vshrl.u32 %v3367_v50, 16  ;;  %5848 = vmatprep.mubr.bf16.mxu1 %v3535_v4  ;;  %v2887_v48 = vrot.slane %v2885_v25, 7  ;;  %v3410_v18 = vshll.u32 %v3367_v50, 16  ;;  %v2788_v19 = vor.u32 %v2786_v24, %v2785_v0  ;;  %vm9913_vm3 = vmmov %vm9908_vm1 }
 0x396   : > { %v3233_v8 = vsel %vm9907_vm13, %v3230_v43, %v3232_v20  ;;  %v3042_v45 = vsel %vm9908_vm1, %v8153_v47, %v3041_v26  ;;  %vm9914_vm13 = vmmov %vm9908_vm1  ;;  %vm9915_vm1 = vsmask.f32 3328 }
 0x397   : > { %v3409_v55 = vrot.slane %v3407_v34, 7  ;;  %v2890_v5 = vor.u32 %v2888_v32, %v2887_v48  ;;  %v3258_v33 = vsel %vm9881_vm12, %v7843_v2, %v3233_v8  ;;  %v3085_v23 = vsel %vm6991_vm7, %v7848_v38, %v3042_v45 }
 0x398   : > { %v3305_v41 = vshrl.u32 %v3258_v33, 16  ;;  %v3308_v37 = vshll.u32 %v3258_v33, 16  ;;  %v3146_v6 = vshrl.u32 %v3085_v23, 16  ;;  %v3149_v13 = vshll.u32 %v3085_v23, 16 }
 0x399   : > { %v3412_v27 = vor.u32 %v3410_v18, %v3409_v55  ;;  %v2891_v47 = vsel %vm9910_vm11, %v8097_v36, %v2890_v5  ;;  %v2789_v3 = vsel %vm9911_vm14, %v8179_v31, %v2788_v19  ;;  %vm9917_vm11 = vmmov %vm9913_vm3 }
 0x39a   : > { %v3307_v56 = vrot.slane %v3305_v41, 7  ;;  %v8244_v25 = vrot.slane %v3146_v6, 7  ;;  %v2920_v50 = vsel %vm6599_vm2, %v7926_v46, %v2891_v47  ;;  %v2811_v36 = vsel %vm6445_vm4, %v2690_v28, %v2789_v3  ;;  %v3205_v6 = vld [vmem:[#allocation2 + $0x40] sm:$0xff]  ;;  %v2812_v3 = vld [vmem:[#allocation2 + $0x50] sm:$0x1f]  ;;  %vm9918_vm14 = vmmov %vm9913_vm3 }
 0x39b   : > { %v3413_v43 = vsel %vm9909_vm10, %v8172_v1, %v3412_v27  ;;  %v2953_v63 = vrot.slane %v2920_v50, 1  ;;  %v2893_v4 = vshrl.u32 %v2811_v36, 16  ;;  %v2896_v32 = vshll.u32 %v2811_v36, 16  ;;  %vm9916_vm10 = vmmov %vm9912_vm0 }
 0x39c   : > { %v3477_v9 = vsel %vm9893_vm15, %v7949_v39, %v3413_v43  ;;  %v3310_v0 = vor.u32 %v3308_v37, %v3307_v56  ;;  %v3151_v31 = vor.u32 %v3149_v13, %v8244_v25 }
 0x39d   : > { %v3537_v44 = vshrl.u32 %v3477_v9, 16  ;;  %v3540_v1 = vshll.u32 %v3477_v9, 16  ;;  %v2954_v39 = vsel %vm9912_vm0, %v8191_v21, %v2953_v63  ;;  %v2895_v8 = vrot.slane %v2893_v4, 7  ;;  %vm9919_vm0 = vmmov %vm9913_vm3 }
 0x39e   : > { %v3311_v26 = vsel %vm9913_vm3, %v3299_v17, %v3310_v0  ;;  %v3152_v24 = vsel %vm9914_vm13, %v3140_v29, %v3151_v31  ;;  %v2976_v18 = vsel %vm6935_vm6, %v7926_v46, %v2954_v39  ;;  %vm9920_vm3 = vmmov %vm9916_vm10 }
 0x39f   : > { %v3539_v34 = vrot.slane %v3537_v44, 4  ;;  %v3542_v42 = vrot.slane %v3540_v1, 5  ;;  %v3368_v45 = vsel %vm9888_vm9, %v7843_v2, %v3311_v26  ;;  %v3195_v5 = vsel %vm7025_vm8, %v7848_v38, %v3152_v24  ;;  %vm9921_vm13 = vmmov %vm9919_vm0 }
 0x3a0   : > { %v3044_v21 = vshrl.u32 %v2976_v18, 16  ;;  %v3415_v19 = vshrl.u32 %v3368_v45, 16  ;;  %v3234_v27 = vrot.slane %v3195_v5, 1  ;;  %v3047_v33 = vshll.u32 %v2976_v18, 16 }
 0x3a1   : > { %v3543_v28 = vor.u32 %v3542_v42, %v3539_v34  ;;  %v2898_v23 = vor.u32 %v2896_v32, %v2895_v8  ;;  %v3418_v37 = vshll.u32 %v3368_v45, 16  ;;  %v8283_v34 = vld [vmem:[#allocation2 + $0x50] sm:$0xff]  ;;  %v2924_v32 = vld [vmem:[#allocation2 + $0x58] sm:$0xf] }
 0x3a2   : > { %v3046_v29 = vrot.slane %v3044_v21, 7  ;;  %v3417_v41 = vrot.slane %v3415_v19, 7  ;;  %v3235_v43 = vsel %vm9916_vm10, %v3232_v20, %v3234_v27  ;;  %vm9923_vm10 = vsmask.f32 3328 }
 0x3a3   : > { %v3544_v17 = vsel %vm9915_vm1, %v3534_v58, %v3543_v28  ;;  %v3259_v13 = vsel %vm9881_vm12, %v3205_v6, %v3235_v43  ;;  %v2899_v38 = vsel %vm9917_vm11, %v2887_v48, %v2898_v23  ;;  %vm9922_vm1 = vmmov %vm9919_vm0 }
 0x3a4   : > { %5849 = vmatmul.mubr.bf16.gmra.mrb[24].mxu1 %v3544_v17  ;;  %v3049_v47 = vor.u32 %v3047_v33, %v3046_v29  ;;  %v3420_v9 = vor.u32 %v3418_v37, %v3417_v41  ;;  %v3313_v50 = vshrl.u32 %v3259_v13, 16  ;;  %v2921_v58 = vsel %vm6599_vm2, %v2812_v3, %v2899_v38  ;;  %vm9924_vm11 = vmmov %vm9919_vm0 }
 0x3a5   : > { %v2955_v1 = vrot.slane %v2921_v58, 1  ;;  %v3316_v20 = vshll.u32 %v3259_v13, 16 }
 0x3a6   : > { %v3050_v44 = vsel %vm9918_vm14, %v8214_v52, %v3049_v47  ;;  %v3421_v36 = vsel %vm9919_vm0, %v3409_v55, %v3420_v9  ;;  %v8275_v0 = vrot.slane %v3313_v50, 7  ;;  %vm9925_vm14 = vmmov %vm9919_vm0 }
 0x3a7   : > { %v3086_v31 = vsel %vm6991_vm7, %v7926_v46, %v3050_v44  ;;  %v3478_v48 = vsel %vm9893_vm15, %v7843_v2, %v3421_v36  ;;  %v2956_v42 = vsel %vm9920_vm3, %v2953_v63, %v2955_v1  ;;  %v2978_v8 = vsel %vm6935_vm6, %v2924_v32, %v2955_v1  ;;  %vm9926_vm0 = vmmov %vm9920_vm3 }
 0x3a8   : > { %v3154_v4 = vshrl.u32 %v3086_v31, 16  ;;  %v3546_v52 = vshrl.u32 %v3478_v48, 16  ;;  %v3549_v39 = vshll.u32 %v3478_v48, 16  ;;  %v3318_v55 = vor.u32 %v3316_v20, %v8275_v0  ;;  %vm9927_vm3 = vmmov %vm9922_vm1 }
 0x3a9   : > { %v2977_v26 = vsel %vm6935_vm6, %v8283_v34, %v2956_v42  ;;  %v3157_v18 = vshll.u32 %v3086_v31, 16  ;;  %v3060_v63 = vshrl.u32 %v2978_v8, 16  ;;  %v3063_v47 = vshll.u32 %v2978_v8, 16 }
 0x3aa   : > { %v3156_v24 = vrot.slane %v3154_v4, 7  ;;  %v3052_v2 = vshrl.u32 %v2977_v26, 16  ;;  %v3548_v45 = vrot.slane %v3546_v52, 4  ;;  %v3551_v5 = vrot.slane %v3549_v39, 5 }
 0x3ab   : > { %v3319_v21 = vsel %vm9921_vm13, %v3307_v56, %v3318_v55  ;;  %v3055_v23 = vshll.u32 %v2977_v26, 16  ;;  %v3062_v13 = vrot.slane %v3060_v63, 7  ;;  %vm9928_vm13 = vmmov %vm9922_vm1 }
 0x3ac   : > { %v3369_v19 = vsel %vm9888_vm9, %v3205_v6, %v3319_v21  ;;  %v3159_v17 = vor.u32 %v3157_v18, %v3156_v24  ;;  %v3054_v33 = vrot.slane %v3052_v2, 7  ;;  %v3552_v37 = vor.u32 %v3551_v5, %v3548_v45 }
 0x3ad   : > { %v3423_v43 = vshrl.u32 %v3369_v19, 16  ;;  %v3426_v3 = vshll.u32 %v3369_v19, 16  ;;  %v3065_v44 = vor.u32 %v3063_v47, %v3062_v13 }
 0x3ae   : > { %v3160_v38 = vsel %vm9922_vm1, %v8244_v25, %v3159_v17  ;;  %v3057_v9 = vor.u32 %v3055_v23, %v3054_v33  ;;  %v3553_v50 = vsel %vm9923_vm10, %v3543_v28, %v3552_v37  ;;  %vm9929_vm10 = vmmov %vm9922_vm1 }
 0x3af   : > { %v8298_v58 = vrot.slane %v3423_v43, 7  ;;  %v3196_v56 = vsel %vm7025_vm8, %v7926_v46, %v3160_v38  ;;  %5852 = vmatprep.mubr.bf16.mxu1 %v3553_v50  ;;  %v3066_v31 = vsel %vm9925_vm14, %v3054_v33, %v3065_v44  ;;  %v3089_v43 = vld [vmem:[#allocation2 + $0x58] sm:$0x1f]  ;;  %vm9931_vm14 = vmmov %vm9926_vm0 }
 0x3b0   : > { %v3236_v1 = vrot.slane %v3196_v56, 1  ;;  %v3058_v36 = vsel %vm9924_vm11, %v3046_v29, %v3057_v9  ;;  %v3088_v4 = vsel %vm6991_vm7, %v2924_v32, %v3066_v31  ;;  %v3209_v9 = vld [vmem:[#allocation2 + $0x60] sm:$0xf]  ;;  %vm9930_vm11 = vsmask.f32 3328 }
 0x3b1   : > { %v3428_v20 = vor.u32 %v3426_v3, %v8298_v58  ;;  %v3087_v25 = vsel %vm6991_vm7, %v8283_v34, %v3058_v36  ;;  %v3170_v52 = vshrl.u32 %v3088_v4, 16  ;;  %v3173_v45 = vshll.u32 %v3088_v4, 16 }
 0x3b2   : > { %v3237_v28 = vsel %vm9926_vm0, %v3234_v27, %v3236_v1  ;;  %v3162_v48 = vshrl.u32 %v3087_v25, 16  ;;  %v3165_v18 = vshll.u32 %v3087_v25, 16 }
 0x3b3   : > { %v3429_v42 = vsel %vm9927_vm3, %v3417_v41, %v3428_v20  ;;  %v3260_v29 = vsel %vm9881_vm12, %v7926_v46, %v3237_v28  ;;  %v3172_v27 = vrot.slane %v3170_v52, 7  ;;  %v3208_v20 = vld [vmem:[#allocation2 + $0x58] sm:$0xff]  ;;  %vm9932_vm3 = vmmov %vm9922_vm1 }
 0x3b4   : > { %v3479_v39 = vsel %vm9893_vm15, %v3205_v6, %v3429_v42  ;;  %v3321_v55 = vshrl.u32 %v3260_v29, 16  ;;  %v3164_v26 = vrot.slane %v3162_v48, 7  ;;  %v3324_v21 = vshll.u32 %v3260_v29, 16 }
 0x3b5   : > { %v3555_v8 = vshrl.u32 %v3479_v39, 16  ;;  %v3558_v2 = vshll.u32 %v3479_v39, 16  ;;  %v3175_v19 = vor.u32 %v3173_v45, %v3172_v27 }
 0x3b6   : > { %v3323_v5 = vrot.slane %v3321_v55, 7  ;;  %v3167_v32 = vor.u32 %v3165_v18, %v3164_v26 }
 0x3b7   : > { %v3557_v63 = vrot.slane %v3555_v8, 4  ;;  %v3560_v41 = vrot.slane %v3558_v2, 5  ;;  %v3176_v13 = vsel %vm9922_vm1, %v3164_v26, %v3175_v19 }
 0x3b8   : > { %v3326_v17 = vor.u32 %v3324_v21, %v3323_v5  ;;  %v3168_v33 = vsel %vm9928_vm13, %v3156_v24, %v3167_v32  ;;  %v3198_v38 = vsel %vm7025_vm8, %v3089_v43, %v3176_v13  ;;  %vm9933_vm13 = vmmov %vm9922_vm1 }
 0x3b9   : > { %v3561_v23 = vor.u32 %v3560_v41, %v3557_v63  ;;  %v3197_v6 = vsel %vm7025_vm8, %v8283_v34, %v3168_v33  ;;  %v3240_v56 = vrot.slane %v3198_v38, 1 }
 0x3ba   : > { %v3327_v47 = vsel %vm9929_vm10, %v8275_v0, %v3326_v17  ;;  %v3238_v3 = vrot.slane %v3197_v6, 1  ;;  %vm9934_vm10 = vmmov %vm9922_vm1 }
 0x3bb   : > { %v3562_v50 = vsel %vm9930_vm11, %v3552_v37, %v3561_v23  ;;  %v3370_v24 = vsel %vm9888_vm9, %v7926_v46, %v3327_v47  ;;  %v3263_v25 = vsel %vm9881_vm12, %v3209_v9, %v3240_v56 }
 0x3bc   : > { %5853 = vmatmul.mubr.bf16.gmra.mrb[28].mxu1 %v3562_v50  ;;  %v3431_v44 = vshrl.u32 %v3370_v24, 16  ;;  %v3239_v36 = vsel %vm9931_vm14, %v3236_v1, %v3238_v3  ;;  %v3241_v31 = vsel %vm9926_vm0, %v3238_v3, %v3240_v56  ;;  %v3434_v28 = vshll.u32 %v3370_v24, 16  ;;  %vm9935_vm14 = vmmov %vm9922_vm1 }
 0x3bd   : > { %v3261_v0 = vsel %vm9881_vm12, %v8283_v34, %v3239_v36  ;;  %v3262_v4 = vsel %vm9881_vm12, %v3208_v20, %v3241_v31  ;;  %v3345_v29 = vshrl.u32 %v3263_v25, 16  ;;  %v3348_v8 = vshll.u32 %v3263_v25, 16  ;;  %vm9936_vm0 = vmmov %vm9922_vm1 }
 0x3be   : > { %v3433_v37 = vrot.slane %v3431_v44, 7  ;;  %v3329_v48 = vshrl.u32 %v3261_v0, 16  ;;  %v3337_v42 = vshrl.u32 %v3262_v4, 16  ;;  %v3332_v39 = vshll.u32 %v3261_v0, 16 }
 0x3bf   : > { %v3340_v26 = vshll.u32 %v3262_v4, 16  ;;  %v3347_v18 = vrot.slane %v3345_v29, 7 }
 0x3c0   : > { %v3436_v52 = vor.u32 %v3434_v28, %v3433_v37  ;;  %v3331_v1 = vrot.slane %v3329_v48, 7  ;;  %v3339_v55 = vrot.slane %v3337_v42, 7 }
 0x3c1   : > { %v3350_v32 = vor.u32 %v3348_v8, %v3347_v18 }
 0x3c2   : > { %v3437_v2 = vsel %vm9932_vm3, %v8298_v58, %v3436_v52  ;;  %v3334_v27 = vor.u32 %v3332_v39, %v3331_v1  ;;  %v3342_v21 = vor.u32 %v3340_v26, %v3339_v55  ;;  %vm9937_vm3 = vmmov %vm9936_vm0 }
 0x3c3   : > { %v3480_v45 = vsel %vm9893_vm15, %v7926_v46, %v3437_v2  ;;  %v3351_v6 = vsel %vm9934_vm10, %v3339_v55, %v3350_v32 }
 0x3c4   : > { %v3564_v63 = vshrl.u32 %v3480_v45, 16  ;;  %v3567_v41 = vshll.u32 %v3480_v45, 16  ;;  %v3335_v19 = vsel %vm9933_vm13, %v3323_v5, %v3334_v27  ;;  %v3343_v33 = vsel %vm9922_vm1, %v3331_v1, %v3342_v21  ;;  %v3374_v1 = vld [vmem:[#allocation2 + $0x60] sm:$0x1f]  ;;  %vm9938_vm13 = vmmov %vm9930_vm11 }
 0x3c5   : > { %v3371_v17 = vsel %vm9888_vm9, %v8283_v34, %v3335_v19  ;;  %v3372_v46 = vsel %vm9888_vm9, %v3208_v20, %v3343_v33  ;;  %v3373_v47 = vsel %vm9888_vm9, %v3209_v9, %v3351_v6  ;;  %vm9939_vm1 = vmmov %vm9930_vm11 }
 0x3c6   : > { %v3566_v58 = vrot.slane %v3564_v63, 4  ;;  %v3569_v43 = vrot.slane %v3567_v41, 5  ;;  %v3439_v13 = vshrl.u32 %v3371_v17, 16  ;;  %v3442_v5 = vshll.u32 %v3371_v17, 16  ;;  %vm9940_vm10 = vmmov %vm9939_vm1 }
 0x3c7   : > { %v3447_v50 = vshrl.u32 %v3372_v46, 16  ;;  %v3455_v24 = vshrl.u32 %v3373_v47, 16  ;;  %v3450_v0 = vshll.u32 %v3372_v46, 16  ;;  %v3458_v25 = vshll.u32 %v3373_v47, 16 }
 0x3c8   : > { %v3570_v3 = vor.u32 %v3569_v43, %v3566_v58  ;;  %v3441_v38 = vrot.slane %v3439_v13, 7 }
 0x3c9   : > { %v3449_v36 = vrot.slane %v3447_v50, 7  ;;  %v3457_v31 = vrot.slane %v3455_v24, 7 }
 0x3ca   : > { %v3571_v56 = vsel %vm9930_vm11, %v3561_v23, %v3570_v3  ;;  %v3444_v44 = vor.u32 %v3442_v5, %v3441_v38 }
 0x3cb   : > { %5856 = vmatprep.mubr.bf16.mxu1 %v3571_v56  ;;  %v3452_v48 = vor.u32 %v3450_v0, %v3449_v36  ;;  %v3460_v4 = vor.u32 %v3458_v25, %v3457_v31  ;;  %v5971_v31 = vld [vmem:[%s9494_s3 + $0x80] sm:$0xff]   ;;  %v5972_v25 = vld [vmem:[%s9494_s3 + $0x88] sm:$0xff]  }
 0x3cc   : > { %v3445_v28 = vsel %vm9935_vm14, %v3433_v37, %v3444_v44  ;;  %5864 = vmatprep.subr.bf16.mxu0 %v5971_v31  ;;  %5900 = vmatprep.subr.bf16.mxu1 %v5971_v31 }
 0x3cd   : > { %v3481_v9 = vsel %vm9893_vm15, %v8283_v34, %v3445_v28  ;;  %v3453_v52 = vsel %vm9936_vm0, %v3441_v38, %v3452_v48  ;;  %v3461_v39 = vsel %vm9937_vm3, %v3449_v36, %v3460_v4  ;;  %5865 = vmatpush3.bf16.msra.mxu0 %v5971_v31  ;;  %5908 = vmatpush3.bf16.msra.mxu1 %v5971_v31 }
 0x3ce   : > { %v3573_v42 = vshrl.u32 %v3481_v9, 16  ;;  %v3576_v29 = vshll.u32 %v3481_v9, 16  ;;  %v3482_v23 = vsel %vm9893_vm15, %v3208_v20, %v3453_v52  ;;  %v3483_v8 = vsel %vm9893_vm15, %v3374_v1, %v3461_v39  ;;  %5866 = vmatprep.subr.bf16.mxu0 %v5972_v25  ;;  %5901 = vmatprep.subr.bf16.mxu1 %v5972_v25 }
 0x3cf   : > { %v3582_v18 = vshrl.u32 %v3482_v23, 16  ;;  %v3585_v37 = vshll.u32 %v3482_v23, 16  ;;  %v3591_v45 = vshrl.u32 %v3483_v8, 16  ;;  %v3594_v21 = vshll.u32 %v3483_v8, 16  ;;  %v5973_v23 = vld [vmem:[%s9494_s3 + $0x90] sm:$0xff]  }
 0x3d0   : > { %v3575_v55 = vrot.slane %v3573_v42, 4  ;;  %v3578_v26 = vrot.slane %v3576_v29, 5 }
 0x3d1   : > { %v3584_v34 = vrot.slane %v3582_v18, 4  ;;  %v3587_v27 = vrot.slane %v3585_v37, 5  ;;  %v3593_v41 = vrot.slane %v3591_v45, 4  ;;  %v3596_v20 = vrot.slane %v3594_v21, 5  ;;  %5867 = vmatpush3.bf16.msra.mxu0 %v5972_v25  ;;  %5909 = vmatpush3.bf16.msra.mxu1 %v5972_v25  ;;  %v9941_v25 = vld [vmem:[#allocation15_spill] sm:$0xff] }
 0x3d2   : > { %v3579_v2 = vor.u32 %v3578_v26, %v3575_v55  ;;  %5868 = vmatprep.subr.bf16.mxu0 %v5973_v23  ;;  %5902 = vmatprep.subr.bf16.mxu1 %v5973_v23 }
 0x3d3   : > { %v3588_v63 = vor.u32 %v3587_v27, %v3584_v34  ;;  %v3597_v17 = vor.u32 %v3596_v20, %v3593_v41  ;;  %v5974_v27 = vld [vmem:[%s9494_s3 + $0x98] sm:$0xff]  }
 0x3d4   : > { %v3580_v32 = vsel %vm9938_vm13, %v3570_v3, %v3579_v2 }
 0x3d5   : > { %5857 = vmatmul.mubr.bf16.gmra.mrb[32].mxu1 %v3580_v32  ;;  %v3589_v19 = vsel %vm9939_vm1, %v3579_v2, %v3588_v63  ;;  %v3598_v33 = vsel %vm9940_vm10, %v3588_v63, %v3597_v17  ;;  %5869 = vmatpush3.bf16.msra.mxu0 %v5973_v23 }
 0x3d6   : > { %5860 = vmatprep.mubr.bf16.mxu1 %v3589_v19  ;;  %5910 = vmatpush3.bf16.msra.mxu1 %v5973_v23  ;;  %v5975_v19 = vld [vmem:[%s9494_s3 + $0xa0] sm:$0xff]  }
 0x3d7   : > { %5870 = vmatprep.subr.bf16.mxu0 %v5974_v27  ;;  %5903 = vmatprep.subr.bf16.mxu1 %v5974_v27 }
 0x3d9   : > { %5871 = vmatpush3.bf16.msra.mxu0 %v5974_v27 }
 0x3da   : > { %5911 = vmatpush3.bf16.msra.mxu1 %v5974_v27  ;;  %5872 = vmatprep.subr.bf16.mxu0 %v5975_v19 }
 0x3db   : > { %5904 = vmatprep.subr.bf16.mxu1 %v5975_v19 }
 0x3dd   : > { %5861 = vmatmul.mubr.bf16.gmra.mrb[36].mxu1 %v3598_v33  ;;  %v5976_v33 = vld [vmem:[%s9494_s3 + $0xa8] sm:$0xff]   ;;  %5873 = vmatpush3.bf16.msra.mxu0 %v5975_v19 }
 0x3de   : > { %5912 = vmatpush3.bf16.msra.mxu1 %v5975_v19  ;;  %5874 = vmatprep.subr.bf16.mxu0 %v5976_v33  ;;  %v9944_v19 = vld [vmem:[#allocation17_spill] sm:$0xff] }
 0x3df   : > { %5905 = vmatprep.subr.bf16.mxu1 %v5976_v33 }
 0x3e1   : > { %5875 = vmatpush3.bf16.msra.mxu0 %v5976_v33 }
 0x3e2   : > { %5913 = vmatpush3.bf16.msra.mxu1 %v5976_v33 }
 0x461   : > { %v5846_v6 = vpop.f32.mrb[20].mxu1 }
 0x462   : > { %v3691_v58 = vpop.f32.mrb[21].mxu1  ;;  %v8378_v38 = vmul.f32 %v5846_v6, %v9831_v54  ;;  %v5977_v6 = vld [vmem:[%s9494_s3 + $0xb0] sm:$0xff]  }
 0x463   : > { %v5847_v43 = vpop.f32.mrb[22].mxu1  ;;  %v8373_v47 = vmul.f32 %v3691_v58, %v9828_v11  ;;  %5876 = vmatprep.subr.bf16.mxu0 %v5977_v6  ;;  %5906 = vmatprep.subr.bf16.mxu1 %v5977_v6  ;;  %v5978_v58 = vld [vmem:[%s9494_s3 + $0xb8] sm:$0xff]  }
 0x464   : > { %v3694_v13 = vpop.f32.mrb[23].mxu1  ;;  %v3817_v56 = vmul.f32 %v8378_v38, %v8378_v38  ;;  %v8387_v44 = vmul.f32 %v5847_v43, %v9832_v12  ;;  %5877 = vmatpush3.bf16.msra.mxu0 %v5977_v6  ;;  %5914 = vmatpush3.bf16.msra.mxu1 %v5977_v6  ;;  %v9945_v6 = vld [vmem:[#allocation20_spill] sm:$0xff] }
 0x465   : > { %v8370_v46 = vmul.f32 %v3694_v13, %v9830_v49  ;;  %v3815_v5 = vmul.f32 %v8373_v47, %v8373_v47  ;;  %5878 = vmatprep.subr.bf16.mxu0 %v5978_v58  ;;  %5907 = vmatprep.subr.bf16.mxu1 %v5978_v58 }
 0x466   : > { %v3818_v28 = vmul.f32 %v8387_v44, %v8387_v44 }
 0x467   : > { %v3816_v3 = vmul.f32 %v8370_v46, %v8370_v46  ;;  %v3790_v50 = vadd.f32 %v8370_v46, %v8373_v47 }
 0x468   : > { %5879 = vmatpush3.bf16.msra.mxu0 %v5978_v58  ;;  %5915 = vmatpush3.bf16.msra.mxu1 %v5978_v58 }
 0x469   : > { %v3835_v24 = vadd.f32 %v3816_v3, %v3815_v5  ;;  %v3791_v36 = vadd.f32 %v3790_v50, %v8378_v38 }
 0x46b   : > { %v3836_v0 = vadd.f32 %v3835_v24, %v3817_v56  ;;  %v3792_v9 = vadd.f32 %v3791_v36, %v8387_v44 }
 0x46d   : > { %v3837_v29 = vadd.f32 %v3836_v0, %v3818_v28 }
 0x477   : > { %v5850_v48 = vpop.f32.mrb[24].mxu1 }
 0x478   : > { %v3707_v4 = vpop.f32.mrb[25].mxu1  ;;  %v8406_v39 = vmul.f32 %v5850_v48, %v9844_v51 }
 0x479   : > { %v8400_v42 = vmul.f32 %v3707_v4, %v9833_v40  ;;  %v5851_v52 = vpop.f32.mrb[26].mxu1 }
 0x47a   : > { %v3710_v1 = vpop.f32.mrb[27].mxu1  ;;  %v8415_v37 = vmul.f32 %v5851_v52, %v9845_v35  ;;  %v3821_v45 = vmul.f32 %v8406_v39, %v8406_v39 }
 0x47b   : > { %v3793_v55 = vadd.f32 %v3792_v9, %v8400_v42  ;;  %v3819_v26 = vmul.f32 %v8400_v42, %v8400_v42  ;;  %v8412_v18 = vmul.f32 %v3710_v1, %v9834_v15 }
 0x47c   : > { %v3822_v63 = vmul.f32 %v8415_v37, %v8415_v37 }
 0x47d   : > { %v3838_v8 = vadd.f32 %v3837_v29, %v3819_v26  ;;  %v3794_v2 = vadd.f32 %v3793_v55, %v8412_v18  ;;  %v3820_v34 = vmul.f32 %v8412_v18, %v8412_v18 }
 0x47f   : > { %v3795_v21 = vadd.f32 %v3794_v2, %v8406_v39  ;;  %v3839_v32 = vadd.f32 %v3838_v8, %v3820_v34  ;;  %v9942_v34 = vld [vmem:[#allocation16_spill] sm:$0xff] }
 0x481   : > { %v3840_v41 = vadd.f32 %v3839_v32, %v3821_v45  ;;  %v3796_v20 = vadd.f32 %v3795_v21, %v8415_v37  ;;  %v9943_v32 = vld [vmem:[#allocation18_spill] sm:$0xff] }
 0x483   : > { %v3841_v17 = vadd.f32 %v3840_v41, %v3822_v63 }
 0x48f   : > { %v5854_v43 = vpop.f32.mrb[28].mxu1 }
 0x490   : > { %v3723_v13 = vpop.f32.mrb[29].mxu1  ;;  %v8445_v24 = vmul.f32 %v5854_v43, %v6234_v14 }
 0x491   : > { %v8442_v3 = vmul.f32 %v3723_v13, %v9846_v62  ;;  %v5855_v5 = vpop.f32.mrb[30].mxu1 }
 0x492   : > { %v3726_v50 = vpop.f32.mrb[31].mxu1  ;;  %v8454_v28 = vmul.f32 %v5855_v5, %v9941_v25  ;;  %v3825_v4 = vmul.f32 %v8445_v24, %v8445_v24 }
 0x493   : > { %v3797_v56 = vadd.f32 %v3796_v20, %v8442_v3  ;;  %v3823_v36 = vmul.f32 %v8442_v3, %v8442_v3  ;;  %v8451_v0 = vmul.f32 %v3726_v50, %v9847_v61 }
 0x494   : > { %v3826_v1 = vmul.f32 %v8454_v28, %v8454_v28 }
 0x495   : > { %v3842_v31 = vadd.f32 %v3841_v17, %v3823_v36  ;;  %v3798_v48 = vadd.f32 %v3797_v56, %v8451_v0  ;;  %v3824_v9 = vmul.f32 %v8451_v0, %v8451_v0 }
 0x497   : > { %v3799_v29 = vadd.f32 %v3798_v48, %v8445_v24  ;;  %v3843_v52 = vadd.f32 %v3842_v31, %v3824_v9 }
 0x499   : > { %v3844_v23 = vadd.f32 %v3843_v52, %v3825_v4  ;;  %v3800_v55 = vadd.f32 %v3799_v29, %v8454_v28  ;;  %v9946_v4 = vld [vmem:[#allocation21_spill] sm:$0xff] }
 0x49b   : > { %v3845_v26 = vadd.f32 %v3844_v23, %v3826_v1  ;;  %v9947_v23 = vld [vmem:[#allocation24_spill] sm:$0xff] }
 0x4a8   : > { %v5858_v8 = vpop.f32.mrb[32].mxu1 }
 0x4a9   : > { %v3739_v2 = vpop.f32.mrb[33].mxu1  ;;  %v8469_v63 = vmul.f32 %v5858_v8, %v9943_v32 }
 0x4aa   : > { %v8466_v27 = vmul.f32 %v3739_v2, %v9942_v34  ;;  %v5859_v45 = vpop.f32.mrb[34].mxu1 }
 0x4ab   : > { %v3742_v21 = vpop.f32.mrb[35].mxu1  ;;  %v8478_v58 = vmul.f32 %v5859_v45, %v9945_v6  ;;  %v3829_v5 = vmul.f32 %v8469_v63, %v8469_v63 }
 0x4ac   : > { %v3801_v41 = vadd.f32 %v3800_v55, %v8466_v27  ;;  %v3827_v20 = vmul.f32 %v8466_v27, %v8466_v27  ;;  %v8475_v17 = vmul.f32 %v3742_v21, %v9944_v19  ;;  %v9948_v21 = vld [vmem:[#allocation23_spill] sm:$0xff] }
 0x4ad   : > { %v3830_v48 = vmul.f32 %v8478_v58, %v8478_v58 }
 0x4ae   : > { %v3846_v33 = vadd.f32 %v3845_v26, %v3827_v20  ;;  %v3802_v43 = vadd.f32 %v3801_v41, %v8475_v17  ;;  %v3828_v13 = vmul.f32 %v8475_v17, %v8475_v17  ;;  %v4048_v20 = vld [vmem:[#allocation3] sm:$0xf8] }
 0x4b0   : > { %v3803_v50 = vadd.f32 %v3802_v43, %v8469_v63  ;;  %v3847_v56 = vadd.f32 %v3846_v33, %v3828_v13  ;;  %v5862_v36 = vpop.f32.mrb[36].mxu1  ;;  %v9949_v43 = vld [vmem:[#allocation25_spill] sm:$0xff] }
 0x4b1   : > { %v3755_v31 = vpop.f32.mrb[37].mxu1  ;;  %v8493_v55 = vmul.f32 %v5862_v36, %v9947_v23 }
 0x4b2   : > { %v3848_v9 = vadd.f32 %v3847_v56, %v3829_v5  ;;  %v8489_v29 = vmul.f32 %v3755_v31, %v9946_v4  ;;  %v3804_v52 = vadd.f32 %v3803_v50, %v8478_v58  ;;  %v5863_v1 = vpop.f32.mrb[38].mxu1  ;;  %v4059_v56 = vsel %vm6352_vm5, %v4048_v20, 0 }
 0x4b3   : > { %v3758_v26 = vpop.f32.mrb[39].mxu1  ;;  %v8502_v13 = vmul.f32 %v5863_v1, %v9949_v43  ;;  %v3833_v36 = vmul.f32 %v8493_v55, %v8493_v55  ;;  %v4075_v20 = vshll.u32 %v4059_v56, 16 }
 0x4b4   : > { %v3805_v8 = vadd.f32 %v3804_v52, %v8489_v29  ;;  %v3831_v2 = vmul.f32 %v8489_v29, %v8489_v29  ;;  %v3849_v45 = vadd.f32 %v3848_v9, %v3830_v48  ;;  %v8499_v41 = vmul.f32 %v3758_v26, %v9948_v21 }
 0x4b5   : > { %v3834_v9 = vmul.f32 %v8502_v13, %v8502_v13  ;;  %v4072_v26 = vshrl.u32 %v4059_v56, 16 }
 0x4b6   : > { %v3850_v33 = vadd.f32 %v3849_v45, %v3831_v2  ;;  %v3806_v5 = vadd.f32 %v3805_v8, %v8499_v41  ;;  %v3832_v50 = vmul.f32 %v8499_v41, %v8499_v41 }
 0x4b7   : > { %v8515_v7 = vrot.slane %v4072_v26, 7 }
 0x4b8   : > { %v3807_v31 = vadd.f32 %v3806_v5, %v8493_v55  ;;  %v3851_v48 = vadd.f32 %v3850_v33, %v3832_v50  ;;  %v4070_v5 = vld [vmem:[#allocation3] sm:$0xf0] }
 0x4b9   : > { %9950 = vst [vmem:[#allocation27_spill] sm:$0xff] %v8515_v7  ;;  %v4077_v33 = vor.u32 %v4075_v20, %v8515_v7 }
 0x4ba   : > { %v3808_v52 = vadd.f32 %v3807_v31, %v8502_v13  ;;  %v3852_v1 = vadd.f32 %v3851_v48, %v3833_v36 }
 0x4bb   : > { %v4169_v36 = vsel %vm6445_vm4, %v4070_v5, %v4077_v33 }
 0x4bc   : > { %v3809_v8 = vrot.slane %v3808_v52, 4  ;;  %v3853_v2 = vadd.f32 %v3852_v1, %v3834_v9 }
 0x4be   : > { %v3810_v45 = vadd.f32 %v3809_v8, %v3808_v52  ;;  %v3854_v53 = vrot.slane %v3853_v2, 4  ;;  %v4182_v52 = vshrl.u32 %v4169_v36, 16 }
 0x4c0   : > { %v3811_v22 = vrot.slane %v3810_v45, 2  ;;  %v3855_v57 = vadd.f32 %v3854_v53, %v3853_v2  ;;  %v8552_v2 = vrot.slane %v4182_v52, 7 }
 0x4c2   : > { %v3812_v30 = vadd.f32 %v3811_v22, %v3810_v45  ;;  %v3856_v10 = vrot.slane %v3855_v57, 2  ;;  %9951 = vst [vmem:[#allocation29_spill] sm:$0xff] %v8552_v2 }
 0x4c4   : > { %v3813_v50 = vrot.slane %v3812_v30, 1  ;;  %v3857_v15 = vadd.f32 %v3856_v10, %v3855_v57 }
 0x4c6   : > { %v3814_v40 = vadd.f32 %v3813_v50, %v3812_v30  ;;  %v3858_v31 = vrot.slane %v3857_v15, 1 }
 0x4c8   : > { %v3859_v48 = vadd.f32 %v3858_v31, %v3857_v15  ;;  %v8520_v9 = vmul.f32 0.015625, %v3814_v40 }
 0x4ca   : > { %v3861_v1 = vmul.f32 0.015625, %v3859_v48  ;;  %v3862_v53 = vmul.f32 %v8520_v9, %v8520_v9  ;;  %v3871_v22 = vsub.f32 %v8406_v39, %v8520_v9  ;;  %v3872_v56 = vsub.f32 %v8415_v37, %v8520_v9 }
 0x4cb   : > { %v3873_v10 = vsub.f32 %v8442_v3, %v8520_v9  ;;  %v3874_v30 = vsub.f32 %v8451_v0, %v8520_v9  ;;  %v3875_v40 = vsub.f32 %v8445_v24, %v8520_v9  ;;  %v3876_v15 = vsub.f32 %v8454_v28, %v8520_v9 }
 0x4cc   : > { %v3863_v57 = vsub.f32 %v3861_v1, %v3862_v53  ;;  %v3877_v26 = vsub.f32 %v8466_v27, %v8520_v9  ;;  %v3878_v39 = vsub.f32 %v8475_v17, %v8520_v9  ;;  %v3879_v37 = vsub.f32 %v8469_v63, %v8520_v9 }
 0x4cd   : > { %v3880_v3 = vsub.f32 %v8478_v58, %v8520_v9  ;;  %v3881_v0 = vsub.f32 %v8489_v29, %v8520_v9  ;;  %v3882_v24 = vsub.f32 %v8499_v41, %v8520_v9  ;;  %v3883_v28 = vsub.f32 %v8493_v55, %v8520_v9 }
 0x4ce   : > { %v3864_v8 = vmax.f32 %v3863_v57, 0.0  ;;  %v3884_v27 = vsub.f32 %v8502_v13, %v8520_v9  ;;  %v4185_v63 = vshll.u32 %v4169_v36, 16  ;;  %v3865_v41 = vsub.f32 %v8373_v47, %v8520_v9 }
 0x4cf   : > { %v3866_v55 = vsub.f32 %v8370_v46, %v8520_v9 }
 0x4d0   : > { %v3885_v17 = vadd.f32 1e-05, %v3864_v8  ;;  %v4187_v58 = vor.u32 %v4185_v63, %v8552_v2 }
 0x4d2   : > { %5985 = vrsqrt.f32 %v3885_v17  ;;  %v4279_v29 = vsel %vm6599_vm2, %v4070_v5, %v4187_v58 }
 0x4d3   : > { %v8561_v45 = vrot.slane %v4279_v29, 1 }
 0x4d5   : > { %9952 = vst [vmem:[#allocation28_spill] sm:$0xff] %v8561_v45 }
 0x4dc   : > { %v8563_v20 = vpop.eup %5985 }
 0x4dd   : > { %v3893_v47 = vmul.f32 %v8563_v20, %v3871_v22  ;;  %v3894_v46 = vmul.f32 %v8563_v20, %v3872_v56  ;;  %v3895_v31 = vmul.f32 %v8563_v20, %v3873_v10  ;;  %v3896_v36 = vmul.f32 %v8563_v20, %v3874_v30 }
 0x4de   : > { %v3897_v48 = vmul.f32 %v8563_v20, %v3875_v40  ;;  %v3898_v52 = vmul.f32 %v8563_v20, %v3876_v15  ;;  %v3899_v1 = vmul.f32 %v8563_v20, %v3877_v26  ;;  %v3900_v53 = vmul.f32 %v8563_v20, %v3878_v39 }
 0x4df   : > { %v3901_v57 = vmul.f32 %v8563_v20, %v3879_v37  ;;  %v3902_v8 = vmul.f32 %v8563_v20, %v3880_v3  ;;  %v3903_v22 = vmul.f32 %v8563_v20, %v3881_v0  ;;  %v3904_v56 = vmul.f32 %v8563_v20, %v3882_v24 }
 0x4e0   : > { %v3905_v10 = vmul.f32 %v8563_v20, %v3883_v28  ;;  %v3906_v30 = vmul.f32 %v8563_v20, %v3884_v27  ;;  %vm3913_vm11 = vcmp.ge.f32.partialorder %v3893_v47, 0.0  ;;  %vm3914_vm14 = vcmp.ge.f32.partialorder %v3894_v46, 0.0 }
 0x4e1   : > { %vm3915_vm0 = vcmp.ge.f32.partialorder %v3895_v31, 0.0  ;;  %vm3916_vm3 = vcmp.ge.f32.partialorder %v3896_v36, 0.0  ;;  %vm3917_vm13 = vcmp.ge.f32.partialorder %v3897_v48, 0.0  ;;  %vm3918_vm1 = vcmp.ge.f32.partialorder %v3898_v52, 0.0 }
 0x4e2   : > { %vm3919_vm10 = vcmp.ge.f32.partialorder %v3899_v1, 0.0  ;;  %vm3920_vm15 = vcmp.ge.f32.partialorder %v3900_v53, 0.0  ;;  %vm3921_vm9 = vcmp.ge.f32.partialorder %v3901_v57, 0.0  ;;  %vm3922_vm12 = vcmp.ge.f32.partialorder %v3902_v8, 0.0 }
 0x4e3   : > { %vm3923_vm8 = vcmp.ge.f32.partialorder %v3903_v22, 0.0  ;;  %vm3924_vm7 = vcmp.ge.f32.partialorder %v3904_v56, 0.0  ;;  %vm3925_vm6 = vcmp.ge.f32.partialorder %v3905_v10, 0.0  ;;  %vm3926_vm2 = vcmp.ge.f32.partialorder %v3906_v30, 0.0 }
 0x4e4   : > { %v3933_v40 = vmul.f32 0.01, %v3893_v47  ;;  %v3934_v15 = vmul.f32 0.01, %v3894_v46  ;;  %v3935_v26 = vmul.f32 0.01, %v3895_v31  ;;  %v8588_v39 = vmul.f32 %v8563_v20, %v3865_v41 }
 0x4e5   : > { %v3936_v37 = vmul.f32 0.01, %v3896_v36  ;;  %v3937_v3 = vmul.f32 0.01, %v3897_v48  ;;  %v3938_v0 = vmul.f32 0.01, %v3898_v52  ;;  %v8591_v24 = vmul.f32 %v8563_v20, %v3866_v55 }
 0x4e6   : > { %v3939_v28 = vmul.f32 0.01, %v3899_v1  ;;  %v3940_v27 = vmul.f32 0.01, %v3900_v53  ;;  %v3941_v17 = vmul.f32 0.01, %v3901_v57  ;;  %v3953_v63 = vsel %vm3913_vm11, %v3893_v47, %v3933_v40 }
 0x4e7   : > { %v3942_v58 = vmul.f32 0.01, %v3902_v8  ;;  %v3943_v29 = vmul.f32 0.01, %v3903_v22  ;;  %v3944_v5 = vmul.f32 0.01, %v3904_v56  ;;  %v3954_v50 = vsel %vm3914_vm14, %v3894_v46, %v3934_v15 }
 0x4e8   : > { %v3945_v33 = vmul.f32 0.01, %v3905_v10  ;;  %v3946_v13 = vmul.f32 0.01, %v3906_v30  ;;  %v3955_v41 = vsel %vm3915_vm0, %v3895_v31, %v3935_v26  ;;  %v3956_v45 = vsel %vm3916_vm3, %v3896_v36, %v3936_v37 }
 0x4e9   : > { %v3957_v2 = vsel %vm3917_vm13, %v3897_v48, %v3937_v3  ;;  %v3958_v55 = vsel %vm3918_vm1, %v3898_v52, %v3938_v0  ;;  %v3959_v59 = vsel %vm3919_vm10, %v3899_v1, %v3939_v28  ;;  %v3960_v7 = vsel %vm3920_vm15, %v3900_v53, %v3940_v27 }
 0x4ea   : > { %v3961_v47 = vsel %vm3921_vm9, %v3901_v57, %v3941_v17  ;;  %v3962_v40 = vsel %vm3922_vm12, %v3902_v8, %v3942_v58  ;;  %v3963_v46 = vsel %vm3923_vm8, %v3903_v22, %v3943_v29  ;;  %v3964_v15 = vsel %vm3924_vm7, %v3904_v56, %v3944_v5 }
 0x4eb   : > { %v3965_v31 = vsel %vm3925_vm6, %v3905_v10, %v3945_v33  ;;  %v3966_v36 = vsel %vm3926_vm2, %v3906_v30, %v3946_v13  ;;  %v3973_v48 = vmul.f32 %v3953_v63, %v9844_v51  ;;  %v3974_v52 = vmul.f32 %v3954_v50, %v9845_v35 }
 0x4ec   : > { %v3975_v1 = vmul.f32 %v3955_v41, %v9846_v62  ;;  %v3976_v53 = vmul.f32 %v3956_v45, %v9847_v61  ;;  %v3977_v57 = vmul.f32 %v3957_v2, %v6234_v14  ;;  %v3978_v8 = vmul.f32 %v3958_v55, %v9941_v25 }
 0x4ed   : > { %v3979_v22 = vmul.f32 %v3959_v59, %v9942_v34  ;;  %v3980_v5 = vmul.f32 %v3960_v7, %v9944_v19  ;;  %v3981_v33 = vmul.f32 %v3961_v47, %v9943_v32  ;;  %v3982_v13 = vmul.f32 %v3962_v40, %v9945_v6 }
 0x4ee   : > { %v3983_v56 = vmul.f32 %v3963_v46, %v9946_v4  ;;  %v3984_v50 = vmul.f32 %v3964_v15, %v9948_v21  ;;  %v3985_v10 = vmul.f32 %v3965_v31, %v9947_v23  ;;  %v3986_v45 = vmul.f32 %v3966_v36, %v9949_v43 }
 0x4ef   : > { %v3990_v30 = vpack.c.bf16 %v3974_v52, %v3973_v48  ;;  %v3991_v2 = vpack.c.bf16 %v3976_v53, %v3975_v1  ;;  %v3992_v26 = vpack.c.bf16 %v3978_v8, %v3977_v57  ;;  %v3993_v37 = vpack.c.bf16 %v3980_v5, %v3979_v22 }
 0x4f0   : > { %v3994_v3 = vpack.c.bf16 %v3982_v13, %v3981_v33  ;;  %v3995_v59 = vpack.c.bf16 %v3984_v50, %v3983_v56  ;;  %v3996_v0 = vpack.c.bf16 %v3986_v45, %v3985_v10  ;;  %v9953_v7 = vsub.f32 %v8378_v38, %v8520_v9 }
 0x4f1   : > { %v8625_v27 = vrot.slane %v3990_v30, 4  ;;  %v4014_v17 = vrot.slane %v3991_v2, 4  ;;  %v4016_v63 = vrot.slane %v3992_v26, 4  ;;  %v4018_v58 = vrot.slane %v3993_v37, 4  ;;  %v9963_v37 = vld [vmem:[#allocation8_spill] sm:$0xff] }
 0x4f2   : > { %v3889_v28 = vmul.f32 %v8563_v20, %v9953_v7  ;;  %v4020_v29 = vrot.slane %v3994_v3, 4  ;;  %v4022_v41 = vrot.slane %v3995_v59, 4  ;;  %v4024_v55 = vrot.slane %v3996_v0, 4  ;;  %v9964_v3 = vld [vmem:[#allocation9_spill] sm:$0xff] }
 0x4f3   : > { %v9954_v47 = vsub.f32 %v8387_v44, %v8520_v9  ;;  %vm9955_vm2 = vcmask 1043456   ;;  %v9958_v31 = vsub.f32 %v8400_v42, %v8520_v9  ;;  %v9962_v1 = vsub.f32 %v8412_v18, %v8520_v9 }
 0x4f4   : > { %v8633_v46 = vsel %vm9955_vm2, %v8625_v27, %v4014_v17  ;;  %vm9956_vm6 = vmmov %vm9955_vm2  ;;  %4047 = vst [vmem:[#allocation3 + $0x58] sm:$0xf] %v4024_v55  ;;  %vm3907_vm15 = vcmp.ge.f32.partialorder %v8588_v39, 0.0  ;;  %vm3908_vm11 = vcmp.ge.f32.partialorder %v8591_v24, 0.0  ;;  %vm3909_vm14 = vcmp.ge.f32.partialorder %v3889_v28, 0.0 }
 0x4f5   : > { %v3890_v40 = vmul.f32 %v8563_v20, %v9954_v47  ;;  %v8636_v38 = vsel %vm9956_vm6, %v4014_v17, %v4016_v63  ;;  %vm9957_vm7 = vmmov %vm9955_vm2  ;;  %v3891_v36 = vmul.f32 %v8563_v20, %v9958_v31  ;;  %4041 = vst [vmem:[#allocation3 + $0x28] sm:$0xff] %v8633_v46  ;;  %v3892_v42 = vmul.f32 %v8563_v20, %v9962_v1 }
 0x4f6   : > { %v8639_v15 = vsel %vm9957_vm7, %v4016_v63, %v4018_v58  ;;  %vm9959_vm8 = vmmov %vm9955_vm2  ;;  %v3927_v53 = vmul.f32 0.01, %v8588_v39  ;;  %v3928_v57 = vmul.f32 0.01, %v8591_v24  ;;  %v3929_v18 = vmul.f32 0.01, %v3889_v28 }
 0x4f7   : > { %v8646_v48 = vsel %vm9959_vm8, %v4018_v58, %v4020_v29  ;;  %vm9960_vm12 = vmmov %vm9955_vm2  ;;  %4043 = vst [vmem:[#allocation3 + $0x38] sm:$0xff] %v8639_v15  ;;  %vm3910_vm0 = vcmp.ge.f32.partialorder %v3890_v40, 0.0  ;;  %vm3911_vm3 = vcmp.ge.f32.partialorder %v3891_v36, 0.0  ;;  %vm3912_vm13 = vcmp.ge.f32.partialorder %v3892_v42, 0.0 }
 0x4f8   : > { %v8649_v44 = vsel %vm9960_vm12, %v4020_v29, %v4022_v41  ;;  %vm9961_vm9 = vmmov %vm9955_vm2  ;;  %4044 = vst [vmem:[#allocation3 + $0x40] sm:$0xff] %v8646_v48  ;;  %v3930_v9 = vmul.f32 0.01, %v3890_v40  ;;  %v3931_v20 = vmul.f32 0.01, %v3891_v36  ;;  %v3947_v22 = vsel %vm3907_vm15, %v8588_v39, %v3927_v53 }
 0x4f9   : > { %v4025_v52 = vsel %vm9961_vm9, %v4022_v41, %v4024_v55  ;;  %4045 = vst [vmem:[#allocation3 + $0x48] sm:$0xff] %v8649_v44  ;;  %v3932_v8 = vmul.f32 0.01, %v3892_v42  ;;  %v3948_v5 = vsel %vm3908_vm11, %v8591_v24, %v3928_v57  ;;  %v4064_v33 = vsel %vm6352_vm5, %v8633_v46, 0  ;;  %vm9965_vm1 = vmmov %vm9955_vm2 }
 0x4fa   : > { %4046 = vst [vmem:[#allocation3 + $0x50] sm:$0xff] %v4025_v52  ;;  %v3949_v13 = vsel %vm3909_vm14, %v3889_v28, %v3929_v18  ;;  %v3950_v56 = vsel %vm3910_vm0, %v3890_v40, %v3930_v9  ;;  %v3951_v50 = vsel %vm3911_vm3, %v3891_v36, %v3931_v20  ;;  %v3967_v10 = vmul.f32 %v3947_v22, %v9828_v11  ;;  %vm9966_vm10 = vmmov %vm9965_vm1 }
 0x4fb   : > { %v3952_v45 = vsel %vm3912_vm13, %v3892_v42, %v3932_v8  ;;  %v3968_v30 = vmul.f32 %v3948_v5, %v9830_v49  ;;  %v3969_v2 = vmul.f32 %v3949_v13, %v9831_v54  ;;  %v3970_v26 = vmul.f32 %v3950_v56, %v9832_v12  ;;  %vm9967_vm2 = vmmov %vm9965_vm1 }
 0x4fc   : > { %v3971_v39 = vmul.f32 %v3951_v50, %v9963_v37  ;;  %v3972_v24 = vmul.f32 %v3952_v45, %v9964_v3  ;;  %v4065_v59 = vsel %vm6352_vm5, %v8636_v38, 0  ;;  %v4066_v0 = vsel %vm6352_vm5, %v8639_v15, 0 }
 0x4fd   : > { %v3987_v7 = vpack.c.bf16 %v3968_v30, %v3967_v10  ;;  %v3988_v28 = vpack.c.bf16 %v3970_v26, %v3969_v2  ;;  %v4067_v63 = vsel %vm6352_vm5, %v8646_v48, 0  ;;  %v4068_v58 = vsel %vm6352_vm5, %v8649_v44, 0 }
 0x4fe   : > { %v3989_v29 = vpack.c.bf16 %v3972_v24, %v3971_v39  ;;  %v4111_v55 = vshrl.u32 %v4064_v33, 16  ;;  %v4114_v47 = vshll.u32 %v4064_v33, 16  ;;  %v4119_v36 = vshrl.u32 %v4065_v59, 16 }
 0x4ff   : > { %v4007_v40 = vrot.slane %v3987_v7, 4  ;;  %v4008_v31 = vrot.slane %v3988_v28, 4  ;;  %v4122_v52 = vshll.u32 %v4065_v59, 16  ;;  %v4127_v53 = vshrl.u32 %v4066_v0, 16 }
 0x500   : > { %v4010_v1 = vrot.slane %v3989_v29, 4  ;;  %v4113_v42 = vrot.slane %v4111_v55, 7  ;;  %v4130_v57 = vshll.u32 %v4066_v0, 16  ;;  %v4121_v9 = vrot.slane %v4119_v36, 7 }
 0x501   : > { %v8681_v17 = vld [vmem:[#allocation3 + $0x50] sm:$0xf]  ;;  %v8695_v18 = vsel %vm9965_vm1, %v4007_v40, %v4008_v31  ;;  %4037 = vst [vmem:[#allocation3 + $0x8] sm:$0xf0] %v4007_v40  ;;  %v4135_v20 = vshrl.u32 %v4067_v63, 16  ;;  %v4138_v8 = vshll.u32 %v4067_v63, 16 }
 0x502   : > { %v8692_v41 = vsel %vm6352_vm5, %v8681_v17, 0  ;;  %v8698_v22 = vsel %vm9966_vm10, %v4008_v31, %v4010_v1  ;;  %v8702_v5 = vsel %vm9967_vm2, %v4010_v1, %v8625_v27  ;;  %4038 = vst [vmem:[#allocation3 + $0x10] sm:$0xff] %v8695_v18  ;;  %v4061_v33 = vsel %vm6352_vm5, %v8695_v18, 0 }
 0x503   : > { %v4116_v13 = vor.u32 %v4114_v47, %v4113_v42  ;;  %v4062_v56 = vsel %vm6352_vm5, %v8698_v22, 0  ;;  %v4063_v50 = vsel %vm6352_vm5, %v8702_v5, 0  ;;  %v4087_v10 = vshrl.u32 %v4061_v33, 16 }
 0x504   : > { %v4090_v45 = vshll.u32 %v4061_v33, 16  ;;  %v4095_v30 = vshrl.u32 %v4062_v56, 16  ;;  %v4098_v27 = vshll.u32 %v4062_v56, 16  ;;  %v4103_v2 = vshrl.u32 %v4063_v50, 16 }
 0x505   : > { %v4106_v26 = vshll.u32 %v4063_v50, 16  ;;  %v4089_v39 = vrot.slane %v4087_v10, 7  ;;  %v4124_v24 = vor.u32 %v4122_v52, %v4121_v9  ;;  %v4129_v59 = vrot.slane %v4127_v53, 7 }
 0x506   : > { %v4137_v0 = vrot.slane %v4135_v20, 7  ;;  %v4097_v7 = vrot.slane %v4095_v30, 7  ;;  %v4105_v28 = vrot.slane %v4103_v2, 7  ;;  %v4143_v63 = vshrl.u32 %v4068_v58, 16 }
 0x507   : > { %v4146_v29 = vshll.u32 %v4068_v58, 16  ;;  %v4092_v55 = vor.u32 %v4090_v45, %v4089_v39  ;;  %vm9968_vm6 = vsmask.f32 256  ;;  %v4132_v40 = vor.u32 %v4130_v57, %v4129_v59 }
 0x508   : > { %v4125_v47 = vsel %vm9968_vm6, %v4113_v42, %v4124_v24  ;;  %v4140_v31 = vor.u32 %v4138_v8, %v4137_v0  ;;  %v8715_v36 = vld [vmem:[#allocation3 + $0x8] sm:$0xff]  ;;  %v4100_v1 = vor.u32 %v4098_v27, %v4097_v7  ;;  %v4108_v33 = vor.u32 %v4106_v26, %v4105_v28  ;;  %vm9969_vm7 = vmmov %vm9968_vm6 }
 0x509   : > { %v4117_v56 = vsel %vm9969_vm7, %v4105_v28, %v4116_v13  ;;  %v4145_v50 = vrot.slane %v4143_v63, 7  ;;  %v4060_v52 = vsel %vm6352_vm5, %v8715_v36, 0  ;;  %vm9970_vm8 = vmmov %vm9968_vm6  ;;  %v4151_v20 = vshrl.u32 %v8692_v41, 16  ;;  %v4567_v43 = vld [vmem:[#allocation3 + $0x10] sm:$0xf8] }
 0x50a   : > { %v4133_v53 = vsel %vm9970_vm8, %v4121_v9, %v4132_v40  ;;  %vm9971_vm12 = vmmov %vm9968_vm6  ;;  %v4079_v42 = vshrl.u32 %v4060_v52, 16  ;;  %v4082_v57 = vshll.u32 %v4060_v52, 16 }
 0x50b   : > { %v4141_v58 = vsel %vm9971_vm12, %v4129_v59, %v4140_v31  ;;  %vm9972_vm9 = vmmov %vm9968_vm6  ;;  %v4148_v45 = vor.u32 %v4146_v29, %v4145_v50  ;;  %v4153_v9 = vrot.slane %v4151_v20, 7 }
 0x50c   : > { %v4101_v8 = vsel %vm9972_vm9, %v4089_v39, %v4100_v1  ;;  %vm9973_vm15 = vmmov %vm9968_vm6  ;;  %v4081_v30 = vrot.slane %v4079_v42, 7  ;;  %v4154_v39 = vshll.u32 %v8692_v41, 16  ;;  %v4176_v41 = vsel %vm6445_vm4, %v8639_v15, %v4133_v53 }
 0x50d   : > { %v4109_v10 = vsel %vm9973_vm15, %v4097_v7, %v4108_v33  ;;  %v4172_v13 = vsel %vm6445_vm4, %v8698_v22, %v4101_v8  ;;  %vm9974_vm5 = vmmov %vm9968_vm6  ;;  %v4174_v7 = vsel %vm6445_vm4, %v8633_v46, %v4117_v56  ;;  %v9976_v33 = vld [vmem:[#allocation27_spill] sm:$0xff]  ;;  %vm9986_vm6 = vcmask 1046528  }
 0x50e   : > { %v4173_v16 = vsel %vm6445_vm4, %v8702_v5, %v4109_v10  ;;  %v4205_v27 = vshrl.u32 %v4172_v13, 16  ;;  %v4208_v2 = vshll.u32 %v4172_v13, 16  ;;  %v4149_v59 = vsel %vm9974_vm5, %v4137_v0, %v4148_v45  ;;  %vm9975_vm11 = vmmov %vm9974_vm5 }
 0x50f   : > { %v4213_v26 = vshrl.u32 %v4173_v16, 16  ;;  %v4216_v24 = vshll.u32 %v4173_v16, 16  ;;  %v4084_v28 = vor.u32 %v4082_v57, %v4081_v30  ;;  %v4093_v63 = vsel %vm9975_vm11, %v4081_v30, %v4092_v55  ;;  %vm9977_vm14 = vmmov %vm9974_vm5 }
 0x510   : > { %v4207_v40 = vrot.slane %v4205_v27, 7  ;;  %v4171_v29 = vsel %vm6445_vm4, %v8695_v18, %v4093_v63  ;;  %v4156_v1 = vor.u32 %v4154_v39, %v4153_v9  ;;  %v4175_v0 = vsel %vm6445_vm4, %v8636_v38, %v4125_v47  ;;  %vm9978_vm0 = vmmov %vm9974_vm5 }
 0x511   : > { %v4215_v31 = vrot.slane %v4213_v26, 7  ;;  %v4085_v56 = vsel %vm9977_vm14, %v9976_v33, %v4084_v28  ;;  %v4197_v52 = vshrl.u32 %v4171_v29, 16  ;;  %v4200_v55 = vshll.u32 %v4171_v29, 16  ;;  %vm9979_vm3 = vmmov %vm9978_vm0 }
 0x512   : > { %v4210_v20 = vor.u32 %v4208_v2, %v4207_v40  ;;  %v4170_v42 = vsel %vm6445_vm4, %v8715_v36, %v4085_v56  ;;  %v8753_v8 = vsel %vm9978_vm0, %v4145_v50, %v4156_v1  ;;  %v4177_v47 = vsel %vm6445_vm4, %v8646_v48, %v4141_v58  ;;  %vm9980_vm13 = vmmov %vm9978_vm0 }
 0x513   : > { %v4218_v57 = vor.u32 %v4216_v24, %v4215_v31  ;;  %v4189_v10 = vshrl.u32 %v4170_v42, 16  ;;  %v4192_v53 = vshll.u32 %v4170_v42, 16  ;;  %v4199_v13 = vrot.slane %v4197_v52, 7  ;;  %v9981_v24 = vld [vmem:[#allocation41_spill] sm:$0xff]  ;;  %vm9983_vm10 = vmmov %vm9978_vm0 }
 0x514   : > { %v4178_v16 = vsel %vm6445_vm4, %v8649_v44, %v4149_v59  ;;  %v4221_v9 = vshrl.u32 %v4174_v7, 16  ;;  %v4224_v30 = vshll.u32 %v4174_v7, 16  ;;  %v4229_v27 = vshrl.u32 %v4175_v0, 16  ;;  %vm9985_vm2 = vmmov %vm9978_vm0 }
 0x515   : > { %v4219_v45 = vsel %vm9979_vm3, %v4207_v40, %v4218_v57  ;;  %v4191_v2 = vrot.slane %v4189_v10, 7  ;;  %v4202_v26 = vor.u32 %v4200_v55, %v4199_v13  ;;  %v4211_v50 = vsel %vm9980_vm13, %v4199_v13, %v4210_v20  ;;  %v9984_v20 = vld [vmem:[#allocation29_spill] sm:$0xff]  ;;  %vm9987_vm7 = vmmov %vm9978_vm0 }
 0x516   : > { %vm9982_vm1 = vnez %v9981_v24  ;;  %v4223_v59 = vrot.slane %v4221_v9, 7  ;;  %v4231_v63 = vrot.slane %v4229_v27, 7  ;;  %v4232_v1 = vshll.u32 %v4175_v0, 16  ;;  %vm9988_vm8 = vmmov %vm9986_vm6 }
 0x517   : > { %v4283_v58 = vsel %vm9982_vm1, %v8702_v5, %v4219_v45  ;;  %v4282_v39 = vsel %vm9982_vm1, %v8698_v22, %v4211_v50  ;;  %v4194_v40 = vor.u32 %v4192_v53, %v4191_v2  ;;  %v4203_v7 = vsel %vm9983_vm10, %v4191_v2, %v4202_v26  ;;  %vm9989_vm12 = vmmov %vm9978_vm0  ;;  %v9990_v26 = vld [vmem:[#allocation30_spill] sm:$0xff] }
 0x518   : > { %v8769_v28 = vrot.slane %v4283_v58, 1  ;;  %v4309_v29 = vrot.slane %v4282_v39, 1  ;;  %v4281_v33 = vsel %vm9982_vm1, %v8695_v18, %v4203_v7  ;;  %v4226_v56 = vor.u32 %v4224_v30, %v4223_v59  ;;  %v4290_v7 = vld [vmem:[#allocation3 + $0x8] sm:$0xf8]  ;;  %vm9993_vm15 = vmmov %vm9986_vm6 }
 0x519   : > { %v4237_v52 = vshrl.u32 %v4176_v41, 16  ;;  %v4240_v55 = vshll.u32 %v4176_v41, 16  ;;  %v4195_v42 = vsel %vm9985_vm2, %v9984_v20, %v4194_v40  ;;  %v4307_v57 = vrot.slane %v4281_v33, 1  ;;  %vm9994_vm5 = vmmov %vm9986_vm6 }
 0x51a   : > { %v8779_v10 = vsel %vm9986_vm6, %v4309_v29, %v8769_v28  ;;  %v4234_v53 = vor.u32 %v4232_v1, %v4231_v63  ;;  %v4280_v0 = vsel %vm9982_vm1, %v8715_v36, %v4195_v42  ;;  %v4227_v13 = vsel %vm9987_vm7, %v4215_v31, %v4226_v56  ;;  %v9992_v1 = vld [vmem:[#allocation28_spill] sm:$0xff]  ;;  %vm9995_vm11 = vmmov %vm9978_vm0 }
 0x51b   : > { %v4239_v45 = vrot.slane %v4237_v52, 7  ;;  %v4245_v9 = vshrl.u32 %v4177_v47, 16  ;;  %v4305_v30 = vrot.slane %v4280_v0, 1  ;;  %v4310_v41 = vsel %vm9988_vm8, %v4307_v57, %v4309_v29  ;;  %vm9996_vm14 = vmmov %vm9978_vm0 }
 0x51c   : > { %v4235_v27 = vsel %vm9989_vm12, %v4223_v59, %v4234_v53  ;;  %v4248_v2 = vshll.u32 %v4177_v47, 16  ;;  %vm9991_vm9 = vnez %v9990_v26  ;;  %v4253_v40 = vshrl.u32 %v4178_v16, 16  ;;  %vm9997_vm3 = vmmov %vm9978_vm0 }
 0x51d   : > { %v4338_v50 = vsel %vm9991_vm9, %v8698_v22, %v4310_v41  ;;  %v4242_v58 = vor.u32 %v4240_v55, %v4239_v45  ;;  %v4247_v39 = vrot.slane %v4245_v9, 7  ;;  %v4306_v36 = vsel %vm9993_vm15, %v9992_v1, %v4305_v30  ;;  %vm9998_vm13 = vmmov %vm9978_vm0 }
 0x51e   : > { %v4308_v31 = vsel %vm9994_vm5, %v4305_v30, %v4307_v57  ;;  %v4364_v33 = vshrl.u32 %v4338_v50, 16  ;;  %v4367_v56 = vshll.u32 %v4338_v50, 16  ;;  %v4336_v29 = vsel %vm9991_vm9, %v4290_v7, %v4306_v36  ;;  %vm10001_vm2 = vmmov %vm9994_vm5 }
 0x51f   : > { %v4337_v47 = vsel %vm9991_vm9, %v8695_v18, %v4308_v31  ;;  %v4243_v59 = vsel %vm9995_vm11, %v4231_v63, %v4242_v58  ;;  %v4250_v52 = vor.u32 %v4248_v2, %v4247_v39  ;;  %v4349_v55 = vshrl.u32 %v4336_v29, 16  ;;  %v4347_v31 = vld [vmem:[#allocation3 + $0x8] sm:$0xf0]  ;;  %vm10002_vm6 = vmmov %vm10001_vm2 }
 0x520   : > { %v4352_v20 = vshll.u32 %v4336_v29, 16  ;;  %v4356_v42 = vshrl.u32 %v4337_v47, 16  ;;  %v4359_v53 = vshll.u32 %v4337_v47, 16  ;;  %v8799_v0 = vrot.slane %v4364_v33, 7  ;;  %vm10003_vm7 = vmmov %vm10001_vm2 }
 0x521   : > { %v4251_v57 = vsel %vm9996_vm14, %v4239_v45, %v4250_v52  ;;  %v8802_v9 = vrot.slane %v4253_v40, 7  ;;  %v4256_v30 = vshll.u32 %v4178_v16, 16  ;;  %v4351_v41 = vrot.slane %v4349_v55, 7  ;;  %v9999_v52 = vld [vmem:[#allocation33_spill] sm:$0xff]  ;;  %vm10004_vm8 = vmmov %vm10001_vm2 }
 0x522   : > { %v4358_v50 = vrot.slane %v4356_v42, 7  ;;  %v4284_v7 = vsel %vm9982_vm1, %v8633_v46, %v4227_v13  ;;  %v4285_v63 = vsel %vm9982_vm1, %v8636_v38, %v4235_v27  ;;  %v4369_v2 = vor.u32 %v4367_v56, %v8799_v0  ;;  %vm10005_vm12 = vmmov %vm10001_vm2 }
 0x523   : > { %v4258_v58 = vor.u32 %v4256_v30, %v8802_v9  ;;  %v4286_v45 = vsel %vm9982_vm1, %v8639_v15, %v4243_v59  ;;  %v4287_v16 = vsel %vm9982_vm1, %v8646_v48, %v4251_v57  ;;  %v4354_v40 = vor.u32 %v4352_v20, %v4351_v41  ;;  %vm10006_vm15 = vmmov %vm9978_vm0 }
 0x524   : > { %v4361_v1 = vor.u32 %v4359_v53, %v4358_v50  ;;  %v4313_v36 = vrot.slane %v4284_v7, 1  ;;  %v4315_v13 = vrot.slane %v4285_v63, 1  ;;  %v4370_v33 = vsel %vm9978_vm0, %v4358_v50, %v4369_v2  ;;  %vm10009_vm11 = vmmov %vm9978_vm0 }
 0x525   : > { %v4259_v27 = vsel %vm9997_vm3, %v4247_v39, %v4258_v58  ;;  %v4317_v56 = vrot.slane %v4286_v45, 1  ;;  %v4319_v29 = vrot.slane %v4287_v16, 1  ;;  %vm10000_vm10 = vnez %v9999_v52  ;;  %vm10010_vm14 = vmmov %vm10001_vm2 }
 0x526   : > { %v4362_v47 = vsel %vm9998_vm13, %v4351_v41, %v4361_v1  ;;  %v4446_v59 = vsel %vm10000_vm10, %v4347_v31, %v4354_v40  ;;  %v4448_v55 = vsel %vm10000_vm10, %v8698_v22, %v4370_v33  ;;  %v4288_v20 = vsel %vm9982_vm1, %v8649_v44, %v4259_v27  ;;  %vm10011_vm0 = vmmov %vm10001_vm2 }
 0x527   : > { %v4447_v42 = vsel %vm10000_vm10, %v8695_v18, %v4362_v47  ;;  %v4459_v39 = vshrl.u32 %v4446_v59, 16  ;;  %v4462_v53 = vshll.u32 %v4446_v59, 16  ;;  %v4474_v57 = vshrl.u32 %v4448_v55, 16  ;;  %vm10014_vm13 = vmmov %vm10009_vm11 }
 0x528   : > { %v4466_v30 = vshrl.u32 %v4447_v42, 16  ;;  %v4469_v41 = vshll.u32 %v4447_v42, 16  ;;  %v4477_v50 = vshll.u32 %v4448_v55, 16  ;;  %v4314_v7 = vsel %vm10001_vm2, %v8769_v28, %v4313_v36  ;;  %vm10015_vm2 = vmmov %vm10009_vm11 }
 0x529   : > { %v4461_v63 = vrot.slane %v4459_v39, 7  ;;  %v8834_v2 = vrot.slane %v4474_v57, 7  ;;  %v4316_v58 = vsel %vm10002_vm6, %v4313_v36, %v4315_v13  ;;  %v4318_v45 = vsel %vm10003_vm7, %v4315_v13, %v4317_v56  ;;  %vm10016_vm6 = vmmov %vm10015_vm2 }
 0x52a   : > { %v4468_v16 = vrot.slane %v4466_v30, 7  ;;  %v4320_v40 = vsel %vm10004_vm8, %v4317_v56, %v4319_v29  ;;  %v8839_v1 = vrot.slane %v4288_v20, 1  ;;  %v4339_v33 = vsel %vm9991_vm9, %v8702_v5, %v8779_v10  ;;  %v10007_v20 = vld [vmem:[#allocation19_spill] sm:$0xff]  ;;  %vm10017_vm7 = vmmov %vm10015_vm2 }
 0x52b   : > { %v4464_v27 = vor.u32 %v4462_v53, %v4461_v63  ;;  %v4479_v28 = vor.u32 %v4477_v50, %v8834_v2  ;;  %v4340_v47 = vsel %vm9991_vm9, %v8633_v46, %v4314_v7  ;;  %v4341_v36 = vsel %vm9991_vm9, %v8636_v38, %v4316_v58  ;;  %vm10018_vm8 = vmmov %vm10015_vm2 }
 0x52c   : > { %v4471_v13 = vor.u32 %v4469_v41, %v4468_v16  ;;  %v4322_v56 = vsel %vm10005_vm12, %v4319_v29, %v8839_v1  ;;  %v4342_v59 = vsel %vm9991_vm9, %v8639_v15, %v4318_v45  ;;  %v4343_v10 = vsel %vm9991_vm9, %v8646_v48, %v4320_v40 }
 0x52d   : > { %v4480_v55 = vsel %vm10006_vm15, %v4468_v16, %v4479_v28  ;;  %vm10008_vm5 = vnez %v10007_v20  ;;  %v4344_v39 = vsel %vm9991_vm9, %v8649_v44, %v4322_v56  ;;  %v4372_v53 = vshrl.u32 %v4339_v33, 16  ;;  %vm10021_vm15 = vmmov %vm10015_vm2 }
 0x52e   : > { %v4556_v42 = vsel %vm10008_vm5, %v4347_v31, %v4464_v27  ;;  %v4472_v29 = vsel %vm10009_vm11, %v4461_v63, %v4471_v13  ;;  %v4558_v57 = vsel %vm10008_vm5, %v8698_v22, %v4480_v55  ;;  %v4375_v41 = vshll.u32 %v4339_v33, 16  ;;  %vm10022_vm11 = vmmov %vm10015_vm2 }
 0x52f   : > { %v4589_v30 = vrot.slane %v4556_v42, 1  ;;  %v4557_v50 = vsel %vm10008_vm5, %v8695_v18, %v4472_v29  ;;  %v8873_v7 = vrot.slane %v4558_v57, 1  ;;  %v4374_v31 = vrot.slane %v4372_v53, 7  ;;  %v10012_v29 = vld [vmem:[#allocation39_spill] sm:$0xff] }
 0x530   : > { %v4380_v58 = vshrl.u32 %v4340_v47, 16  ;;  %v4590_v45 = vrot.slane %v4557_v50, 1  ;;  %v4383_v16 = vshll.u32 %v4340_v47, 16  ;;  %v4388_v40 = vshrl.u32 %v4341_v36, 16 }
 0x531   : > { %v4391_v27 = vshll.u32 %v4341_v36, 16  ;;  %v4377_v28 = vor.u32 %v4375_v41, %v4374_v31  ;;  %v4396_v13 = vshrl.u32 %v4342_v59, 16  ;;  %v4399_v56 = vshll.u32 %v4342_v59, 16 }
 0x532   : > { %v4382_v63 = vrot.slane %v4380_v58, 7  ;;  %v4591_v55 = vsel %vm10010_vm14, %v4589_v30, %v4590_v45  ;;  %v4593_v33 = vsel %vm10011_vm0, %v4590_v45, %v8873_v7  ;;  %v4390_v42 = vrot.slane %v4388_v40, 7  ;;  %vm10025_vm0 = vmmov %vm10015_vm2 }
 0x533   : > { %v4404_v18 = vshrl.u32 %v4343_v10, 16  ;;  %vm10013_vm3 = vnez %v10012_v29  ;;  %v4378_v36 = vsel %vm10014_vm13, %v8799_v0, %v4377_v28  ;;  %v4398_v40 = vrot.slane %v4396_v13, 7  ;;  %v4632_v13 = vld [vmem:[#allocation3 + $0x10] sm:$0xf0]  ;;  %vm10026_vm13 = vmmov %vm10025_vm0 }
 0x534   : > { %v4621_v53 = vsel %vm10013_vm3, %v4567_v43, %v4591_v55  ;;  %v4622_v47 = vsel %vm10013_vm3, %v8698_v22, %v4593_v33  ;;  %v4385_v57 = vor.u32 %v4383_v16, %v4382_v63  ;;  %v4393_v45 = vor.u32 %v4391_v27, %v4390_v42 }
 0x535   : > { %v4634_v59 = vshrl.u32 %v4621_v53, 16  ;;  %v4637_v41 = vshll.u32 %v4621_v53, 16  ;;  %v4641_v50 = vshrl.u32 %v4622_v47, 16  ;;  %v4644_v30 = vshll.u32 %v4622_v47, 16  ;;  %v10019_v53 = vld [vmem:[#allocation36_spill] sm:$0xff] }
 0x536   : > { %v4386_v58 = vsel %vm10015_vm2, %v4374_v31, %v4385_v57  ;;  %v4406_v23 = vrot.slane %v4404_v18, 7  ;;  %v4407_v43 = vshll.u32 %v4343_v10, 16  ;;  %v4412_v55 = vshrl.u32 %v4344_v39, 16  ;;  %vm10027_vm2 = vmmov %vm10025_vm0 }
 0x537   : > { %v4636_v21 = vrot.slane %v4634_v59, 7  ;;  %v8886_v4 = vrot.slane %v4641_v50, 7  ;;  %v4394_v33 = vsel %vm10016_vm6, %v4382_v63, %v4393_v45  ;;  %v4401_v6 = vor.u32 %v4399_v56, %v4398_v40  ;;  %vm10028_vm6 = vmmov %vm10025_vm0 }
 0x538   : > { %v4415_v32 = vshll.u32 %v4344_v39, 16  ;;  %v8892_v0 = vsel %vm10000_vm10, %v8702_v5, %v4378_v36  ;;  %v4409_v27 = vor.u32 %v4407_v43, %v4406_v23  ;;  %v8895_v28 = vrot.slane %v4412_v55, 7 }
 0x539   : > { %v4639_v16 = vor.u32 %v4637_v41, %v4636_v21  ;;  %v4646_v31 = vor.u32 %v4644_v30, %v8886_v4  ;;  %v4402_v18 = vsel %vm10017_vm7, %v4390_v42, %v4401_v6  ;;  %v4450_v10 = vsel %vm10000_vm10, %v8633_v46, %v4386_v58  ;;  %vm10029_vm7 = vmmov %vm10025_vm0 }
 0x53a   : > { %v4451_v39 = vsel %vm10000_vm10, %v8636_v38, %v4394_v33  ;;  %v4482_v63 = vshrl.u32 %v8892_v0, 16  ;;  %vm10020_vm12 = vnez %v10019_v53  ;;  %v4410_v36 = vsel %vm10021_vm15, %v4398_v40, %v4409_v27  ;;  %vm10031_vm15 = vmmov %vm10025_vm0 }
 0x53b   : > { %v4647_v56 = vsel %vm10018_vm8, %v4636_v21, %v4646_v31  ;;  %v4731_v47 = vsel %vm10020_vm12, %v4632_v13, %v4639_v16  ;;  %v4417_v57 = vor.u32 %v4415_v32, %v8895_v28  ;;  %v4452_v41 = vsel %vm10000_vm10, %v8639_v15, %v4402_v18 }
 0x53c   : > { %v4732_v6 = vsel %vm10020_vm12, %v8698_v22, %v4647_v56  ;;  %v4744_v42 = vshrl.u32 %v4731_v47, 16  ;;  %v4747_v59 = vshll.u32 %v4731_v47, 16  ;;  %v4453_v58 = vsel %vm10000_vm10, %v8646_v48, %v4410_v36 }
 0x53d   : > { %v4751_v50 = vshrl.u32 %v4732_v6, 16  ;;  %v4754_v30 = vshll.u32 %v4732_v6, 16  ;;  %v4418_v21 = vsel %vm10022_vm11, %v4406_v23, %v4417_v57  ;;  %v8923_v40 = vrot.slane %v4482_v63, 7 }
 0x53e   : > { %v4746_v45 = vrot.slane %v4744_v42, 7  ;;  %v4454_v32 = vsel %vm10000_vm10, %v8649_v44, %v4418_v21  ;;  %v4490_v43 = vshrl.u32 %v4450_v10, 16  ;;  %v4493_v33 = vshll.u32 %v4450_v10, 16  ;;  %v10023_v42 = vld [vmem:[#allocation51_spill] sm:$0xff] }
 0x53f   : > { %v8925_v55 = vrot.slane %v4751_v50, 7  ;;  %v4498_v16 = vshrl.u32 %v4451_v39, 16  ;;  %v4501_v31 = vshll.u32 %v4451_v39, 16  ;;  %v4506_v23 = vshrl.u32 %v4452_v41, 16 }
 0x540   : > { %v4749_v27 = vor.u32 %v4747_v59, %v4746_v45  ;;  %v4492_v18 = vrot.slane %v4490_v43, 7  ;;  %v4509_v56 = vshll.u32 %v4452_v41, 16  ;;  %v4514_v57 = vshrl.u32 %v4453_v58, 16 }
 0x541   : > { %v4756_v47 = vor.u32 %v4754_v30, %v8925_v55  ;;  %v4500_v36 = vrot.slane %v4498_v16, 7  ;;  %v4517_v6 = vshll.u32 %v4453_v58, 16  ;;  %vm10024_vm14 = vnez %v10023_v42 }
 0x542   : > { %v4841_v21 = vsel %vm10024_vm14, %v4632_v13, %v4749_v27  ;;  %v4495_v63 = vor.u32 %v4493_v33, %v4492_v18  ;;  %v4508_v19 = vrot.slane %v4506_v23, 7  ;;  %v4522_v34 = vshrl.u32 %v4454_v32, 16 }
 0x543   : > { %v4757_v50 = vsel %vm10025_vm0, %v4746_v45, %v4756_v47  ;;  %v4870_v10 = vshrl.u32 %v4841_v21, 16  ;;  %v4873_v25 = vshll.u32 %v4841_v21, 16  ;;  %v4503_v39 = vor.u32 %v4501_v31, %v4500_v36 }
 0x544   : > { %v4842_v59 = vsel %vm10024_vm14, %v8698_v22, %v4757_v50  ;;  %v4496_v41 = vsel %vm10026_vm13, %v8923_v40, %v4495_v63  ;;  %v4511_v30 = vor.u32 %v4509_v56, %v4508_v19  ;;  %v4516_v58 = vrot.slane %v4514_v57, 7 }
 0x545   : > { %v4872_v43 = vrot.slane %v4870_v10, 4  ;;  %v4875_v16 = vrot.slane %v4873_v25, 5  ;;  %v4878_v13 = vshrl.u32 %v4842_v59, 16  ;;  %v4881_v33 = vshll.u32 %v4842_v59, 16 }
 0x546   : > { %v4504_v27 = vsel %vm10027_vm2, %v4492_v18, %v4503_v39  ;;  %v4512_v45 = vsel %vm10028_vm6, %v4500_v36, %v4511_v30  ;;  %v4519_v23 = vor.u32 %v4517_v6, %v4516_v58  ;;  %v8938_v47 = vrot.slane %v4522_v34, 7  ;;  %vm10036_vm6 = vmmov %vm10027_vm2 }
 0x547   : > { %v4876_v31 = vor.u32 %v4875_v16, %v4872_v43  ;;  %v4880_v21 = vrot.slane %v4878_v13, 4  ;;  %v4883_v61 = vrot.slane %v4881_v33, 5  ;;  %v4525_v22 = vshll.u32 %v4454_v32, 16 }
 0x548   : > { %v4520_v50 = vsel %vm10029_vm7, %v4508_v19, %v4519_v23  ;;  %v4560_v56 = vsel %vm10008_vm5, %v8633_v46, %v4496_v41  ;;  %v4561_v25 = vsel %vm10008_vm5, %v8636_v38, %v4504_v27  ;;  %v4562_v18 = vsel %vm10008_vm5, %v8639_v15, %v4512_v45  ;;  %vm10037_vm7 = vmmov %vm10027_vm2 }
 0x549   : > { %v8950_v34 = vor.u32 %v4883_v61, %v4880_v21  ;;  %v4527_v36 = vor.u32 %v4525_v22, %v8938_v47  ;;  %v4563_v19 = vsel %vm10008_vm5, %v8646_v48, %v4520_v50  ;;  %v8956_v32 = vrot.slane %v4560_v56, 1 }
 0x54a   : > { %v4598_v57 = vrot.slane %v4561_v25, 1  ;;  %v4600_v46 = vrot.slane %v4562_v18, 1  ;;  %v4602_v6 = vrot.slane %v4563_v19, 1  ;;  %vm10030_vm8 = vsmask.f32 3328 }
 0x54b   : > { %v4885_v63 = vsel %vm10030_vm8, %v4876_v31, %v8950_v34  ;;  %v4528_v10 = vsel %vm10031_vm15, %v4516_v58, %v4527_v36  ;;  %v4485_v39 = vshll.u32 %v8892_v0, 16  ;;  %v4179_v61 = vsel %vm6445_vm4, %v8681_v17, %v8753_v8  ;;  %vm10039_vm15 = vmmov %vm10027_vm2 }
 0x54c   : > { %5880 = vmatprep.mubr.bf16.mxu0 %v4885_v63  ;;  %v4564_v59 = vsel %vm10008_vm5, %v8649_v44, %v4528_v10  ;;  %vm10032_vm11 = vcmask 1046528   ;;  %v4261_v31 = vshrl.u32 %v4179_v61, 16 }
 0x54d   : > { %v4599_v41 = vsel %vm10032_vm11, %v8956_v32, %v4598_v57  ;;  %vm10033_vm0 = vmmov %vm10032_vm11  ;;  %v8973_v58 = vrot.slane %v4564_v59, 1  ;;  %v4487_v23 = vor.u32 %v4485_v39, %v8923_v40  ;;  %v4264_v40 = vshll.u32 %v4179_v61, 16 }
 0x54e   : > { %v4601_v30 = vsel %vm10033_vm0, %v4598_v57, %v4600_v46  ;;  %vm10034_vm13 = vmmov %vm10033_vm0  ;;  %v4625_v0 = vsel %vm10013_vm3, %v8636_v38, %v4599_v41  ;;  %v4263_v36 = vrot.slane %v4261_v31, 7 }
 0x54f   : > { %v4603_v43 = vsel %vm10034_vm13, %v4600_v46, %v4602_v6  ;;  %v4626_v60 = vsel %vm10013_vm3, %v8639_v15, %v4601_v30  ;;  %v4665_v8 = vshrl.u32 %v4625_v0, 16  ;;  %vm10035_vm4 = vmmov %vm10033_vm0  ;;  %v4488_v18 = vsel %vm10027_vm2, %v8834_v2, %v4487_v23 }
 0x550   : > { %v4627_v17 = vsel %vm10013_vm3, %v8646_v48, %v4603_v43  ;;  %v4673_v16 = vshrl.u32 %v4626_v60, 16  ;;  %v4676_v13 = vshll.u32 %v4626_v60, 16  ;;  %v4605_v27 = vsel %vm10035_vm4, %v4602_v6, %v8973_v58  ;;  %vm10038_vm8 = vmmov %vm10033_vm0 }
 0x551   : > { %v4681_v33 = vshrl.u32 %v4627_v17, 16  ;;  %v4684_v45 = vshll.u32 %v4627_v17, 16  ;;  %v4628_v21 = vsel %vm10013_vm3, %v8649_v44, %v4605_v27  ;;  %v4667_v22 = vrot.slane %v4665_v8, 7  ;;  %vm10040_vm11 = vmmov %vm10027_vm2 }
 0x552   : > { %v4675_v50 = vrot.slane %v4673_v16, 7  ;;  %v4689_v25 = vshrl.u32 %v4628_v21, 16  ;;  %v4559_v46 = vsel %vm10008_vm5, %v8702_v5, %v4488_v18  ;;  %v4692_v63 = vshll.u32 %v4628_v21, 16  ;;  %vm10042_vm13 = vmmov %vm10027_vm2 }
 0x553   : > { %v4683_v56 = vrot.slane %v4681_v33, 7  ;;  %v4594_v10 = vrot.slane %v4559_v46, 1  ;;  %v4266_v41 = vor.u32 %v4264_v40, %v4263_v36  ;;  %v4668_v16 = vshll.u32 %v4625_v0, 16  ;;  %vm10043_vm4 = vmmov %vm10027_vm2 }
 0x554   : > { %v4678_v19 = vor.u32 %v4676_v13, %v4675_v50  ;;  %v8995_v6 = vrot.slane %v4689_v25, 7 }
 0x555   : > { %v4686_v57 = vor.u32 %v4684_v45, %v4683_v56  ;;  %v4595_v43 = vsel %vm10038_vm8, %v8873_v7, %v4594_v10  ;;  %v4180_v45 = vld [vmem:[#allocation3 + $0x50] sm:$0x1f]  ;;  %v4267_v23 = vsel %vm10040_vm11, %v8802_v9, %v4266_v41  ;;  %v4597_v9 = vsel %vm10033_vm0, %v4594_v10, %v8956_v32  ;;  %vm10046_vm8 = vmmov %vm10027_vm2 }
 0x556   : > { %v4679_v39 = vsel %vm10036_vm6, %v4667_v22, %v4678_v19  ;;  %v4694_v30 = vor.u32 %v4692_v63, %v8995_v6  ;;  %v4623_v8 = vsel %vm10013_vm3, %v8702_v5, %v4595_v43  ;;  %v4670_v46 = vor.u32 %v4668_v16, %v4667_v22  ;;  %vm10044_vm6 = vmmov %vm10027_vm2 }
 0x557   : > { %v4687_v59 = vsel %vm10037_vm7, %v4675_v50, %v4686_v57  ;;  %v9003_v2 = vsel %vm10020_vm12, %v8639_v15, %v4679_v39  ;;  %v4649_v27 = vshrl.u32 %v4623_v8, 16  ;;  %v4652_v21 = vshll.u32 %v4623_v8, 16  ;;  %v9024_v57 = vld [vmem:[#allocation3 + $0x28] sm:$0xff]  ;;  %v9030_v39 = vld [vmem:[#allocation3 + $0x50] sm:$0xff]  ;;  %vm10045_vm7 = vmmov %vm10027_vm2 }
 0x558   : > { %v4737_v61 = vsel %vm10020_vm12, %v8646_v48, %v4687_v59  ;;  %v4783_v60 = vshrl.u32 %v9003_v2, 16  ;;  %v4695_v13 = vsel %vm10039_vm15, %v4683_v56, %v4694_v30  ;;  %v4289_v50 = vsel %vm9982_vm1, %v4180_v45, %v4267_v23  ;;  %vm10041_vm1 = vmmov %vm10033_vm0 }
 0x559   : > { %v4791_v17 = vshrl.u32 %v4737_v61, 16  ;;  %v4794_v33 = vshll.u32 %v4737_v61, 16  ;;  %v4738_v7 = vsel %vm10020_vm12, %v8649_v44, %v4695_v13  ;;  %v4651_v18 = vrot.slane %v4649_v27, 7  ;;  %vm10047_vm15 = vmmov %vm10027_vm2 }
 0x55a   : > { %v9022_v25 = vrot.slane %v4783_v60, 7  ;;  %v4799_v0 = vshrl.u32 %v4738_v7, 16  ;;  %v4323_v56 = vrot.slane %v4289_v50, 1  ;;  %v4802_v19 = vshll.u32 %v4738_v7, 16  ;;  %vm10049_vm11 = vmmov %vm10027_vm2 }
 0x55b   : > { %v4793_v31 = vrot.slane %v4791_v17, 7  ;;  %v4654_v63 = vor.u32 %v4652_v21, %v4651_v18  ;;  %v4624_v59 = vsel %vm10013_vm3, %v9024_v57, %v4597_v9  ;;  %vm10050_vm0 = vmmov %vm10027_vm2 }
 0x55c   : > { %v9028_v40 = vrot.slane %v4799_v0, 7  ;;  %v4324_v24 = vsel %vm10041_vm1, %v8839_v1, %v4323_v56  ;;  %v4657_v22 = vshrl.u32 %v4624_v59, 16  ;;  %v4660_v10 = vshll.u32 %v4624_v59, 16 }
 0x55d   : > { %v4796_v36 = vor.u32 %v4794_v33, %v4793_v31  ;;  %v4345_v32 = vsel %vm9991_vm9, %v9030_v39, %v4324_v24  ;;  %v4655_v1 = vsel %vm10043_vm4, %v8886_v4, %v4654_v63  ;;  %vm10053_vm4 = vmmov %vm10050_vm0 }
 0x55e   : > { %v4804_v30 = vor.u32 %v4802_v19, %v9028_v40  ;;  %v4420_v43 = vshrl.u32 %v4345_v32, 16  ;;  %v4733_v8 = vsel %vm10020_vm12, %v8702_v5, %v4655_v1  ;;  %v4423_v16 = vshll.u32 %v4345_v32, 16  ;;  %v4292_v19 = vld [vmem:[#allocation3 + $0x58] sm:$0xf] }
 0x55f   : > { %v4797_v41 = vsel %vm10042_vm13, %v9022_v25, %v4796_v36  ;;  %v4759_v33 = vshrl.u32 %v4733_v8, 16  ;;  %v4762_v27 = vshll.u32 %v4733_v8, 16  ;;  %v4659_v4 = vrot.slane %v4657_v22, 7  ;;  %vm10052_vm13 = vmmov %vm10050_vm0 }
 0x560   : > { %v4847_v61 = vsel %vm10024_vm14, %v8646_v48, %v4797_v41  ;;  %v4805_v13 = vsel %vm10027_vm2, %v4793_v31, %v4804_v30  ;;  %v4422_v45 = vrot.slane %v4420_v43, 7  ;;  %v4346_v24 = vsel %vm9991_vm9, %v4292_v19, %v4323_v56  ;;  %vm10055_vm2 = vmmov %vm10050_vm0 }
 0x561   : > { %v4923_v60 = vshrl.u32 %v4847_v61, 16  ;;  %v4926_v17 = vshll.u32 %v4847_v61, 16  ;;  %v4848_v48 = vsel %vm10024_vm14, %v8649_v44, %v4805_v13  ;;  %v4761_v0 = vrot.slane %v4759_v33, 7 }
 0x562   : > { %v4932_v21 = vshrl.u32 %v4848_v48, 16  ;;  %v4935_v50 = vshll.u32 %v4848_v48, 16  ;;  %v4425_v36 = vor.u32 %v4423_v16, %v4422_v45  ;;  %v4662_v63 = vor.u32 %v4660_v10, %v4659_v4 }
 0x563   : > { %v4925_v23 = vrot.slane %v4923_v60, 4  ;;  %v4928_v7 = vrot.slane %v4926_v17, 5  ;;  %v4671_v31 = vsel %vm10044_vm6, %v4659_v4, %v4670_v46  ;;  %v4764_v32 = vor.u32 %v4762_v27, %v4761_v0  ;;  %vm10056_vm6 = vmmov %vm10050_vm0 }
 0x564   : > { %v4934_v59 = vrot.slane %v4932_v21, 4  ;;  %v4937_v41 = vrot.slane %v4935_v50, 5  ;;  %v4426_v44 = vsel %vm10045_vm7, %v8895_v28, %v4425_v36  ;;  %v4663_v30 = vsel %vm10046_vm8, %v4651_v18, %v4662_v63 }
 0x565   : > { %v9055_v9 = vor.u32 %v4928_v7, %v4925_v23  ;;  %v4455_v22 = vsel %vm10000_vm10, %v9030_v39, %v4426_v44  ;;  %v4428_v61 = vshrl.u32 %v4346_v24, 16  ;;  %v4431_v1 = vshll.u32 %v4346_v24, 16 }
 0x566   : > { %v9066_v10 = vor.u32 %v4937_v41, %v4934_v59  ;;  %v4765_v26 = vsel %vm10047_vm15, %v8925_v55, %v4764_v32  ;;  %v4530_v56 = vshrl.u32 %v4455_v22, 16  ;;  %v4533_v46 = vshll.u32 %v4455_v22, 16 }
 0x567   : > { %v4843_v43 = vsel %vm10024_vm14, %v8702_v5, %v4765_v26  ;;  %v4734_v28 = vsel %vm10020_vm12, %v9024_v57, %v4663_v30  ;;  %v4430_v60 = vrot.slane %v4428_v61, 7  ;;  %v4735_v18 = vsel %vm10020_vm12, %v8636_v38, %v4671_v31 }
 0x568   : > { %vm10048_vm9 = vsmask.f32 3328  ;;  %v4887_v55 = vshrl.u32 %v4843_v43, 16  ;;  %v4890_v8 = vshll.u32 %v4843_v43, 16  ;;  %v4532_v16 = vrot.slane %v4530_v56, 7 }
 0x569   : > { %v4939_v17 = vsel %vm10048_vm9, %v9055_v9, %v9066_v10  ;;  %v4767_v13 = vshrl.u32 %v4734_v28, 16  ;;  %v4433_v33 = vor.u32 %v4431_v1, %v4430_v60  ;;  %v4775_v5 = vshrl.u32 %v4735_v18, 16  ;;  %vm10051_vm1 = vmmov %vm10048_vm9 }
 0x56a   : > { %5892 = vmatprep.mubr.bf16.mxu1 %v4939_v17  ;;  %v4786_v27 = vshll.u32 %v9003_v2, 16  ;;  %v4889_v48 = vrot.slane %v4887_v55, 4  ;;  %v4892_v23 = vrot.slane %v4890_v8, 5  ;;  %v4535_v7 = vor.u32 %v4533_v46, %v4532_v16  ;;  %v4457_v55 = vld [vmem:[#allocation3 + $0x58] sm:$0x1f]  ;;  %vm10057_vm7 = vmmov %vm10051_vm1 }
 0x56b   : > { %v4770_v4 = vshll.u32 %v4734_v28, 16  ;;  %v4769_v21 = vrot.slane %v4767_v13, 7  ;;  %v4434_v50 = vsel %vm10049_vm11, %v4422_v45, %v4433_v33  ;;  %v4777_v36 = vrot.slane %v4775_v5, 7  ;;  %v4577_v5 = vld [vmem:[#allocation3 + $0x60] sm:$0xf]  ;;  %vm10060_vm15 = vmmov %vm10051_vm1 }
 0x56c   : > { %v4788_v63 = vor.u32 %v4786_v27, %v9022_v25  ;;  %v4893_v31 = vor.u32 %v4892_v23, %v4889_v48  ;;  %v4536_v24 = vsel %vm10050_vm0, %v8938_v47, %v4535_v7  ;;  %v4456_v59 = vsel %vm10000_vm10, %v4292_v19, %v4434_v50  ;;  %vm10062_vm9 = vmmov %vm10051_vm1 }
 0x56d   : > { %v4778_v41 = vshll.u32 %v4735_v18, 16  ;;  %v4565_v2 = vsel %vm10008_vm5, %v9030_v39, %v4536_v24  ;;  %v4772_v32 = vor.u32 %v4770_v4, %v4769_v21  ;;  %v4538_v44 = vshrl.u32 %v4456_v59, 16  ;;  %v4576_v24 = vld [vmem:[#allocation3 + $0x58] sm:$0xff]  ;;  %vm10063_vm11 = vmmov %vm10050_vm0 }
 0x56e   : > { %v4894_v45 = vsel %vm10051_vm1, %v8950_v34, %v4893_v31  ;;  %v4606_v22 = vrot.slane %v4565_v2, 1  ;;  %v4789_v25 = vsel %vm10052_vm13, %v4777_v36, %v4788_v63  ;;  %v4541_v52 = vshll.u32 %v4456_v59, 16  ;;  %vm10066_vm13 = vmmov %vm10050_vm0 }
 0x56f   : > { %v4780_v30 = vor.u32 %v4778_v41, %v4777_v36  ;;  %5881 = vmatmul.mubr.bf16.vlgmr.msra.gmra.mrb[40].mxu0 %v4894_v45  ;;  %v4773_v47 = vsel %vm10053_vm4, %v4761_v0, %v4772_v32  ;;  %v4540_v61 = vrot.slane %v4538_v44, 7  ;;  %v4846_v19 = vsel %vm10024_vm14, %v8639_v15, %v4789_v25 }
 0x570   : > { %vm10054_vm10 = vcmask 1046528   ;;  %v4844_v34 = vsel %vm10024_vm14, %v9024_v57, %v4773_v47  ;;  %v4917_v48 = vshll.u32 %v4846_v19, 16 }
 0x571   : > { %v4607_v1 = vsel %vm10054_vm10, %v8973_v58, %v4606_v22  ;;  %v4781_v26 = vsel %vm10055_vm2, %v4769_v21, %v4780_v30  ;;  %v4896_v0 = vshrl.u32 %v4844_v34, 16  ;;  %v4899_v46 = vshll.u32 %v4844_v34, 16  ;;  %vm10058_vm8 = vmmov %vm10054_vm10 }
 0x572   : > { %v4629_v56 = vsel %vm10013_vm3, %v9030_v39, %v4607_v1  ;;  %v4543_v43 = vor.u32 %v4541_v52, %v4540_v61  ;;  %v4845_v15 = vsel %vm10024_vm14, %v8636_v38, %v4781_v26  ;;  %v4914_v58 = vshrl.u32 %v4846_v19, 16 }
 0x573   : > { %v4697_v28 = vshrl.u32 %v4629_v56, 16  ;;  %v4700_v60 = vshll.u32 %v4629_v56, 16  ;;  %v4898_v18 = vrot.slane %v4896_v0, 4  ;;  %v4901_v17 = vrot.slane %v4899_v46, 5 }
 0x574   : > { %v4544_v57 = vsel %vm10056_vm6, %v4532_v16, %v4543_v43  ;;  %v4905_v8 = vshrl.u32 %v4845_v15, 16  ;;  %v4908_v27 = vshll.u32 %v4845_v15, 16  ;;  %v4916_v38 = vrot.slane %v4914_v58, 4 }
 0x575   : > { %v4699_v13 = vrot.slane %v4697_v28, 7  ;;  %v4566_v33 = vsel %vm10008_vm5, %v4457_v55, %v4544_v57  ;;  %v4902_v23 = vor.u32 %v4901_v17, %v4898_v18  ;;  %v4919_v36 = vrot.slane %v4917_v48, 5  ;;  %vm10059_vm5 = vmmov %vm10050_vm0 }
 0x576   : > { %v4608_v7 = vrot.slane %v4566_v33, 1  ;;  %v4907_v4 = vrot.slane %v4905_v8, 4  ;;  %v4910_v50 = vrot.slane %v4908_v27, 5  ;;  %v4742_v27 = vld [vmem:[#allocation3 + $0x60] sm:$0x1f] }
 0x577   : > { %v4702_v21 = vor.u32 %v4700_v60, %v4699_v13  ;;  %v4903_v63 = vsel %vm10057_vm7, %v4893_v31, %v4902_v23  ;;  %v4920_v25 = vor.u32 %v4919_v36, %v4916_v38 }
 0x578   : > { %v4609_v16 = vsel %vm10058_vm8, %v4606_v22, %v4608_v7  ;;  %v4631_v59 = vsel %vm10013_vm3, %v4577_v5, %v4608_v7  ;;  %5884 = vmatprep.mubr.bf16.mxu0 %v4903_v63  ;;  %v4911_v31 = vor.u32 %v4910_v50, %v4907_v4 }
 0x579   : > { %v4703_v20 = vsel %vm10059_vm5, %v8995_v6, %v4702_v21  ;;  %v4630_v41 = vsel %vm10013_vm3, %v4576_v24, %v4609_v16  ;;  %v4713_v2 = vshrl.u32 %v4631_v59, 16  ;;  %v4716_v22 = vshll.u32 %v4631_v59, 16  ;;  %vm10061_vm3 = vmmov %vm10051_vm1 }
 0x57a   : > { %v4739_v32 = vsel %vm10020_vm12, %v9030_v39, %v4703_v20  ;;  %v4705_v44 = vshrl.u32 %v4630_v41, 16  ;;  %v4708_v52 = vshll.u32 %v4630_v41, 16  ;;  %v4912_v6 = vsel %vm10060_vm15, %v4902_v23, %v4911_v31  ;;  %vm10064_vm1 = vmmov %vm10050_vm0 }
 0x57b   : > { %v4807_v45 = vshrl.u32 %v4739_v32, 16  ;;  %v4715_v30 = vrot.slane %v4713_v2, 7  ;;  %v4810_v47 = vshll.u32 %v4739_v32, 16  ;;  %5885 = vmatmul.mubr.bf16.gmra.mrb[44].mxu0 %v4912_v6  ;;  %v4921_v29 = vsel %vm10061_vm3, %v4911_v31, %v4920_v25  ;;  %vm10067_vm4 = vmmov %vm10061_vm3 }
 0x57c   : > { %v4707_v61 = vrot.slane %v4705_v44, 7  ;;  %v4930_v34 = vsel %vm10062_vm9, %v4920_v25, %v9055_v9  ;;  %5888 = vmatprep.mubr.bf16.mxu0 %v4921_v29  ;;  %vm10068_vm10 = vmmov %vm10061_vm3 }
 0x57d   : > { %v4809_v19 = vrot.slane %v4807_v45, 7  ;;  %v4718_v1 = vor.u32 %v4716_v22, %v4715_v30  ;;  %vm10069_vm2 = vmmov %vm10061_vm3 }
 0x57e   : > { %v4710_v26 = vor.u32 %v4708_v52, %v4707_v61 }
 0x57f   : > { %v4812_v56 = vor.u32 %v4810_v47, %v4809_v19  ;;  %v4719_v0 = vsel %vm10063_vm11, %v4707_v61, %v4718_v1 }
 0x580   : > { %v4711_v46 = vsel %vm10050_vm0, %v4699_v13, %v4710_v26  ;;  %v4741_v43 = vsel %vm10020_vm12, %v4577_v5, %v4719_v0 }
 0x581   : > { %v4813_v28 = vsel %vm10064_vm1, %v9028_v40, %v4812_v56  ;;  %v4740_v60 = vsel %vm10020_vm12, %v4576_v24, %v4711_v46  ;;  %v4823_v15 = vshrl.u32 %v4741_v43, 16  ;;  %v4826_v57 = vshll.u32 %v4741_v43, 16  ;;  %vm10065_vm12 = vmmov %vm10050_vm0 }
 0x582   : > { %v4849_v9 = vsel %vm10024_vm14, %v9030_v39, %v4813_v28  ;;  %v4815_v58 = vshrl.u32 %v4740_v60, 16  ;;  %v4818_v13 = vshll.u32 %v4740_v60, 16 }
 0x583   : > { %v4941_v18 = vshrl.u32 %v4849_v9, 16  ;;  %v4944_v17 = vshll.u32 %v4849_v9, 16  ;;  %v4825_v55 = vrot.slane %v4823_v15, 7  ;;  %5889 = vmatmul.mubr.bf16.gmra.mrb[48].mxu0 %v4930_v34 }
 0x584   : > { %v4817_v8 = vrot.slane %v4815_v58, 7 }
 0x585   : > { %v4943_v33 = vrot.slane %v4941_v18, 4  ;;  %v4946_v5 = vrot.slane %v4944_v17, 5  ;;  %v4828_v48 = vor.u32 %v4826_v57, %v4825_v55 }
 0x586   : > { %v4820_v40 = vor.u32 %v4818_v13, %v4817_v8 }
 0x587   : > { %v4947_v53 = vor.u32 %v4946_v5, %v4943_v33  ;;  %v4829_v23 = vsel %vm10065_vm12, %v4817_v8, %v4828_v48 }
 0x588   : > { %v4821_v7 = vsel %vm10066_vm13, %v4809_v19, %v4820_v40  ;;  %v4851_v39 = vsel %vm10024_vm14, %v4742_v27, %v4829_v23 }
 0x589   : > { %v4948_v4 = vsel %vm10067_vm4, %v9066_v10, %v4947_v53  ;;  %v4850_v21 = vsel %vm10024_vm14, %v4576_v24, %v4821_v7  ;;  %v4959_v50 = vshrl.u32 %v4851_v39, 16  ;;  %v4962_v38 = vshll.u32 %v4851_v39, 16 }
 0x58a   : > { %5893 = vmatmul.mubr.bf16.vlgmr.msra.gmra.mrb[40].mxu1 %v4948_v4  ;;  %v4950_v36 = vshrl.u32 %v4850_v21, 16  ;;  %v4953_v63 = vshll.u32 %v4850_v21, 16  ;;  %vm10080_vm14 = vcmask 1043456  }
 0x58b   : > { %v4961_v16 = vrot.slane %v4959_v50, 4  ;;  %v4964_v59 = vrot.slane %v4962_v38, 5  ;;  %vm10081_vm6 = vmmov %vm10080_vm14 }
 0x58c   : > { %v4952_v20 = vrot.slane %v4950_v36, 4  ;;  %v4955_v41 = vrot.slane %v4953_v63, 5  ;;  %vm10082_vm7 = vmmov %vm10081_vm6 }
 0x58d   : > { %v4965_v32 = vor.u32 %v4964_v59, %v4961_v16  ;;  %v10070_v16 = vld [vmem:[#allocation13_spill] sm:$0xff]  ;;  %vm10083_vm8 = vmmov %vm10081_vm6 }
 0x58e   : > { %v4956_v2 = vor.u32 %v4955_v41, %v4952_v20  ;;  %vm10084_vm5 = vmmov %vm10081_vm6 }
 0x58f   : > { %vm10085_vm15 = vmmov %vm10084_vm5 }
 0x590   : > { %v4957_v44 = vsel %vm10068_vm10, %v4947_v53, %v4956_v2  ;;  %v4966_v31 = vsel %vm10069_vm2, %v4956_v2, %v4965_v32  ;;  %v10071_v32 = vld [vmem:[#allocation15_spill] sm:$0xff]  ;;  %vm10086_vm3 = vmmov %vm10084_vm5 }
 0x591   : > { %5896 = vmatprep.mubr.bf16.mxu1 %v4957_v44  ;;  %vm10087_vm9 = vmmov %vm10086_vm3 }
 0x592   : > { %5897 = vmatmul.mubr.bf16.gmra.mrb[44].mxu1 %v4966_v31  ;;  %vm10088_vm11 = vmmov %vm10086_vm3 }
 0x593   : > { %vm10089_vm0 = vmmov %vm10086_vm3 }
 0x642   : > { %v5882_v10 = vpop.f32.mrb[40].mxu0 }
 0x643   : > { %v5059_v42 = vpop.f32.mrb[41].mxu0  ;;  %v9154_v22 = vmul.f32 %v5882_v10, %v9831_v54 }
 0x644   : > { %v9151_v24 = vmul.f32 %v5059_v42, %v9828_v11  ;;  %v5883_v45 = vpop.f32.mrb[42].mxu0 }
 0x645   : > { %v5062_v30 = vpop.f32.mrb[43].mxu0  ;;  %v9162_v61 = vmul.f32 %v5883_v45, %v9832_v12  ;;  %v5185_v19 = vmul.f32 %v9154_v22, %v9154_v22  ;;  %v10072_v45 = vld [vmem:[#allocation16_spill] sm:$0xff] }
 0x646   : > { %v9157_v25 = vmul.f32 %v5062_v30, %v9830_v49  ;;  %v5183_v47 = vmul.f32 %v9151_v24, %v9151_v24 }
 0x647   : > { %v5186_v34 = vmul.f32 %v9162_v61, %v9162_v61 }
 0x648   : > { %v5158_v52 = vadd.f32 %v9157_v25, %v9151_v24  ;;  %v5184_v6 = vmul.f32 %v9157_v25, %v9157_v25 }
 0x64a   : > { %v5159_v1 = vadd.f32 %v5158_v52, %v9154_v22  ;;  %v5203_v29 = vadd.f32 %v5184_v6, %v5183_v47 }
 0x64c   : > { %v5204_v26 = vadd.f32 %v5203_v29, %v5185_v19  ;;  %v5160_v56 = vadd.f32 %v5159_v1, %v9162_v61  ;;  %v10073_v1 = vld [vmem:[#allocation17_spill] sm:$0xff] }
 0x64e   : > { %v5205_v0 = vadd.f32 %v5204_v26, %v5186_v34  ;;  %v5886_v46 = vpop.f32.mrb[44].mxu0 }
 0x64f   : > { %v5075_v43 = vpop.f32.mrb[45].mxu0  ;;  %v9178_v9 = vmul.f32 %v5886_v46, %v9844_v51 }
 0x650   : > { %v9175_v28 = vmul.f32 %v5075_v43, %v9963_v37  ;;  %v5887_v60 = vpop.f32.mrb[46].mxu0 }
 0x651   : > { %v5078_v15 = vpop.f32.mrb[47].mxu0  ;;  %v9187_v57 = vmul.f32 %v5887_v60, %v9845_v35  ;;  %v5189_v33 = vmul.f32 %v9178_v9, %v9178_v9 }
 0x652   : > { %v5161_v58 = vadd.f32 %v5160_v56, %v9175_v28  ;;  %v5187_v18 = vmul.f32 %v9175_v28, %v9175_v28  ;;  %v9184_v17 = vmul.f32 %v5078_v15, %v9964_v3 }
 0x653   : > { %v5190_v53 = vmul.f32 %v9187_v57, %v9187_v57 }
 0x654   : > { %v5206_v55 = vadd.f32 %v5205_v0, %v5187_v18  ;;  %v5162_v8 = vadd.f32 %v5161_v58, %v9184_v17  ;;  %v5188_v13 = vmul.f32 %v9184_v17, %v9184_v17  ;;  %v10074_v0 = vld [vmem:[#allocation18_spill] sm:$0xff]  ;;  %v10075_v18 = vld [vmem:[#allocation20_spill] sm:$0xff] }
 0x656   : > { %v5163_v5 = vadd.f32 %v5162_v8, %v9178_v9  ;;  %v5207_v27 = vadd.f32 %v5206_v55, %v5188_v13  ;;  %v5890_v48 = vpop.f32.mrb[48].mxu0 }
 0x657   : > { %v5091_v40 = vpop.f32.mrb[49].mxu0  ;;  %v9202_v21 = vmul.f32 %v5890_v48, %v6234_v14 }
 0x658   : > { %v5208_v23 = vadd.f32 %v5207_v27, %v5189_v33  ;;  %v9198_v7 = vmul.f32 %v5091_v40, %v9846_v62  ;;  %v5164_v39 = vadd.f32 %v5163_v5, %v9187_v57  ;;  %v5891_v4 = vpop.f32.mrb[50].mxu0  ;;  %v10076_v40 = vld [vmem:[#allocation21_spill] sm:$0xff] }
 0x659   : > { %v5094_v50 = vpop.f32.mrb[51].mxu0  ;;  %v9211_v44 = vmul.f32 %v5891_v4, %v10071_v32  ;;  %v5193_v52 = vmul.f32 %v9202_v21, %v9202_v21 }
 0x65a   : > { %v5165_v38 = vadd.f32 %v5164_v39, %v9198_v7  ;;  %v5191_v36 = vmul.f32 %v9198_v7, %v9198_v7  ;;  %v5209_v63 = vadd.f32 %v5208_v23, %v5190_v53  ;;  %v9208_v59 = vmul.f32 %v5094_v50, %v10070_v16 }
 0x65b   : > { %v5194_v34 = vmul.f32 %v9211_v44, %v9211_v44 }
 0x65c   : > { %v5210_v2 = vadd.f32 %v5209_v63, %v5191_v36  ;;  %v5166_v31 = vadd.f32 %v5165_v38, %v9208_v59  ;;  %v5192_v10 = vmul.f32 %v9208_v59, %v9208_v59  ;;  %v10077_v38 = vld [vmem:[#allocation23_spill] sm:$0xff] }
 0x65d   : > { %v5894_v20 = vpop.f32.mrb[40].mxu1 }
 0x65e   : > { %v5107_v41 = vpop.f32.mrb[41].mxu1  ;;  %v5167_v6 = vadd.f32 %v5166_v31, %v9202_v21  ;;  %v5211_v19 = vadd.f32 %v5210_v2, %v5192_v10  ;;  %v9229_v46 = vmul.f32 %v5894_v20, %v10074_v0 }
 0x65f   : > { %v5895_v42 = vpop.f32.mrb[42].mxu1  ;;  %v9217_v30 = vmul.f32 %v5107_v41, %v10072_v45  ;;  %v10078_v41 = vld [vmem:[#allocation24_spill] sm:$0xff] }
 0x660   : > { %v5110_v47 = vpop.f32.mrb[43].mxu1  ;;  %v5168_v26 = vadd.f32 %v5167_v6, %v9211_v44  ;;  %v5212_v56 = vadd.f32 %v5211_v19, %v5193_v52  ;;  %v9235_v55 = vmul.f32 %v5895_v42, %v10075_v18  ;;  %v5197_v48 = vmul.f32 %v9229_v46, %v9229_v46 }
 0x661   : > { %v9223_v29 = vmul.f32 %v5110_v47, %v10073_v1  ;;  %v5195_v43 = vmul.f32 %v9217_v30, %v9217_v30  ;;  %v10079_v47 = vld [vmem:[#allocation25_spill] sm:$0xff] }
 0x662   : > { %v5169_v60 = vadd.f32 %v5168_v26, %v9217_v30  ;;  %v5213_v15 = vadd.f32 %v5212_v56, %v5194_v34  ;;  %v5198_v50 = vmul.f32 %v9235_v55, %v9235_v55 }
 0x663   : > { %v5196_v8 = vmul.f32 %v9223_v29, %v9223_v29 }
 0x664   : > { %v5170_v33 = vadd.f32 %v5169_v60, %v9223_v29  ;;  %v5214_v5 = vadd.f32 %v5213_v15, %v5195_v43 }
 0x665   : > { %v5898_v58 = vpop.f32.mrb[44].mxu1 }
 0x666   : > { %v5123_v13 = vpop.f32.mrb[45].mxu1  ;;  %v5171_v39 = vadd.f32 %v5170_v33, %v9229_v46  ;;  %v5215_v4 = vadd.f32 %v5214_v5, %v5196_v8  ;;  %v9253_v2 = vmul.f32 %v5898_v58, %v10078_v41 }
 0x667   : > { %v5899_v27 = vpop.f32.mrb[46].mxu1  ;;  %v9243_v53 = vmul.f32 %v5123_v13, %v10076_v40 }
 0x668   : > { %v5126_v23 = vpop.f32.mrb[47].mxu1  ;;  %v5172_v63 = vadd.f32 %v5171_v39, %v9235_v55  ;;  %v5216_v20 = vadd.f32 %v5215_v4, %v5197_v48  ;;  %v9259_v52 = vmul.f32 %v5899_v27, %v10079_v47  ;;  %v5201_v26 = vmul.f32 %v9253_v2, %v9253_v2 }
 0x669   : > { %v9249_v36 = vmul.f32 %v5126_v23, %v10077_v38  ;;  %v5199_v31 = vmul.f32 %v9243_v53, %v9243_v53 }
 0x66a   : > { %v5173_v10 = vadd.f32 %v5172_v63, %v9243_v53  ;;  %v5217_v42 = vadd.f32 %v5216_v20, %v5198_v50  ;;  %v5202_v60 = vmul.f32 %v9259_v52, %v9259_v52 }
 0x66b   : > { %v5200_v6 = vmul.f32 %v9249_v36, %v9249_v36 }
 0x66c   : > { %v5174_v19 = vadd.f32 %v5173_v10, %v9249_v36  ;;  %v5218_v34 = vadd.f32 %v5217_v42, %v5199_v31 }
 0x66e   : > { %v5175_v56 = vadd.f32 %v5174_v19, %v9253_v2  ;;  %v5219_v43 = vadd.f32 %v5218_v34, %v5200_v6 }
 0x670   : > { %v5176_v15 = vadd.f32 %v5175_v56, %v9259_v52  ;;  %v5220_v58 = vadd.f32 %v5219_v43, %v5201_v26 }
 0x672   : > { %v5177_v8 = vrot.slane %v5176_v15, 4  ;;  %v5221_v13 = vadd.f32 %v5220_v58, %v5202_v60  ;;  %v5284_v58 = vld [vmem:[#allocation2 + $0x50] sm:$0xff] }
 0x673   : > { %v5314_v41 = vrot.slane %v5284_v58, 4 }
 0x674   : > { %v5178_v33 = vadd.f32 %v5177_v8, %v5176_v15  ;;  %v5222_v5 = vrot.slane %v5221_v13, 4  ;;  %v5283_v8 = vld [vmem:[#allocation2 + $0x48] sm:$0xff] }
 0x675   : > { %v5312_v47 = vrot.slane %v5283_v8, 4 }
 0x676   : > { %v5179_v27 = vrot.slane %v5178_v33, 2  ;;  %v5223_v48 = vadd.f32 %v5222_v5, %v5221_v13  ;;  %v5279_v5 = vld [vmem:[#allocation2 + $0x28] sm:$0xff] }
 0x677   : > { %v5304_v26 = vrot.slane %v5279_v5, 4  ;;  %v5315_v5 = vsel %vm10088_vm11, %v5312_v47, %v5314_v41 }
 0x678   : > { %v5180_v23 = vadd.f32 %v5179_v27, %v5178_v33  ;;  %v5224_v39 = vrot.slane %v5223_v48, 2  ;;  %v5281_v33 = vld [vmem:[#allocation2 + $0x38] sm:$0xff]  ;;  %v5345_v45 = vunpack.c.h.bf16 %v5315_v5 }
 0x679   : > { %v5308_v34 = vrot.slane %v5281_v33, 4 }
 0x67a   : > { %v5181_v4 = vrot.slane %v5180_v23, 1  ;;  %v5225_v50 = vadd.f32 %v5224_v39, %v5223_v48  ;;  %v5285_v39 = vld [vmem:[#allocation2 + $0x58] sm:$0xf] }
 0x67b   : > { %v5316_v19 = vrot.slane %v5285_v39, 4 }
 0x67c   : > { %v5182_v63 = vadd.f32 %v5181_v4, %v5180_v23  ;;  %v5226_v20 = vrot.slane %v5225_v50, 1  ;;  %v5275_v23 = vld [vmem:[#allocation2 + $0x8] sm:$0xf0] }
 0x67d   : > { %v5297_v60 = vrot.slane %v5275_v23, 4  ;;  %v5317_v58 = vsel %vm10089_vm0, %v5314_v41, %v5316_v19 }
 0x67e   : > { %v5227_v31 = vadd.f32 %v5226_v20, %v5225_v50  ;;  %v9270_v10 = vmul.f32 0.015625, %v5182_v63  ;;  %v5280_v63 = vld [vmem:[#allocation2 + $0x30] sm:$0xff]  ;;  %v5282_v20 = vld [vmem:[#allocation2 + $0x40] sm:$0xff]  ;;  %v5346_v41 = vunpack.c.l.bf16 %v5317_v58  ;;  %v5347_v19 = vunpack.c.h.bf16 %v5317_v58 }
 0x67f   : > { %v5306_v48 = vrot.slane %v5280_v63, 4 }
 0x680   : > { %v5229_v42 = vmul.f32 0.015625, %v5227_v31  ;;  %v5230_v6 = vmul.f32 %v9270_v10, %v9270_v10  ;;  %v5276_v31 = vld [vmem:[#allocation2 + $0x10] sm:$0xff] }
 0x681   : > { %v5298_v43 = vrot.slane %v5276_v31, 4  ;;  %v5307_v23 = vsel %vm10084_vm5, %v5304_v26, %v5306_v48  ;;  %v5309_v31 = vsel %vm10085_vm15, %v5306_v48, %v5308_v34 }
 0x682   : > { %v5231_v15 = vsub.f32 %v5229_v42, %v5230_v6  ;;  %v5277_v42 = vld [vmem:[#allocation2 + $0x18] sm:$0xff]  ;;  %v5278_v6 = vld [vmem:[#allocation2 + $0x20] sm:$0xff]  ;;  %v5339_v48 = vunpack.c.h.bf16 %v5309_v31 }
 0x683   : > { %v5300_v56 = vrot.slane %v5277_v42, 4  ;;  %v5302_v27 = vrot.slane %v5278_v6, 4  ;;  %v5299_v50 = vsel %vm10080_vm14, %v5297_v60, %v5298_v43  ;;  %v5336_v42 = vunpack.c.l.bf16 %v5307_v23 }
 0x684   : > { %v5232_v4 = vmax.f32 %v5231_v15, 0.0  ;;  %v5310_v15 = vrot.slane %v5282_v20, 4  ;;  %v5328_v8 = vunpack.c.l.bf16 %v5299_v50  ;;  %v5329_v60 = vunpack.c.h.bf16 %v5299_v50 }
 0x685   : > { %v5301_v38 = vsel %vm10081_vm6, %v5298_v43, %v5300_v56  ;;  %v5305_v40 = vsel %vm10083_vm8, %v5302_v27, %v5304_v26  ;;  %v5337_v26 = vunpack.c.h.bf16 %v5307_v23  ;;  %v5338_v6 = vunpack.c.l.bf16 %v5309_v31 }
 0x686   : > { %v5253_v13 = vadd.f32 1e-05, %v5232_v4  ;;  %v5303_v4 = vsel %vm10082_vm7, %v5300_v56, %v5302_v27  ;;  %v5313_v33 = vsel %vm10087_vm9, %v5310_v15, %v5312_v47  ;;  %v5330_v39 = vunpack.c.l.bf16 %v5301_v38 }
 0x687   : > { %v5331_v43 = vunpack.c.h.bf16 %v5301_v38  ;;  %v5332_v63 = vunpack.c.l.bf16 %v5303_v4  ;;  %v5333_v56 = vunpack.c.h.bf16 %v5303_v4  ;;  %v5334_v20 = vunpack.c.l.bf16 %v5305_v40 }
 0x688   : > { %5987 = vrsqrt.f32 %v5253_v13  ;;  %v5311_v13 = vsel %vm10086_vm3, %v5308_v34, %v5310_v15  ;;  %v5335_v27 = vunpack.c.h.bf16 %v5305_v40  ;;  %v5342_v0 = vunpack.c.l.bf16 %v5313_v33 }
 0x689   : > { %v5340_v18 = vunpack.c.l.bf16 %v5311_v13  ;;  %v5341_v34 = vunpack.c.h.bf16 %v5311_v13  ;;  %v5343_v15 = vunpack.c.h.bf16 %v5313_v33  ;;  %v5344_v47 = vunpack.c.l.bf16 %v5315_v5 }
 0x68a   : > { %v10090_v38 = vsub.f32 %v9151_v24, %v9270_v10  ;;  %v10091_v40 = vsub.f32 %v9157_v25, %v9270_v10  ;;  %v10092_v23 = vsub.f32 %v9154_v22, %v9270_v10  ;;  %v10093_v13 = vsub.f32 %v9162_v61, %v9270_v10 }
 0x68b   : > { %v10094_v5 = vsub.f32 %v9175_v28, %v9270_v10  ;;  %v10095_v24 = vsub.f32 %v9184_v17, %v9270_v10  ;;  %v10096_v25 = vsub.f32 %v9178_v9, %v9270_v10  ;;  %v10097_v22 = vsub.f32 %v9187_v57, %v9270_v10 }
 0x68c   : > { %v10098_v61 = vsub.f32 %v9198_v7, %v9270_v10  ;;  %v10099_v28 = vsub.f32 %v9208_v59, %v9270_v10  ;;  %v10100_v17 = vsub.f32 %v9202_v21, %v9270_v10  ;;  %v10101_v9 = vsub.f32 %v9211_v44, %v9270_v10 }
 0x68d   : > { %v10102_v57 = vsub.f32 %v9217_v30, %v9270_v10  ;;  %v10103_v7 = vsub.f32 %v9223_v29, %v9270_v10  ;;  %v10104_v59 = vsub.f32 %v9229_v46, %v9270_v10  ;;  %v10105_v21 = vsub.f32 %v9235_v55, %v9270_v10 }
 0x68e   : > { %v10106_v44 = vsub.f32 %v9243_v53, %v9270_v10  ;;  %v10107_v30 = vsub.f32 %v9249_v36, %v9270_v10  ;;  %v10108_v29 = vsub.f32 %v9253_v2, %v9270_v10  ;;  %v10109_v46 = vsub.f32 %v9259_v52, %v9270_v10 }
 0x692   : > { %v5988_v1 = vpop.eup %5987 }
 0x693   : > { %v5255_v50 = vmul.f32 %v5988_v1, %v10090_v38  ;;  %v5256_v4 = vmul.f32 %v5988_v1, %v10091_v40  ;;  %v5257_v31 = vmul.f32 %v5988_v1, %v10092_v23  ;;  %v5258_v33 = vmul.f32 %v5988_v1, %v10093_v13 }
 0x694   : > { %v5259_v58 = vmul.f32 %v5988_v1, %v10094_v5  ;;  %v5260_v38 = vmul.f32 %v5988_v1, %v10095_v24  ;;  %v5261_v40 = vmul.f32 %v5988_v1, %v10096_v25  ;;  %v5262_v23 = vmul.f32 %v5988_v1, %v10097_v22 }
 0x695   : > { %v5263_v13 = vmul.f32 %v5988_v1, %v10098_v61  ;;  %v5264_v5 = vmul.f32 %v5988_v1, %v10099_v28  ;;  %v5265_v24 = vmul.f32 %v5988_v1, %v10100_v17  ;;  %v5266_v25 = vmul.f32 %v5988_v1, %v10101_v9 }
 0x696   : > { %v5267_v22 = vmul.f32 %v5988_v1, %v10102_v57  ;;  %v5268_v61 = vmul.f32 %v5988_v1, %v10103_v7  ;;  %v5269_v28 = vmul.f32 %v5988_v1, %v10104_v59  ;;  %v5270_v17 = vmul.f32 %v5988_v1, %v10105_v21 }
 0x697   : > { %v5271_v9 = vmul.f32 %v5988_v1, %v10106_v44  ;;  %v5272_v57 = vmul.f32 %v5988_v1, %v10107_v30  ;;  %v5273_v7 = vmul.f32 %v5988_v1, %v10108_v29  ;;  %v5274_v59 = vmul.f32 %v5988_v1, %v10109_v46  ;;  %v10117_v46 = vld [vmem:[#allocation9_spill] sm:$0xff] }
 0x698   : > { %v5348_v32 = vadd.f32 %v5328_v8, %v5255_v50  ;;  %v5349_v14 = vadd.f32 %v5329_v60, %v5256_v4  ;;  %v5350_v55 = vadd.f32 %v5330_v39, %v5257_v31  ;;  %v5351_v21 = vadd.f32 %v5331_v43, %v5258_v33 }
 0x699   : > { %v5352_v16 = vadd.f32 %v5332_v63, %v5259_v58  ;;  %v5353_v62 = vadd.f32 %v5333_v56, %v5260_v38  ;;  %v5354_v53 = vadd.f32 %v5334_v20, %v5261_v40  ;;  %v5355_v44 = vadd.f32 %v5335_v27, %v5262_v23 }
 0x69a   : > { %v5356_v35 = vadd.f32 %v5336_v42, %v5263_v13  ;;  %v5357_v51 = vadd.f32 %v5337_v26, %v5264_v5  ;;  %v5358_v36 = vadd.f32 %v5338_v6, %v5265_v24  ;;  %v5359_v30 = vadd.f32 %v5339_v48, %v5266_v25 }
 0x69b   : > { %v5360_v3 = vadd.f32 %v5340_v18, %v5267_v22  ;;  %v5361_v37 = vadd.f32 %v5341_v34, %v5268_v61  ;;  %v9384_v2 = vadd.f32 %v5342_v0, %v5269_v28  ;;  %v9386_v29 = vadd.f32 %v5343_v15, %v5270_v17 }
 0x69c   : > { %v9388_v52 = vadd.f32 %v5344_v47, %v5271_v9  ;;  %v9390_v1 = vadd.f32 %v5345_v45, %v5272_v57  ;;  %v9392_v10 = vadd.f32 %v5346_v41, %v5273_v7  ;;  %v9394_v8 = vadd.f32 %v5347_v19, %v5274_v59  ;;  %v10116_v57 = vld [vmem:[#allocation8_spill] sm:$0xff] }
 0x69d   : > { %vm5369_vm12 = vcmp.ge.f32.partialorder %v5349_v14, 0.0  ;;  %vm5371_vm4 = vcmp.ge.f32.partialorder %v5351_v21, 0.0  ;;  %vm5373_vm2 = vcmp.ge.f32.partialorder %v5353_v62, 0.0  ;;  %vm5375_vm6 = vcmp.ge.f32.partialorder %v5355_v44, 0.0 }
 0x69e   : > { %vm5376_vm7 = vcmp.ge.f32.partialorder %v5356_v35, 0.0  ;;  %vm5377_vm8 = vcmp.ge.f32.partialorder %v5357_v51, 0.0  ;;  %vm5378_vm5 = vcmp.ge.f32.partialorder %v5358_v36, 0.0  ;;  %vm5379_vm15 = vcmp.ge.f32.partialorder %v5359_v30, 0.0 }
 0x69f   : > { %vm5380_vm3 = vcmp.ge.f32.partialorder %v5360_v3, 0.0  ;;  %vm5381_vm9 = vcmp.ge.f32.partialorder %v5361_v37, 0.0  ;;  %vm5383_vm0 = vcmp.ge.f32.partialorder %v9386_v29, 0.0  ;;  %vm5384_vm1 = vcmp.ge.f32.partialorder %v9388_v52, 0.0 }
 0x6a0   : > { %vm5385_vm13 = vcmp.ge.f32.partialorder %v9390_v1, 0.0  ;;  %vm5386_vm10 = vcmp.ge.f32.partialorder %v9392_v10, 0.0  ;;  %v5388_v45 = vmul.f32 0.01, %v5348_v32  ;;  %v5389_v0 = vmul.f32 0.01, %v5349_v14 }
 0x6a1   : > { %v5390_v18 = vmul.f32 0.01, %v5350_v55  ;;  %v5391_v60 = vmul.f32 0.01, %v5351_v21  ;;  %v5392_v39 = vmul.f32 0.01, %v5352_v16 }
 0x6a2   : > { %v5393_v43 = vmul.f32 0.01, %v5353_v62  ;;  %v5394_v63 = vmul.f32 0.01, %v5354_v53  ;;  %v5395_v56 = vmul.f32 0.01, %v5355_v44  ;;  %v5409_v48 = vsel %vm5369_vm12, %v5349_v14, %v5389_v0 }
 0x6a3   : > { %v5396_v20 = vmul.f32 0.01, %v5356_v35  ;;  %vm10110_vm11 = vcmp.ge.f32.partialorder %v5348_v32, 0.0  ;;  %v5397_v42 = vmul.f32 0.01, %v5357_v51  ;;  %vm10111_vm14 = vcmp.ge.f32.partialorder %v5350_v55, 0.0 }
 0x6a4   : > { %v5408_v27 = vsel %vm10110_vm11, %v5348_v32, %v5388_v45  ;;  %v5398_v26 = vmul.f32 0.01, %v5358_v36  ;;  %v5399_v6 = vmul.f32 0.01, %v5359_v30  ;;  %v5400_v34 = vmul.f32 0.01, %v5360_v3 }
 0x6a5   : > { %v5401_v15 = vmul.f32 0.01, %v5361_v37  ;;  %v5402_v47 = vmul.f32 0.01, %v9384_v2  ;;  %v5410_v41 = vsel %vm10111_vm14, %v5350_v55, %v5390_v18  ;;  %v5403_v19 = vmul.f32 0.01, %v9386_v29 }
 0x6a6   : > { %v5404_v50 = vmul.f32 0.01, %v9388_v52  ;;  %v5405_v4 = vmul.f32 0.01, %v9390_v1  ;;  %v5411_v32 = vsel %vm5371_vm4, %v5351_v21, %v5391_v60  ;;  %v5406_v31 = vmul.f32 0.01, %v9392_v10 }
 0x6a7   : > { %v5407_v33 = vmul.f32 0.01, %v9394_v8  ;;  %vm10112_vm12 = vcmp.ge.f32.partialorder %v5352_v16, 0.0  ;;  %v5413_v58 = vsel %vm5373_vm2, %v5353_v62, %v5393_v43  ;;  %vm10113_vm11 = vcmp.ge.f32.partialorder %v5354_v53, 0.0  ;;  %v10118_v55 = vld [vmem:[#allocation10_spill] sm:$0xff]  ;;  %v10127_v18 = vld [vmem:[#allocation20_spill] sm:$0xff] }
 0x6a8   : > { %v5412_v14 = vsel %vm10112_vm12, %v5352_v16, %v5392_v39  ;;  %v5414_v38 = vsel %vm10113_vm11, %v5354_v53, %v5394_v63  ;;  %v5415_v40 = vsel %vm5375_vm6, %v5355_v44, %v5395_v56  ;;  %v5416_v23 = vsel %vm5376_vm7, %v5356_v35, %v5396_v20  ;;  %v10119_v53 = vld [vmem:[#allocation11_spill] sm:$0xff]  ;;  %v10126_v45 = vld [vmem:[#allocation18_spill] sm:$0xff]  ;;  %v10128_v39 = vld [vmem:[#allocation21_spill] sm:$0xff] }
 0x6a9   : > { %v5417_v13 = vsel %vm5377_vm8, %v5357_v51, %v5397_v42  ;;  %v5418_v5 = vsel %vm5378_vm5, %v5358_v36, %v5398_v26  ;;  %v5419_v24 = vsel %vm5379_vm15, %v5359_v30, %v5399_v6  ;;  %v5420_v25 = vsel %vm5380_vm3, %v5360_v3, %v5400_v34  ;;  %v10120_v36 = vld [vmem:[#allocation12_spill] sm:$0xff]  ;;  %v10121_v30 = vld [vmem:[#allocation13_spill] sm:$0xff]  ;;  %v10129_v63 = vld [vmem:[#allocation23_spill] sm:$0xff] }
 0x6aa   : > { %v5421_v22 = vsel %vm5381_vm9, %v5361_v37, %v5401_v15  ;;  %vm10114_vm4 = vcmp.ge.f32.partialorder %v9384_v2, 0.0  ;;  %v5423_v51 = vsel %vm5383_vm0, %v9386_v29, %v5403_v19  ;;  %v5424_v62 = vsel %vm5384_vm1, %v9388_v52, %v5404_v50  ;;  %v10124_v52 = vld [vmem:[#allocation16_spill] sm:$0xff]  ;;  %v10131_v42 = vld [vmem:[#allocation25_spill] sm:$0xff] }
 0x6ab   : > { %v5422_v35 = vsel %vm10114_vm4, %v9384_v2, %v5402_v47  ;;  %v5425_v37 = vsel %vm5385_vm13, %v9390_v1, %v5405_v4  ;;  %v5426_v3 = vsel %vm5386_vm10, %v9392_v10, %v5406_v31  ;;  %vm10115_vm2 = vcmp.ge.f32.partialorder %v9394_v8, 0.0  ;;  %v10123_v2 = vld [vmem:[#allocation15_spill] sm:$0xff]  ;;  %v10125_v10 = vld [vmem:[#allocation17_spill] sm:$0xff]  ;;  %v10130_v20 = vld [vmem:[#allocation24_spill] sm:$0xff] }
 0x6ac   : > { %v5427_v16 = vsel %vm10115_vm2, %v9394_v8, %v5407_v33  ;;  %v5428_v61 = vmul.f32 %v5408_v27, %v9828_v11  ;;  %v5429_v28 = vmul.f32 %v5409_v48, %v9830_v49  ;;  %v5430_v17 = vmul.f32 %v5410_v41, %v9831_v54  ;;  %v10122_v54 = vld [vmem:[#allocation14_spill] sm:$0xff] }
 0x6ad   : > { %v5431_v9 = vmul.f32 %v5411_v32, %v9832_v12  ;;  %v5432_v7 = vmul.f32 %v5412_v14, %v10116_v57  ;;  %v5433_v59 = vmul.f32 %v5413_v58, %v10117_v46  ;;  %v5434_v21 = vmul.f32 %v5414_v38, %v10118_v55 }
 0x6ae   : > { %v5435_v44 = vmul.f32 %v5415_v40, %v10119_v53  ;;  %v5436_v11 = vmul.f32 %v5416_v23, %v10120_v36  ;;  %v5437_v49 = vmul.f32 %v5417_v13, %v10121_v30  ;;  %5448 = vst [vmem:[%s9428_s25] sm:$0xff] %v5428_v61  ;;  %5449 = vst [vmem:[%s9428_s25 + $0x8] sm:$0xff] %v5429_v28 }
 0x6af   : > { %v5438_v12 = vmul.f32 %v5418_v5, %v10122_v54  ;;  %v5439_v29 = vmul.f32 %v5419_v24, %v10123_v2  ;;  %v5440_v1 = vmul.f32 %v5420_v25, %v10124_v52  ;;  %v5441_v8 = vmul.f32 %v5421_v22, %v10125_v10  ;;  %5450 = vst [vmem:[%s9428_s25 + $0x10] sm:$0xff] %v5430_v17 }
 0x6b0   : > { %5451 = vst [vmem:[%s9428_s25 + $0x18] sm:$0xff] %v5431_v9  ;;  %5452 = vst [vmem:[%s9428_s25 + $0x20] sm:$0xff] %v5432_v7  ;;  %v5442_v0 = vmul.f32 %v5422_v35, %v10126_v45  ;;  %v5443_v60 = vmul.f32 %v5423_v51, %v10127_v18  ;;  %v5444_v43 = vmul.f32 %v5424_v62, %v10128_v39 }
 0x6b1   : > { %5453 = vst [vmem:[%s9428_s25 + $0x28] sm:$0xff] %v5433_v59  ;;  %v5445_v56 = vmul.f32 %v5425_v37, %v10129_v63  ;;  %5454 = vst [vmem:[%s9428_s25 + $0x30] sm:$0xff] %v5434_v21  ;;  %v5446_v27 = vmul.f32 %v5426_v3, %v10130_v20  ;;  %v5447_v26 = vmul.f32 %v5427_v16, %v10131_v42 }
 0x6b2   : > { %5455 = vst [vmem:[%s9428_s25 + $0x38] sm:$0xff] %v5435_v44  ;;  %5456 = vst [vmem:[%s9428_s25 + $0x40] sm:$0xff] %v5436_v11 }
 0x6b3   : > { %5457 = vst [vmem:[%s9428_s25 + $0x48] sm:$0xff] %v5437_v49  ;;  %5458 = vst [vmem:[%s9428_s25 + $0x50] sm:$0xff] %v5438_v12 }
 0x6b4   : > { %5459 = vst [vmem:[%s9428_s25 + $0x58] sm:$0xff] %v5439_v29  ;;  %5460 = vst [vmem:[%s9428_s25 + $0x60] sm:$0xff] %v5440_v1 }
 0x6b5   : > { %5461 = vst [vmem:[%s9428_s25 + $0x68] sm:$0xff] %v5441_v8  ;;  %5462 = vst [vmem:[%s9428_s25 + $0x70] sm:$0xff] %v5442_v0 }
 0x6b6   : > { %5463 = vst [vmem:[%s9428_s25 + $0x78] sm:$0xff] %v5443_v60  ;;  %5464 = vst [vmem:[%s9428_s25 + $0x80] sm:$0xff] %v5444_v43 }
 0x6b7   : > { %5465 = vst [vmem:[%s9428_s25 + $0x88] sm:$0xff] %v5445_v56  ;;  %5466 = vst [vmem:[%s9428_s25 + $0x90] sm:$0xff] %v5446_v27 }
 0x6b8   : > { %5467 = vst [vmem:[%s9428_s25 + $0x98] sm:$0xff] %v5447_v26 }
 0x6b9 PF: > { %s14_s15 = sadd.s32 1, %s5996_s15  }
 0x6ba   : > { %p11_p4 = scmp.ge.s32.totalorder %s14_s15, 4  }
 0x6bc   :  { %13 = sbr.rel (!%p11_p4) target bundleno = 1 (0x1), region = 69 }

</bundles_post_ra>
